<compile_context>
chip_gen: v5e
topology: v5e:2x2
jax: 0.10.0
libtpu: 0.0.40
codegen_flags: <defaults>
</compile_context>

<pallas_src>
import functools

import jax
import jax.numpy as jnp
from jax import lax
from jax.experimental import pallas as pl
from jax.experimental.pallas import tpu as pltpu


# ---------------------------------------------------------------------------
# Fused kernel
# ---------------------------------------------------------------------------
def _bottleneck_kernel(xt_ref, xc_ref, xb_ref, w1_ref, b1_ref, w2_ref, b2_ref,
                       w3_ref, b3_ref, o_ref, y1p_ref, *, tile_h, pad, width,
                       cdt):
    """One (batch, row-tile) step.

    xt_ref : (pad,    W, Cin)   rows [r0-pad, r0)        (clamped at top border)
    xc_ref : (tile_h, W, Cin)   rows [r0, r0+tile_h)     (also the residual)
    xb_ref : (pad,    W, Cin)   rows [r0+tile_h, +pad)   (clamped at bottom)
    w1_ref : (Cin, C1)          1x1 conv1, BN1 scale folded
    w2_ref : (9, C1, C1)        3x3 conv2 taps (dy*3+dx), BN2 scale folded
    w3_ref : (C1, Cout)         1x1 conv3, BN3 scale folded
    b*_ref : (1, C)             folded BN biases (f32)
    o_ref  : (tile_h, W, Cout)  output row tile
    y1p_ref: (tile_h+2p, W+2p, C1) VMEM scratch holding the padded y1 slab
    """
    t = pl.program_id(1)
    last = pl.num_programs(1) - 1
    cin = xc_ref.shape[-1]
    c1 = w1_ref.shape[-1]
    cout = w3_ref.shape[-1]
    halo_h = tile_h + 2 * pad

    w1 = w1_ref[...]
    b1 = b1_ref[...]

    def conv1(x2d):
        y = jnp.dot(x2d, w1, preferred_element_type=jnp.float32)
        return jnp.maximum(y + b1, 0.0)

    # Zero the pad columns of the y1 scratch (tiny stores; repeated every step
    # so the kernel is correct under any megacore grid sharding).
    y1p_ref[:, 0:pad, :] = jnp.zeros((halo_h, pad, c1), cdt)
    y1p_ref[:, pad + width:, :] = jnp.zeros((halo_h, pad, c1), cdt)

    # conv1 + bn1 + relu.  Halo rows outside the image are zeroed (== conv2's
    # zero padding along H); only the 2*pad halo rows pay any masking work.
    top_valid = (t > 0).astype(jnp.float32)
    bot_valid = (t < last).astype(jnp.float32)
    y1t = conv1(xt_ref[...].reshape(pad * width, cin)) * top_valid
    y1b = conv1(xb_ref[...].reshape(pad * width, cin)) * bot_valid
    y1c = conv1(xc_ref[...].reshape(tile_h * width, cin))
    y1p_ref[0:pad, pad:pad + width, :] = y1t.reshape(pad, width, c1).astype(cdt)
    y1p_ref[pad + tile_h:, pad:pad + width, :] = (
        y1b.reshape(pad, width, c1).astype(cdt))
    y1p_ref[pad:pad + tile_h, pad:pad + width, :] = (
        y1c.reshape(tile_h, width, c1).astype(cdt))

    # conv2 (3x3, dilation=pad, stride=1) + bn2 + relu: nine accumulating
    # K=C1 matmuls on shifted static slices of the padded scratch.
    acc = None
    for dy in range(3):
        for dx in range(3):
            tap = y1p_ref[dy * pad:dy * pad + tile_h,
                          dx * pad:dx * pad + width, :]
            contrib = jnp.dot(tap.reshape(tile_h * width, c1),
                              w2_ref[dy * 3 + dx],
                              preferred_element_type=jnp.float32)
            acc = contrib if acc is None else acc + contrib
    y2 = jnp.maximum(acc + b2_ref[...], 0.0)

    # conv3 (1x1) + bn3 + identity residual + relu.
    res = xc_ref[...].reshape(tile_h * width, cin).astype(jnp.float32)
    out = jnp.dot(y2.astype(cdt), w3_ref[...],
                  preferred_element_type=jnp.float32)
    out = jnp.maximum(out + b3_ref[...] + res, 0.0)
    o_ref[...] = out.reshape(tile_h, width, cout).astype(o_ref.dtype)


# ---------------------------------------------------------------------------
# Wrapper
# ---------------------------------------------------------------------------
def _pick_tile_h(h, pad, requested):
    """Largest divisor of H that is <= requested and a multiple of pad."""
    cands = [d for d in range(1, h + 1) if h % d == 0 and d % pad == 0]
    if not cands:
        # TODO(synk): support a ragged last row tile (e.g. odd H with atrous=2).
        raise NotImplementedError(
            f"H={h} has no row-tile height that is a multiple of atrous={pad}")
    below = [d for d in cands if d <= requested]
    return max(below) if below else min(cands)


def _vmem_limit_bytes(th, pad, width, cin, c1, cout, cdt, out_dtype):
    cb = jnp.dtype(cdt).itemsize
    ob = jnp.dtype(out_dtype).itemsize
    need = 0
    need += 2 * (th + 2 * pad) * width * cin * cb            # x windows (double buffered)
    need += 2 * (cin * c1 + 9 * c1 * c1 + c1 * cout) * cb    # folded weights
    need += 2 * (2 * c1 + cout) * 4                          # biases (f32)
    need += 2 * th * width * cout * ob                       # output tile
    need += (th + 2 * pad) * (width + 2 * pad) * c1 * cb     # y1 scratch
    need += th * width * (2 * c1 + 2 * cout) * 4             # f32 live values
    return int(min(max(2 * need, 32 * 2 ** 20), 64 * 2 ** 20))


def bottleneck_forward_nhwc(x, p, stride=1, atrous=1, tile_h=32,
                            compute_dtype=jnp.bfloat16):
    """Fused Bottleneck forward on an NHWC activation (preferred entry point)."""
    # TODO(synk): the downsample branch / stride>1 of the PyTorch module is an
    # externally supplied nn.Sequential; only downsample=None (identity
    # residual, stride==1) is implemented here.
    assert stride == 1, "identity residual (downsample=None) requires stride==1"

    n, h, w, cin = x.shape
    planes = p["w1"].shape[1]
    cout = p["w3"].shape[1]
    assert cin == cout == 4 * planes, "identity residual needs inplanes == 4*planes"
    assert p["w2"].shape[:2] == (3, 3)
    pad = int(atrous)
    assert pad >= 1 and h >= pad and w >= pad

    th = _pick_tile_h(h, pad, tile_h)
    # Clamped halo loads + boundary masking are only valid when pad <= tile_h
    # and the pad-row halo blocks tile H exactly.
    assert pad <= th and th % pad == 0 and h % th == 0 and h % pad == 0
    num_tiles = h // th
    cdt = jnp.dtype(compute_dtype)

    # Fold BN scale into the conv weights host-side (biases stay separate, f32).
    w1 = (p["w1"] * p["s1"][None, :]).astype(cdt)                      # (Cin, C1)
    w2 = (p["w2"] * p["s2"][None, None, None, :]).astype(cdt)          # (3,3,C1,C1) HWIO
    w2 = w2.reshape(9, planes, planes)                                 # tap dy*3+dx
    w3 = (p["w3"] * p["s3"][None, :]).astype(cdt)                      # (C1, Cout)
    b1 = p["b1"].reshape(1, planes).astype(jnp.float32)
    b2 = p["b2"].reshape(1, planes).astype(jnp.float32)
    b3 = p["b3"].reshape(1, cout).astype(jnp.float32)
    xk = x.astype(cdt)

    thb = th // pad                 # tile height measured in pad-row blocks
    hb_last = h // pad - 1          # last pad-row block index

    kern = functools.partial(_bottleneck_kernel, tile_h=th, pad=pad, width=w,
                             cdt=cdt)

    out = pl.pallas_call(
        kern,
        out_shape=jax.ShapeDtypeStruct((n, h, w, cout), x.dtype),
        grid_spec=pltpu.PrefetchScalarGridSpec(
            num_scalar_prefetch=0,
            grid=(n, num_tiles),
            in_specs=[
                # top halo rows [r0-pad, r0), clamped into the image at t==0
                pl.BlockSpec((None, pad, w, cin),
                             lambda i, t: (i, jnp.maximum(t * thb - 1, 0), 0, 0)),
                # center rows [r0, r0+tile_h) (also the identity residual)
                pl.BlockSpec((None, th, w, cin), lambda i, t: (i, t, 0, 0)),
                # bottom halo rows [r0+tile_h, +pad), clamped at t==last
                pl.BlockSpec((None, pad, w, cin),
                             lambda i, t: (i, jnp.minimum((t + 1) * thb, hb_last),
                                           0, 0)),
                pl.BlockSpec((cin, planes), lambda i, t: (0, 0)),
                pl.BlockSpec((1, planes), lambda i, t: (0, 0)),
                pl.BlockSpec((9, planes, planes), lambda i, t: (0, 0, 0)),
                pl.BlockSpec((1, planes), lambda i, t: (0, 0)),
                pl.BlockSpec((planes, cout), lambda i, t: (0, 0)),
                pl.BlockSpec((1, cout), lambda i, t: (0, 0)),
            ],
            out_specs=pl.BlockSpec((None, th, w, cout), lambda i, t: (i, t, 0, 0)),
            scratch_shapes=[
                pltpu.VMEM((th + 2 * pad, w + 2 * pad, planes), cdt)],
        ),
        compiler_params=pltpu.CompilerParams(
            dimension_semantics=("parallel", "parallel"),
            vmem_limit_bytes=_vmem_limit_bytes(th, pad, w, cin, planes, cout,
                                               cdt, x.dtype)),
    )(xk, xk, xk, w1, b1, w2, b2, w3, b3)
    return out


def bottleneck_forward(x_nchw, p, stride=1, atrous=1, tile_h=32,
                       compute_dtype=jnp.bfloat16):
    """NCHW wrapper for parity with the PyTorch module.

    Prefer bottleneck_forward_nhwc in an NHWC end-to-end model: each transpose
    here is a separate XLA op costing a full HBM pass of the activation.
    """
    x = jnp.transpose(x_nchw, (0, 2, 3, 1))                    # NCHW -> NHWC
    y = bottleneck_forward_nhwc(x, p, stride=stride, atrous=atrous,
                                tile_h=tile_h, compute_dtype=compute_dtype)
    return jnp.transpose(y, (0, 3, 1, 2))                      # NHWC -> NCHW


# ---------------------------------------------------------------------------
# Pure-JAX reference (eval-mode BN folded into scale/bias)
# ---------------------------------------------------------------------------
def reference(x_nchw, p, stride, atrous):
    hi = lax.Precision.HIGHEST
    x = jnp.transpose(x_nchw, (0, 2, 3, 1))
    y = jnp.maximum(jnp.einsum("nhwc,cd->nhwd", x, p["w1"], precision=hi)
                    * p["s1"] + p["b1"], 0.0)
    y = lax.conv_general_dilated(
        y, p["w2"], window_strides=(stride, stride),
        padding=((atrous, atrous), (atrous, atrous)),
        rhs_dilation=(atrous, atrous),
        dimension_numbers=("NHWC", "HWIO", "NHWC"), precision=hi)
    y = jnp.maximum(y * p["s2"] + p["b2"], 0.0)
    y = (jnp.einsum("nhwc,cd->nhwd", y, p["w3"], precision=hi) * p["s3"]
         + p["b3"] + x)
    y = jnp.maximum(y, 0.0)
    return jnp.transpose(y, (0, 3, 1, 2))


# ---------------------------------------------------------------------------
if __name__ == "__main__":
    key = jax.random.PRNGKey(0)
    N, planes = 2, 32                 # Cout = 4*planes = 128 -> lane-dense output
    inplanes = planes * 4             # downsample=None -> identity residual
    H = W = 16
    ks = jax.random.split(key, 16)

    x = jax.random.normal(ks[0], (N, inplanes, H, W), jnp.float32)

    def bn_fold(kg, kb, km, kv, c):
        gamma = jax.random.normal(kg, (c,), jnp.float32) * 0.1 + 1.0
        beta = jax.random.normal(kb, (c,), jnp.float32) * 0.1
        mean = jax.random.normal(km, (c,), jnp.float32) * 0.1
        var = jax.random.uniform(kv, (c,), jnp.float32, minval=0.5, maxval=1.5)
        eps = 1e-5
        s = gamma / jnp.sqrt(var + eps)
        b = beta - mean * s
        return s, b

    w1 = jax.random.normal(ks[1], (inplanes, planes), jnp.float32) * 0.1
    w2 = jax.random.normal(ks[2], (3, 3, planes, planes), jnp.float32) * 0.1
    w3 = jax.random.normal(ks[3], (planes, planes * 4), jnp.float32) * 0.1
    s1, b1 = bn_fold(ks[4], ks[5], ks[6], ks[7], planes)
    s2, b2 = bn_fold(ks[8], ks[9], ks[10], ks[11], planes)
    s3, b3 = bn_fold(ks[12], ks[13], ks[14], ks[15], planes * 4)
    params = dict(w1=w1, w2=w2, w3=w3, s1=s1, b1=b1, s2=s2, b2=b2, s3=s3, b3=b3)

    # f32 path (tight check) and bf16 compute path (loose check), over atrous /
    # tile_h combos that exercise single-tile, boundary and interior tiles.
    for cdt, tol in ((jnp.float32, 1e-3), (jnp.bfloat16, 1e-1)):
        for atrous, th_req in ((1, 16), (1, 4), (2, 8), (2, 4)):
            out = bottleneck_forward(x, params, stride=1, atrous=atrous,
                                     tile_h=th_req, compute_dtype=cdt)
            out = jax.block_until_ready(out)
            ref = reference(x, params, 1, atrous)
            assert out.shape == (N, planes * 4, H, W)
            assert out.dtype == x.dtype
            assert jnp.allclose(out, ref, atol=tol, rtol=tol), (
                f"mismatch (atrous={atrous}, tile_h={th_req}, dtype={cdt})")

    print("KERNEL_OK")
</pallas_src>

<mosaic_0001>
module attributes {stable_mosaic.version = 11 : i64} {
  func.func @_bottleneck_kernel(%arg0: i32, %arg1: i32, %arg2: memref<1x1x16x128xf32, #tpu.memory_space<vmem>>, %arg3: memref<1x16x16x128xf32, #tpu.memory_space<vmem>>, %arg4: memref<1x1x16x128xf32, #tpu.memory_space<vmem>>, %arg5: memref<128x32xf32, #tpu.memory_space<vmem>>, %arg6: memref<1x32xf32, #tpu.memory_space<vmem>>, %arg7: memref<9x32x32xf32, #tpu.memory_space<vmem>>, %arg8: memref<1x32xf32, #tpu.memory_space<vmem>>, %arg9: memref<32x128xf32, #tpu.memory_space<vmem>>, %arg10: memref<1x128xf32, #tpu.memory_space<vmem>>, %arg11: memref<1x16x16x128xf32, #tpu.memory_space<vmem>>, %arg12: memref<18x18x32xf32, #tpu.memory_space<vmem>>) attributes {dimension_semantics = [#tpu.dimension_semantics<parallel>, #tpu.dimension_semantics<parallel>], iteration_bounds = array<i64: 2, 1>, scalar_prefetch = 0 : i64, scratch_operands = 1 : i64, tpu.core_type = #tpu.core_type<tc>, window_params = [{transform_indices = @transform_0, window_bounds = array<i64: 1, 1, 16, 128>}, {transform_indices = @transform_1, window_bounds = array<i64: 1, 16, 16, 128>}, {transform_indices = @transform_2, window_bounds = array<i64: 1, 1, 16, 128>}, {pipeline_mode = #tpu.pipeline_mode<synchronous>, transform_indices = @transform_3, window_bounds = array<i64: 128, 32>}, {pipeline_mode = #tpu.pipeline_mode<synchronous>, transform_indices = @transform_4, window_bounds = array<i64: 1, 32>}, {pipeline_mode = #tpu.pipeline_mode<synchronous>, transform_indices = @transform_5, window_bounds = array<i64: 9, 32, 32>}, {pipeline_mode = #tpu.pipeline_mode<synchronous>, transform_indices = @transform_6, window_bounds = array<i64: 1, 32>}, {pipeline_mode = #tpu.pipeline_mode<synchronous>, transform_indices = @transform_7, window_bounds = array<i64: 32, 128>}, {pipeline_mode = #tpu.pipeline_mode<synchronous>, transform_indices = @transform_8, window_bounds = array<i64: 1, 128>}, {transform_indices = @transform_9, window_bounds = array<i64: 1, 16, 16, 128>}]} {
    %c0 = arith.constant 0 : index
    %c0_0 = arith.constant 0 : index
    %0 = vector.load %arg5[%c0, %c0_0] : memref<128x32xf32, #tpu.memory_space<vmem>>, vector<128x32xf32>
    %c0_1 = arith.constant 0 : index
    %c0_2 = arith.constant 0 : index
    %1 = vector.load %arg6[%c0_1, %c0_2] : memref<1x32xf32, #tpu.memory_space<vmem>>, vector<1x32xf32>
    %cst = arith.constant 0.000000e+00 : f32
    %2 = vector.broadcast %cst : f32 to vector<18x1x32xf32>
    %c0_3 = arith.constant 0 : index
    %c0_4 = arith.constant 0 : index
    %c0_5 = arith.constant 0 : index
    %3 = vector.load %arg12[%c0_3, %c0_4, %c0_5] : memref<18x18x32xf32, #tpu.memory_space<vmem>>, vector<18x1x32xf32>
    tpu.vector_store %arg12[%c0_3, %c0_4, %c0_5], %2 {strides = array<i32>} : memref<18x18x32xf32, #tpu.memory_space<vmem>>, vector<18x1x32xf32>,
    %cst_6 = arith.constant 0.000000e+00 : f32
    %4 = vector.broadcast %cst_6 : f32 to vector<18x1x32xf32>
    %c0_7 = arith.constant 0 : index
    %c17 = arith.constant 17 : index
    %c0_8 = arith.constant 0 : index
    %5 = vector.load %arg12[%c0_7, %c17, %c0_8] : memref<18x18x32xf32, #tpu.memory_space<vmem>>, vector<18x1x32xf32>
    tpu.vector_store %arg12[%c0_7, %c17, %c0_8], %4 {strides = array<i32>} : memref<18x18x32xf32, #tpu.memory_space<vmem>>, vector<18x1x32xf32>,
    %c0_i32 = arith.constant 0 : i32
    %6 = arith.cmpi sgt, %arg1, %c0_i32 : i32
    %7 = arith.extui %6 : i1 to i32
    %8 = arith.sitofp %7 : i32 to f32
    %c0_i32_9 = arith.constant 0 : i32
    %9 = arith.cmpi slt, %arg1, %c0_i32_9 : i32
    %10 = arith.extui %9 : i1 to i32
    %11 = arith.sitofp %10 : i32 to f32
    %c0_10 = arith.constant 0 : index
    %c0_11 = arith.constant 0 : index
    %c0_12 = arith.constant 0 : index
    %c0_13 = arith.constant 0 : index
    %12 = vector.load %arg2[%c0_10, %c0_11, %c0_12, %c0_13] : memref<1x1x16x128xf32, #tpu.memory_space<vmem>>, vector<1x1x16x128xf32>
    %13 = vector.shape_cast %12 : vector<1x1x16x128xf32> to vector<1x16x128xf32>
    %14 = vector.shape_cast %13 : vector<1x16x128xf32> to vector<16x128xf32>
    %cst_14 = arith.constant dense<0.000000e+00> : vector<16x32xf32>
    %15 = tpu.matmul %14, %0, %cst_14 {dimension_numbers = #tpu.dot_dimension_numbers<[1], [0], [0], [1], [0, 0, 1, 1], [], []>} : vector<16x128xf32>, vector<128x32xf32>, vector<16x32xf32> -> vector<16x32xf32>
    %16 = vector.broadcast %1 : vector<1x32xf32> to vector<16x32xf32>
    %17 = arith.addf %15, %16 : vector<16x32xf32>
    %cst_15 = arith.constant 0.000000e+00 : f32
    %18 = vector.broadcast %cst_15 : f32 to vector<16x32xf32>
    %19 = arith.maximumf %17, %18 : vector<16x32xf32>
    %20 = vector.broadcast %8 : f32 to vector<16x32xf32>
    %21 = arith.mulf %19, %20 : vector<16x32xf32>
    %c0_16 = arith.constant 0 : index
    %c0_17 = arith.constant 0 : index
    %c0_18 = arith.constant 0 : index
    %c0_19 = arith.constant 0 : index
    %22 = vector.load %arg4[%c0_16, %c0_17, %c0_18, %c0_19] : memref<1x1x16x128xf32, #tpu.memory_space<vmem>>, vector<1x1x16x128xf32>
    %23 = vector.shape_cast %22 : vector<1x1x16x128xf32> to vector<1x16x128xf32>
    %24 = vector.shape_cast %23 : vector<1x16x128xf32> to vector<16x128xf32>
    %cst_20 = arith.constant dense<0.000000e+00> : vector<16x32xf32>
    %25 = tpu.matmul %24, %0, %cst_20 {dimension_numbers = #tpu.dot_dimension_numbers<[1], [0], [0], [1], [0, 0, 1, 1], [], []>} : vector<16x128xf32>, vector<128x32xf32>, vector<16x32xf32> -> vector<16x32xf32>
    %26 = vector.broadcast %1 : vector<1x32xf32> to vector<16x32xf32>
    %27 = arith.addf %25, %26 : vector<16x32xf32>
    %cst_21 = arith.constant 0.000000e+00 : f32
    %28 = vector.broadcast %cst_21 : f32 to vector<16x32xf32>
    %29 = arith.maximumf %27, %28 : vector<16x32xf32>
    %30 = vector.broadcast %11 : f32 to vector<16x32xf32>
    %31 = arith.mulf %29, %30 : vector<16x32xf32>
    %c0_22 = arith.constant 0 : index
    %c0_23 = arith.constant 0 : index
    %c0_24 = arith.constant 0 : index
    %c0_25 = arith.constant 0 : index
    %32 = vector.load %arg3[%c0_22, %c0_23, %c0_24, %c0_25] : memref<1x16x16x128xf32, #tpu.memory_space<vmem>>, vector<1x16x16x128xf32>
    %33 = vector.shape_cast %32 : vector<1x16x16x128xf32> to vector<16x16x128xf32>
    %34 = vector.shape_cast %33 : vector<16x16x128xf32> to vector<256x128xf32>
    %cst_26 = arith.constant dense<0.000000e+00> : vector<256x32xf32>
    %35 = tpu.matmul %34, %0, %cst_26 {dimension_numbers = #tpu.dot_dimension_numbers<[1], [0], [0], [1], [0, 0, 1, 1], [], []>} : vector<256x128xf32>, vector<128x32xf32>, vector<256x32xf32> -> vector<256x32xf32>
    %36 = vector.broadcast %1 : vector<1x32xf32> to vector<256x32xf32>
    %37 = arith.addf %35, %36 : vector<256x32xf32>
    %cst_27 = arith.constant 0.000000e+00 : f32
    %38 = vector.broadcast %cst_27 : f32 to vector<256x32xf32>
    %39 = arith.maximumf %37, %38 : vector<256x32xf32>
    %40 = vector.shape_cast %21 : vector<16x32xf32> to vector<1x16x32xf32>
    %c0_28 = arith.constant 0 : index
    %c1 = arith.constant 1 : index
    %c0_29 = arith.constant 0 : index
    %41 = vector.load %arg12[%c0_28, %c1, %c0_29] : memref<18x18x32xf32, #tpu.memory_space<vmem>>, vector<1x16x32xf32>
    tpu.vector_store %arg12[%c0_28, %c1, %c0_29], %40 {strides = array<i32>} : memref<18x18x32xf32, #tpu.memory_space<vmem>>, vector<1x16x32xf32>,
    %42 = vector.shape_cast %31 : vector<16x32xf32> to vector<1x16x32xf32>
    %c17_30 = arith.constant 17 : index
    %c1_31 = arith.constant 1 : index
    %c0_32 = arith.constant 0 : index
    %43 = vector.load %arg12[%c17_30, %c1_31, %c0_32] : memref<18x18x32xf32, #tpu.memory_space<vmem>>, vector<1x16x32xf32>
    tpu.vector_store %arg12[%c17_30, %c1_31, %c0_32], %42 {strides = array<i32>} : memref<18x18x32xf32, #tpu.memory_space<vmem>>, vector<1x16x32xf32>,
    %44 = vector.shape_cast %39 : vector<256x32xf32> to vector<16x16x32xf32>
    %c1_33 = arith.constant 1 : index
    %c1_34 = arith.constant 1 : index
    %c0_35 = arith.constant 0 : index
    %45 = vector.load %arg12[%c1_33, %c1_34, %c0_35] : memref<18x18x32xf32, #tpu.memory_space<vmem>>, vector<16x16x32xf32>
    tpu.vector_store %arg12[%c1_33, %c1_34, %c0_35], %44 {strides = array<i32>} : memref<18x18x32xf32, #tpu.memory_space<vmem>>, vector<16x16x32xf32>,
    %c0_36 = arith.constant 0 : index
    %c0_37 = arith.constant 0 : index
    %c0_38 = arith.constant 0 : index
    %46 = vector.load %arg12[%c0_36, %c0_37, %c0_38] : memref<18x18x32xf32, #tpu.memory_space<vmem>>, vector<16x16x32xf32>
    %47 = vector.shape_cast %46 : vector<16x16x32xf32> to vector<256x32xf32>
    %c0_39 = arith.constant 0 : index
    %c0_40 = arith.constant 0 : index
    %c0_41 = arith.constant 0 : index
    %48 = vector.load %arg7[%c0_39, %c0_40, %c0_41] : memref<9x32x32xf32, #tpu.memory_space<vmem>>, vector<1x32x32xf32>
    %49 = vector.shape_cast %48 : vector<1x32x32xf32> to vector<32x32xf32>
    %cst_42 = arith.constant dense<0.000000e+00> : vector<256x32xf32>
    %50 = tpu.matmul %47, %49, %cst_42 {dimension_numbers = #tpu.dot_dimension_numbers<[1], [0], [0], [1], [0, 0, 1, 1], [], []>} : vector<256x32xf32>, vector<32x32xf32>, vector<256x32xf32> -> vector<256x32xf32>
    %c0_43 = arith.constant 0 : index
    %c1_44 = arith.constant 1 : index
    %c0_45 = arith.constant 0 : index
    %51 = vector.load %arg12[%c0_43, %c1_44, %c0_45] : memref<18x18x32xf32, #tpu.memory_space<vmem>>, vector<16x16x32xf32>
    %52 = vector.shape_cast %51 : vector<16x16x32xf32> to vector<256x32xf32>
    %c1_46 = arith.constant 1 : index
    %c0_47 = arith.constant 0 : index
    %c0_48 = arith.constant 0 : index
    %53 = vector.load %arg7[%c1_46, %c0_47, %c0_48] : memref<9x32x32xf32, #tpu.memory_space<vmem>>, vector<1x32x32xf32>
    %54 = vector.shape_cast %53 : vector<1x32x32xf32> to vector<32x32xf32>
    %cst_49 = arith.constant dense<0.000000e+00> : vector<256x32xf32>
    %55 = tpu.matmul %52, %54, %cst_49 {dimension_numbers = #tpu.dot_dimension_numbers<[1], [0], [0], [1], [0, 0, 1, 1], [], []>} : vector<256x32xf32>, vector<32x32xf32>, vector<256x32xf32> -> vector<256x32xf32>
    %56 = arith.addf %50, %55 : vector<256x32xf32>
    %c0_50 = arith.constant 0 : index
    %c2 = arith.constant 2 : index
    %c0_51 = arith.constant 0 : index
    %57 = vector.load %arg12[%c0_50, %c2, %c0_51] : memref<18x18x32xf32, #tpu.memory_space<vmem>>, vector<16x16x32xf32>
    %58 = vector.shape_cast %57 : vector<16x16x32xf32> to vector<256x32xf32>
    %c2_52 = arith.constant 2 : index
    %c0_53 = arith.constant 0 : index
    %c0_54 = arith.constant 0 : index
    %59 = vector.load %arg7[%c2_52, %c0_53, %c0_54] : memref<9x32x32xf32, #tpu.memory_space<vmem>>, vector<1x32x32xf32>
    %60 = vector.shape_cast %59 : vector<1x32x32xf32> to vector<32x32xf32>
    %cst_55 = arith.constant dense<0.000000e+00> : vector<256x32xf32>
    %61 = tpu.matmul %58, %60, %cst_55 {dimension_numbers = #tpu.dot_dimension_numbers<[1], [0], [0], [1], [0, 0, 1, 1], [], []>} : vector<256x32xf32>, vector<32x32xf32>, vector<256x32xf32> -> vector<256x32xf32>
    %62 = arith.addf %56, %61 : vector<256x32xf32>
    %c1_56 = arith.constant 1 : index
    %c0_57 = arith.constant 0 : index
    %c0_58 = arith.constant 0 : index
    %63 = vector.load %arg12[%c1_56, %c0_57, %c0_58] : memref<18x18x32xf32, #tpu.memory_space<vmem>>, vector<16x16x32xf32>
    %64 = vector.shape_cast %63 : vector<16x16x32xf32> to vector<256x32xf32>
    %c3 = arith.constant 3 : index
    %c0_59 = arith.constant 0 : index
    %c0_60 = arith.constant 0 : index
    %65 = vector.load %arg7[%c3, %c0_59, %c0_60] : memref<9x32x32xf32, #tpu.memory_space<vmem>>, vector<1x32x32xf32>
    %66 = vector.shape_cast %65 : vector<1x32x32xf32> to vector<32x32xf32>
    %cst_61 = arith.constant dense<0.000000e+00> : vector<256x32xf32>
    %67 = tpu.matmul %64, %66, %cst_61 {dimension_numbers = #tpu.dot_dimension_numbers<[1], [0], [0], [1], [0, 0, 1, 1], [], []>} : vector<256x32xf32>, vector<32x32xf32>, vector<256x32xf32> -> vector<256x32xf32>
    %68 = arith.addf %62, %67 : vector<256x32xf32>
    %c1_62 = arith.constant 1 : index
    %c1_63 = arith.constant 1 : index
    %c0_64 = arith.constant 0 : index
    %69 = vector.load %arg12[%c1_62, %c1_63, %c0_64] : memref<18x18x32xf32, #tpu.memory_space<vmem>>, vector<16x16x32xf32>
    %70 = vector.shape_cast %69 : vector<16x16x32xf32> to vector<256x32xf32>
    %c4 = arith.constant 4 : index
    %c0_65 = arith.constant 0 : index
    %c0_66 = arith.constant 0 : index
    %71 = vector.load %arg7[%c4, %c0_65, %c0_66] : memref<9x32x32xf32, #tpu.memory_space<vmem>>, vector<1x32x32xf32>
    %72 = vector.shape_cast %71 : vector<1x32x32xf32> to vector<32x32xf32>
    %cst_67 = arith.constant dense<0.000000e+00> : vector<256x32xf32>
    %73 = tpu.matmul %70, %72, %cst_67 {dimension_numbers = #tpu.dot_dimension_numbers<[1], [0], [0], [1], [0, 0, 1, 1], [], []>} : vector<256x32xf32>, vector<32x32xf32>, vector<256x32xf32> -> vector<256x32xf32>
    %74 = arith.addf %68, %73 : vector<256x32xf32>
    %c1_68 = arith.constant 1 : index
    %c2_69 = arith.constant 2 : index
    %c0_70 = arith.constant 0 : index
    %75 = vector.load %arg12[%c1_68, %c2_69, %c0_70] : memref<18x18x32xf32, #tpu.memory_space<vmem>>, vector<16x16x32xf32>
    %76 = vector.shape_cast %75 : vector<16x16x32xf32> to vector<256x32xf32>
    %c5 = arith.constant 5 : index
    %c0_71 = arith.constant 0 : index
    %c0_72 = arith.constant 0 : index
    %77 = vector.load %arg7[%c5, %c0_71, %c0_72] : memref<9x32x32xf32, #tpu.memory_space<vmem>>, vector<1x32x32xf32>
    %78 = vector.shape_cast %77 : vector<1x32x32xf32> to vector<32x32xf32>
    %cst_73 = arith.constant dense<0.000000e+00> : vector<256x32xf32>
    %79 = tpu.matmul %76, %78, %cst_73 {dimension_numbers = #tpu.dot_dimension_numbers<[1], [0], [0], [1], [0, 0, 1, 1], [], []>} : vector<256x32xf32>, vector<32x32xf32>, vector<256x32xf32> -> vector<256x32xf32>
    %80 = arith.addf %74, %79 : vector<256x32xf32>
    %c2_74 = arith.constant 2 : index
    %c0_75 = arith.constant 0 : index
    %c0_76 = arith.constant 0 : index
    %81 = vector.load %arg12[%c2_74, %c0_75, %c0_76] : memref<18x18x32xf32, #tpu.memory_space<vmem>>, vector<16x16x32xf32>
    %82 = vector.shape_cast %81 : vector<16x16x32xf32> to vector<256x32xf32>
    %c6 = arith.constant 6 : index
    %c0_77 = arith.constant 0 : index
    %c0_78 = arith.constant 0 : index
    %83 = vector.load %arg7[%c6, %c0_77, %c0_78] : memref<9x32x32xf32, #tpu.memory_space<vmem>>, vector<1x32x32xf32>
    %84 = vector.shape_cast %83 : vector<1x32x32xf32> to vector<32x32xf32>
    %cst_79 = arith.constant dense<0.000000e+00> : vector<256x32xf32>
    %85 = tpu.matmul %82, %84, %cst_79 {dimension_numbers = #tpu.dot_dimension_numbers<[1], [0], [0], [1], [0, 0, 1, 1], [], []>} : vector<256x32xf32>, vector<32x32xf32>, vector<256x32xf32> -> vector<256x32xf32>
    %86 = arith.addf %80, %85 : vector<256x32xf32>
    %c2_80 = arith.constant 2 : index
    %c1_81 = arith.constant 1 : index
    %c0_82 = arith.constant 0 : index
    %87 = vector.load %arg12[%c2_80, %c1_81, %c0_82] : memref<18x18x32xf32, #tpu.memory_space<vmem>>, vector<16x16x32xf32>
    %88 = vector.shape_cast %87 : vector<16x16x32xf32> to vector<256x32xf32>
    %c7 = arith.constant 7 : index
    %c0_83 = arith.constant 0 : index
    %c0_84 = arith.constant 0 : index
    %89 = vector.load %arg7[%c7, %c0_83, %c0_84] : memref<9x32x32xf32, #tpu.memory_space<vmem>>, vector<1x32x32xf32>
    %90 = vector.shape_cast %89 : vector<1x32x32xf32> to vector<32x32xf32>
    %cst_85 = arith.constant dense<0.000000e+00> : vector<256x32xf32>
    %91 = tpu.matmul %88, %90, %cst_85 {dimension_numbers = #tpu.dot_dimension_numbers<[1], [0], [0], [1], [0, 0, 1, 1], [], []>} : vector<256x32xf32>, vector<32x32xf32>, vector<256x32xf32> -> vector<256x32xf32>
    %92 = arith.addf %86, %91 : vector<256x32xf32>
    %c2_86 = arith.constant 2 : index
    %c2_87 = arith.constant 2 : index
    %c0_88 = arith.constant 0 : index
    %93 = vector.load %arg12[%c2_86, %c2_87, %c0_88] : memref<18x18x32xf32, #tpu.memory_space<vmem>>, vector<16x16x32xf32>
    %94 = vector.shape_cast %93 : vector<16x16x32xf32> to vector<256x32xf32>
    %c8 = arith.constant 8 : index
    %c0_89 = arith.constant 0 : index
    %c0_90 = arith.constant 0 : index
    %95 = vector.load %arg7[%c8, %c0_89, %c0_90] : memref<9x32x32xf32, #tpu.memory_space<vmem>>, vector<1x32x32xf32>
    %96 = vector.shape_cast %95 : vector<1x32x32xf32> to vector<32x32xf32>
    %cst_91 = arith.constant dense<0.000000e+00> : vector<256x32xf32>
    %97 = tpu.matmul %94, %96, %cst_91 {dimension_numbers = #tpu.dot_dimension_numbers<[1], [0], [0], [1], [0, 0, 1, 1], [], []>} : vector<256x32xf32>, vector<32x32xf32>, vector<256x32xf32> -> vector<256x32xf32>
    %98 = arith.addf %92, %97 : vector<256x32xf32>
    %c0_92 = arith.constant 0 : index
    %c0_93 = arith.constant 0 : index
    %99 = vector.load %arg8[%c0_92, %c0_93] : memref<1x32xf32, #tpu.memory_space<vmem>>, vector<1x32xf32>
    %100 = vector.broadcast %99 : vector<1x32xf32> to vector<256x32xf32>
    %101 = arith.addf %98, %100 : vector<256x32xf32>
    %cst_94 = arith.constant 0.000000e+00 : f32
    %102 = vector.broadcast %cst_94 : f32 to vector<256x32xf32>
    %103 = arith.maximumf %101, %102 : vector<256x32xf32>
    %c0_95 = arith.constant 0 : index
    %c0_96 = arith.constant 0 : index
    %c0_97 = arith.constant 0 : index
    %c0_98 = arith.constant 0 : index
    %104 = vector.load %arg3[%c0_95, %c0_96, %c0_97, %c0_98] : memref<1x16x16x128xf32, #tpu.memory_space<vmem>>, vector<1x16x16x128xf32>
    %105 = vector.shape_cast %104 : vector<1x16x16x128xf32> to vector<16x16x128xf32>
    %106 = vector.shape_cast %105 : vector<16x16x128xf32> to vector<256x128xf32>
    %c0_99 = arith.constant 0 : index
    %c0_100 = arith.constant 0 : index
    %107 = vector.load %arg9[%c0_99, %c0_100] : memref<32x128xf32, #tpu.memory_space<vmem>>, vector<32x128xf32>
    %cst_101 = arith.constant dense<0.000000e+00> : vector<256x128xf32>
    %108 = tpu.matmul %103, %107, %cst_101 {dimension_numbers = #tpu.dot_dimension_numbers<[1], [0], [0], [1], [0, 0, 1, 1], [], []>} : vector<256x32xf32>, vector<32x128xf32>, vector<256x128xf32> -> vector<256x128xf32>
    %c0_102 = arith.constant 0 : index
    %c0_103 = arith.constant 0 : index
    %109 = vector.load %arg10[%c0_102, %c0_103] : memref<1x128xf32, #tpu.memory_space<vmem>>, vector<1x128xf32>
    %110 = vector.broadcast %109 : vector<1x128xf32> to vector<256x128xf32>
    %111 = arith.addf %108, %110 : vector<256x128xf32>
    %112 = arith.addf %111, %106 : vector<256x128xf32>
    %cst_104 = arith.constant 0.000000e+00 : f32
    %113 = vector.broadcast %cst_104 : f32 to vector<256x128xf32>
    %114 = arith.maximumf %112, %113 : vector<256x128xf32>
    %115 = vector.shape_cast %114 : vector<256x128xf32> to vector<16x16x128xf32>
    %c0_105 = arith.constant 0 : index
    %c0_106 = arith.constant 0 : index
    %c0_107 = arith.constant 0 : index
    %c0_108 = arith.constant 0 : index
    %116 = vector.load %arg11[%c0_105, %c0_106, %c0_107, %c0_108] : memref<1x16x16x128xf32, #tpu.memory_space<vmem>>, vector<1x16x16x128xf32>
    %117 = vector.shape_cast %116 : vector<1x16x16x128xf32> to vector<16x16x128xf32>
    %118 = vector.shape_cast %115 : vector<16x16x128xf32> to vector<1x16x16x128xf32>
    tpu.vector_store %arg11[%c0_105, %c0_106, %c0_107, %c0_108], %118 {strides = array<i32>} : memref<1x16x16x128xf32, #tpu.memory_space<vmem>>, vector<1x16x16x128xf32>,
    return
  }
  func.func @transform_0(%arg0: i32, %arg1: i32) -> (i32, i32, i32, i32) {
    %c16_i32 = arith.constant 16 : i32
    %0 = arith.muli %arg1, %c16_i32 : i32
    %c1_i32 = arith.constant 1 : i32
    %1 = arith.subi %0, %c1_i32 : i32
    %c0_i32 = arith.constant 0 : i32
    %2 = arith.maxsi %1, %c0_i32 : i32
    %c0_i32_0 = arith.constant 0 : i32
    %c0_i32_1 = arith.constant 0 : i32
    %c0_i32_2 = arith.constant 0 : i32
    return %arg0, %2, %c0_i32_0, %c0_i32_1 : i32, i32, i32, i32
  }
  func.func @transform_1(%arg0: i32, %arg1: i32) -> (i32, i32, i32, i32) {
    %c0_i32 = arith.constant 0 : i32
    %c0_i32_0 = arith.constant 0 : i32
    %c0_i32_1 = arith.constant 0 : i32
    return %arg0, %arg1, %c0_i32, %c0_i32_0 : i32, i32, i32, i32
  }
  func.func @transform_2(%arg0: i32, %arg1: i32) -> (i32, i32, i32, i32) {
    %c1_i32 = arith.constant 1 : i32
    %0 = arith.addi %arg1, %c1_i32 : i32
    %c16_i32 = arith.constant 16 : i32
    %1 = arith.muli %0, %c16_i32 : i32
    %c15_i32 = arith.constant 15 : i32
    %2 = arith.minsi %1, %c15_i32 : i32
    %c0_i32 = arith.constant 0 : i32
    %c0_i32_0 = arith.constant 0 : i32
    %c0_i32_1 = arith.constant 0 : i32
    return %arg0, %2, %c0_i32, %c0_i32_0 : i32, i32, i32, i32
  }
  func.func @transform_3(%arg0: i32, %arg1: i32) -> (i32, i32) {
    %c0_i32 = arith.constant 0 : i32
    %c0_i32_0 = arith.constant 0 : i32
    %c0_i32_1 = arith.constant 0 : i32
    return %c0_i32, %c0_i32_0 : i32, i32
  }
  func.func @transform_4(%arg0: i32, %arg1: i32) -> (i32, i32) {
    %c0_i32 = arith.constant 0 : i32
    %c0_i32_0 = arith.constant 0 : i32
    %c0_i32_1 = arith.constant 0 : i32
    return %c0_i32, %c0_i32_0 : i32, i32
  }
  func.func @transform_5(%arg0: i32, %arg1: i32) -> (i32, i32, i32) {
    %c0_i32 = arith.constant 0 : i32
    %c0_i32_0 = arith.constant 0 : i32
    %c0_i32_1 = arith.constant 0 : i32
    %c0_i32_2 = arith.constant 0 : i32
    return %c0_i32, %c0_i32_0, %c0_i32_1 : i32, i32, i32
  }
  func.func @transform_6(%arg0: i32, %arg1: i32) -> (i32, i32) {
    %c0_i32 = arith.constant 0 : i32
    %c0_i32_0 = arith.constant 0 : i32
    %c0_i32_1 = arith.constant 0 : i32
    return %c0_i32, %c0_i32_0 : i32, i32
  }
  func.func @transform_7(%arg0: i32, %arg1: i32) -> (i32, i32) {
    %c0_i32 = arith.constant 0 : i32
    %c0_i32_0 = arith.constant 0 : i32
    %c0_i32_1 = arith.constant 0 : i32
    return %c0_i32, %c0_i32_0 : i32, i32
  }
  func.func @transform_8(%arg0: i32, %arg1: i32) -> (i32, i32) {
    %c0_i32 = arith.constant 0 : i32
    %c0_i32_0 = arith.constant 0 : i32
    %c0_i32_1 = arith.constant 0 : i32
    return %c0_i32, %c0_i32_0 : i32, i32
  }
  func.func @transform_9(%arg0: i32, %arg1: i32) -> (i32, i32, i32, i32) {
    %c0_i32 = arith.constant 0 : i32
    %c0_i32_0 = arith.constant 0 : i32
    %c0_i32_1 = arith.constant 0 : i32
    return %arg0, %arg1, %c0_i32, %c0_i32_0 : i32, i32, i32, i32
  }
}

</mosaic_0001>

<bundles_post_ra>
// kernel: tpu_custom_call.1
= control target key start
LH: loop header
LB: loop body
LE: loop exit
PB: predicated region body
PF: predicated region fallthrough
CT: control target
= control target key end

     0   :  { %s6437_s0 = inlined_call_operand.hbm [shape: f32[2,16,16,128], index: 0, kind: input, shape index: {}]   ;;  %s6438_s1 = inlined_call_operand.hbm [shape: f32[2,16,16,128], index: 1, kind: input, shape index: {}]   ;;  %s6439_s2 = inlined_call_operand.hbm [shape: f32[2,16,16,128], index: 2, kind: input, shape index: {}]   ;;  %s6440_s3 = inlined_call_operand.vmem [shape: f32[128,32], index: 3, kind: input, shape index: {}]   ;;  %s6441_s4 = inlined_call_operand.vmem [shape: f32[1,32], index: 4, kind: input, shape index: {}]   ;;  %s6442_s5 = inlined_call_operand.hbm [shape: f32[9,32,32], index: 5, kind: input, shape index: {}]   ;;  %s6443_s6 = inlined_call_operand.vmem [shape: f32[1,32], index: 6, kind: input, shape index: {}]   ;;  %s6444_s7 = inlined_call_operand.vmem [shape: f32[32,128], index: 7, kind: input, shape index: {}]   ;;  %s6445_s8 = inlined_call_operand.vmem [shape: f32[1,128], index: 8, kind: input, shape index: {}]   ;;  %s6446_s9 = inlined_call_operand.hbm [shape: f32[2,16,16,128], index: 9, kind: output, shape index: {}]  }
   0x1   :  { %6460 = sst [smem:[#allocation94_spill]] %s6437_s0 }
   0x2   :  { %6461 = sst [smem:[#allocation95_spill]] %s6438_s1 }
   0x3   :  { %6462 = sst [smem:[#allocation96_spill]] %s6442_s5 }
   0x4   :  { %14 = vsyncpa [#allocation4], 0 }
   0x5   :  { %16 = vsyncpa [#allocation4 + $0x1], 0 }
   0x6   :  { %17 = vsyncpa [#allocation7], 0 }
   0x7   :  { %19 = vsyncpa [#allocation7 + $0x1], 0 }
   0x8   :  { %20 = vsyncpa [#allocation10], 0 }
   0x9   :  { %21 = vsyncpa [#allocation5], 0 }
   0xa   :  { %23 = vsyncpa [#allocation5 + $0x1], 0  ;;  %s4601_s30 = smov 0   ;;  %s4603_s10 = smov 0  }
   0xb   :  { %s4605_s11 = smov 0   ;;  %s4607_s12 = smov 0  }
   0xc   :  { %s4609_s13 = smov 0   ;;  %s4611_s14 = smov 0  }
   0xd LB: > { %6463 = sst [smem:[#allocation16_spill]] %s4523_s30  ;;  %s41_s15 = sadd.s32 1, %s4539_s13  ;;  %s4543_s14 = sphi %s4611_s14, %s29_s14   ;;  %s4539_s13 = sphi %s4609_s13, %s6632_s13   ;;  %s4535_s12 = sphi %s4607_s12, %s6631_s12   ;;  %s4531_s11 = sphi %s4605_s11, %s6630_s11   ;;  %s4527_s10 = sphi %s4603_s10, %s6634_s10   ;;  %s4523_s30 = sphi %s4601_s30, %s6633_s30  }
   0xe   : > { %6464 = sst [smem:[#allocation17_spill]] %s4531_s11  ;;  %s58_s16 = sadd.s32 1, %s4531_s11 }
   0xf   : > { %6465 = sst [smem:[#allocation18_spill]] %s4539_s13  ;;  %p43_p0 = scmp.ge.s32.totalorder %s41_s15, 2 }
  0x10   : > { %6466 = sst [smem:[#allocation19_spill]] %s4543_s14  ;;  %p65_p1 = scmp.ne.s32.totalorder %s4531_s11, %s4527_s10 }
  0x11   : > { %p66_p2 = scmp.eq.s32.totalorder %s4543_s14, 0  ;;  %s6636_s15 = smov (%p43_p0, %s41_s15), 0 }
  0x12   : > { %6467 = sst [smem:[#allocation20_spill]] %s6636_s15  ;;  %s53_s17 = ssub.s32 %s4539_s13, %s6636_s15 }
  0x13   : > { %p67_p3 = por %p66_p2, %p65_p1  ;;  %p3871_p4 = scmp.ge.s32.totalorder %s4543_s14, 2 }
  0x14   : > { %p56_p5 = scmp.eq.s32.totalorder %s53_s17, 0  ;;  %p4273_p6 = scmp.lt.s32.totalorder %s4543_s14, 2 }
  0x15   : > { %s4646_s18 = sand.u32 1, %s4531_s11   ;;  %s4649_s19 = sshll.u32 %s4539_s13, 8 }
  0x16   : > { %s4652_s20 = scalar_select %p56_p5, %s4531_s11, %s58_s16  }
  0x17   : > { %p4654_p7 = pnand %p4273_p6, %p67_p3  ;;  %s370_s22 = sand.u32 1, %s4543_s14  }
  0x18   : > { %6468 = sst [smem:[#allocation21_spill]] %s4652_s20  ;;  %s3875_s23 = sshll.u32 %s4646_s18, 8 }
  0x19   : > { %s6470_s1 = sld [smem:[#allocation95_spill]]  ;;  %s374_s27 = scalar_lea.vmem [#allocation6], %s3875_s23 }
  0x1a   : > { %s385_s28 = sshll.u32 %s374_s27, 4  ;;  %s4664_s16 = scalar_lea.sflag [#allocation7], %s370_s22  ;;  %s386_s28 = int_to_ptr.vmem [resolvable:$true] %s385_s28 }
  0x1b   : > { %s6448_s17 = smov 128   ;;  %s6450_s15 = smov 8  }
  0x1c   : > { %s4673_s24 = sadd.s32 4294967295, %s4543_s14   ;;  %s3868_s23 = sadd.s32 4294967294, %s4543_s14  }
  0x1d   : > { %p71_p8 = scmp.ne.s32.totalorder %s4527_s10, %s4523_s30  ;;  %p72_p9 = scmp.eq.s32.totalorder %s4673_s24, 0 }
  0x1e   : > { %p287_p10 = scmp.eq.s32.totalorder %s4673_s24, 1  ;;  %p293_p11 = scmp.eq.s32.totalorder %s3868_s23, 1 }
  0x1f   : > { %s382_s26 = scalar_lea.hbm %s6470_s1, %s4649_s19  ;;  %p3869_p12 = scmp.ge.s32.totalorder %s4543_s14, 1 }
  0x20   : > { %s383_s29 = sshll.u32 %s382_s26, 4  ;;  %p4683_p13 = por %p72_p9, %p71_p8  ;;  %s384_s29 = int_to_ptr.hbm [resolvable:$true] %s383_s29 }
  0x21   : > { %4264 = dma.hbm_to_vmem [thread:$0]  (!%p4654_p7), %s384_s29, 4096, %s386_s28, %s4664_s16, %s6448_s17, %s6448_s17, %s6450_s15  }
  0x22   : > { %p4690_p0 = por %p287_p10, %p65_p1  ;;  %p4694_p2 = por %p293_p11, %p71_p8 }
  0x23   : > { %p300_p3 = scmp.lt.s32.totalorder %s4543_s14, 3  ;;  %s6476_s5 = sld [smem:[#allocation96_spill]] }
  0x24   : > { %s6472_s25 = scalar_select %p4690_p0, 1, 0 }
  0x25   : > { %s6474_s26 = scalar_select %p4694_p2, 1, 0 }
  0x26   : > { %6473 = sst [smem:[#allocation22_spill]] %s6472_s25  ;;  %p4702_p5 = pnand %p3869_p12, %p300_p3 }
  0x27   : > { %6475 = sst [smem:[#allocation23_spill]] %s6474_s26  ;;  %s4547_s17 = smov [#allocation9]  }
  0x28   : > { %p4254_p1 = pneg %p4702_p5  ;;  %s319_s15 = sshll.u32 %s4547_s17, 4  ;;  %s320_s15 = int_to_ptr.vmem [resolvable:$true] %s319_s15 }
  0x29   : > { %s317_s29 = sshll.u32 %s6476_s5, 4  ;;  %s3872_s1 = sshll.u32 %s4646_s18, 4  ;;  %s318_s29 = int_to_ptr.hbm [resolvable:$true] %s317_s29 }
  0x2a   : > { %p4255_p6 = pnand %p4254_p1, %p72_p9  ;;  %s6478_s0 = sld [smem:[#allocation94_spill]] }
  0x2b   : > { %s346_s5 = scalar_lea.vmem [#allocation3], %s3872_s1  ;;  %s6479_s14 = smov 8  }
  0x2c   : > { %s360_s20 = sshll.u32 %s346_s5, 4  ;;  %s6480_s26 = smov 128   ;;  %s361_s20 = int_to_ptr.vmem [resolvable:$true] %s360_s20 }
  0x2d   : > { %4257 = dma.hbm_to_vmem [thread:$0]  (!%p4255_p6), %s318_s29, 4608, %s320_s15, [#allocation10], %s6480_s26, %s6480_s26, %s6479_s14  }
  0x2e   : > { %s343_s17 = scalar_lea.sflag [#allocation4], %s4646_s18  ;;  %s4215_s30 = sadd.s32 240, %s4649_s19 }
  0x2f   : > { %s399_s13 = scalar_lea.vmem [#allocation8], %s3872_s1  ;;  %s410_s5 = scalar_lea.hbm %s6439_s2, %s4215_s30 }
  0x30   : > { %s357_s28 = scalar_lea.hbm %s6478_s0, %s4649_s19  ;;  %s413_s27 = sshll.u32 %s399_s13, 4  ;;  %s414_s27 = int_to_ptr.vmem [resolvable:$true] %s413_s27 }
  0x31   : > { %s358_s11 = sshll.u32 %s357_s28, 4  ;;  %s411_s28 = sshll.u32 %s410_s5, 4  ;;  %s359_s11 = int_to_ptr.hbm [resolvable:$true] %s358_s11  ;;  %s412_s28 = int_to_ptr.hbm [resolvable:$true] %s411_s28 }
  0x32   : > { %4261 = dma.hbm_to_vmem [thread:$0]  (!%p4654_p7), %s359_s11, 256, %s361_s20, %s343_s17, %s6480_s26, %s6480_s26, %s6479_s14  }
  0x33   : > { %4267 = dma.hbm_to_vmem [thread:$0]  (!%p4654_p7), %s412_s28, 256, %s414_s27, %s4664_s16, %s6480_s26, %s6480_s26, %s6479_s14  }
  0x34   : > { %425 = sbr.rel (%p4702_p5) target bundleno = 1288 (0x508), region = 56 }
  0x39   : > { %s4737_s11 = sand.u32 1, %s4527_s10  }
  0x3a   : > { %s3882_s1 = sshll.u32 %s4737_s11, 4  ;;  %s428_s0 = scalar_lea.sflag [#allocation4], %s4737_s11 }
  0x3b   : > { %s4741_s30 = scalar_lea.vmem [#allocation3], %s3882_s1 }
  0x3c   : > { %4506 = dma.done.wait (%p4683_p13), %s428_s0, 256  }
  0x3d   : > { %4508 = vsyncadd (%p4683_p13), %s428_s0, 4294967040  ;;  %s437_s14 = sand.u32 1, %s4673_s24   ;;  %s3883_s15 = sshll.u32 %s4737_s11, 8 }
  0x3e   : > { %s438_s18 = scalar_lea.sflag [#allocation7], %s437_s14  ;;  %s4751_s19 = scalar_lea.vmem [#allocation6], %s3883_s15 }
  0x3f   : > { %4510 = dma.done.wait (%p4683_p13), %s438_s18, 4352  }
  0x40   : > { %4512 = vsyncadd (%p4683_p13), %s438_s18, 4294962944  ;;  %s4757_s20 = scalar_lea.vmem [#allocation8], %s3882_s1 }
  0x41   : > { %4514 = dma.done.wait (%p72_p9), [#allocation10], 4608  }
  0x42   : > { %4516 = vsyncadd (%p72_p9), [#allocation10], 4294962688  ;;  %v4766_v0 = vld [vmem:[%s6440_s3 + $0x78] sm:$0xff]  ;;  %v4771_v1 = vld [vmem:[%s6440_s3 + $0x70] sm:$0xff]  ;;  %vm529_vm0 = vcmask 253952   ;;  %v4548_v44 = vmov 0.0  }
  0x43   : > { %607 = vmatpush.msra.mxu1 %v4766_v0  ;;  %4218 = vmatpush.msra.mxu2 %v4766_v0  ;;  %v4778_v2 = vld [vmem:[%s6440_s3 + $0x68] sm:$0xff]  ;;  %v4786_v3 = vld [vmem:[%s6440_s3 + $0x60] sm:$0xff]  ;;  %v4794_v4 = vld [vmem:[%s6440_s3 + $0x58] sm:$0xff]  ;;  %530 = vst.msk [vmem:[#allocation2] sm:$0x1] %vm529_vm0, %v4548_v44  ;;  %vm812_vm1 = vcmask 261120  }
  0x44   : > { %577 = vmatpush.msra.mxu0 %v4766_v0  ;;  %v4802_v5 = vld [vmem:[%s6440_s3 + $0x50] sm:$0xff]  ;;  %v521_v6 = vld [vmem:[%s6440_s3 + $0x48] sm:$0xff]  ;;  %v520_v7 = vld [vmem:[%s6440_s3 + $0x40] sm:$0xff]  ;;  %531 = vst.msk [vmem:[#allocation2 + $0x18] sm:$0x1] %vm529_vm0, %v4548_v44  ;;  %s6233_s27 = scalar_lea.vmem [#allocation11], %s3883_s15 }
  0x45   : > { %608 = vmatpush.msra.mxu1 %v4771_v1  ;;  %4219 = vmatpush.msra.mxu2 %v4771_v1  ;;  %v519_v8 = vld [vmem:[%s6440_s3 + $0x38] sm:$0xff]  ;;  %v518_v9 = vld [vmem:[%s6440_s3 + $0x30] sm:$0xff]  ;;  %v517_v10 = vld [vmem:[%s6440_s3 + $0x28] sm:$0xff]  ;;  %532 = vst.msk [vmem:[#allocation2 + $0x30] sm:$0x1] %vm529_vm0, %v4548_v44  ;;  %s4216_s15 = sshll.u32 %s4535_s12, 8 }
  0x46   : > { %578 = vmatpush.msra.mxu0 %v4771_v1  ;;  %v516_v11 = vld [vmem:[%s6440_s3 + $0x20] sm:$0xff]  ;;  %v515_v12 = vld [vmem:[%s6440_s3 + $0x18] sm:$0xff]  ;;  %v514_v13 = vld [vmem:[%s6440_s3 + $0x10] sm:$0xff]  ;;  %533 = vst.msk [vmem:[#allocation2 + $0x48] sm:$0x1] %vm529_vm0, %v4548_v44  ;;  %s3717_s1 = scalar_lea.hbm %s6446_s9, %s4216_s15  ;;  %s3703_s14 = scalar_lea.sflag [#allocation5], %s4737_s11 }
  0x47   : > { %609 = vmatpush.msra.mxu1 %v4778_v2  ;;  %4220 = vmatpush.msra.mxu2 %v4778_v2  ;;  %v513_v14 = vld [vmem:[%s6440_s3 + $0x8] sm:$0xff]  ;;  %v512_v15 = vld [vmem:[%s6440_s3] sm:$0xff]  ;;  %v643_v19 = vld [vmem:[%s4751_s19 + $0x40] sm:$0xff]  ;;  %534 = vst.msk [vmem:[#allocation2 + $0x60] sm:$0x1] %vm529_vm0, %v4548_v44  ;;  %s4473_s16 = scalar_lea.hbm %s6446_s9, 512 }
  0x48   : > { %579 = vmatpush.msra.mxu0 %v4778_v2  ;;  %v642_v16 = vld [vmem:[%s4751_s19 + $0x38] sm:$0xff]  ;;  %v605_v17 = vld [vmem:[%s4757_s20] sm:$0xff]  ;;  %v644_v22 = vld [vmem:[%s4751_s19 + $0x48] sm:$0xff]  ;;  %535 = vst.msk [vmem:[#allocation2 + $0x78] sm:$0x1] %vm529_vm0, %v4548_v44 }
  0x49   : > { %610 = vmatpush.msra.mxu1 %v4786_v3  ;;  %4221 = vmatpush.msra.mxu2 %v4786_v3  ;;  %v572_v18 = vld [vmem:[%s4741_s30] sm:$0xff]  ;;  %v606_v20 = vld [vmem:[%s4757_s20 + $0x8] sm:$0xff]  ;;  %536 = vst.msk [vmem:[#allocation2 + $0x90] sm:$0x1] %vm529_vm0, %v4548_v44  ;;  %s3720_s20 = sshll.u32 %s3717_s1, 4  ;;  %s3721_s20 = int_to_ptr.hbm [resolvable:$true] %s3720_s20 }
  0x4a   : > { %580 = vmatpush.msra.mxu0 %v4786_v3  ;;  %v573_v21 = vld [vmem:[%s4741_s30 + $0x8] sm:$0xff]  ;;  %v645_v23 = vld [vmem:[%s4751_s19 + $0x50] sm:$0xff]  ;;  %v635_v24 = vld [vmem:[%s4751_s19] sm:$0xff]  ;;  %537 = vst.msk [vmem:[#allocation2 + $0xa8] sm:$0x1] %vm529_vm0, %v4548_v44  ;;  %s3718_s30 = sshll.u32 %s6233_s27, 4  ;;  %s3719_s30 = int_to_ptr.vmem [resolvable:$true] %s3718_s30 }
  0x4b   : > { %611 = vmatpush.msra.mxu1 %v4794_v4  ;;  %4222 = vmatpush.msra.mxu2 %v4794_v4  ;;  %v646_v25 = vld [vmem:[%s4751_s19 + $0x58] sm:$0xff]  ;;  %v636_v26 = vld [vmem:[%s4751_s19 + $0x8] sm:$0xff]  ;;  %v647_v27 = vld [vmem:[%s4751_s19 + $0x60] sm:$0xff]  ;;  %538 = vst.msk [vmem:[#allocation2 + $0xc0] sm:$0x1] %vm529_vm0, %v4548_v44  ;;  %s4467_s12 = sshra.s32 %s3721_s20, 4  ;;  %s4468_s12 = int_to_ptr.hbm [resolvable:$true] %s4467_s12 }
  0x4c   : > { %581 = vmatpush.msra.mxu0 %v4794_v4  ;;  %v637_v28 = vld [vmem:[%s4751_s19 + $0x10] sm:$0xff]  ;;  %v648_v29 = vld [vmem:[%s4751_s19 + $0x68] sm:$0xff]  ;;  %v638_v30 = vld [vmem:[%s4751_s19 + $0x18] sm:$0xff]  ;;  %539 = vst.msk [vmem:[#allocation2 + $0xd8] sm:$0x1] %vm529_vm0, %v4548_v44  ;;  %s4469_s18 = scalar_lea.hbm %s4468_s12, 256  ;;  %p4474_p10 = scmp.lt.s32.totalorder %s4468_s12, %s6446_s9 }
  0x4d   : > { %612 = vmatpush.msra.mxu1 %v4802_v5  ;;  %4223 = vmatpush.msra.mxu2 %v4802_v5  ;;  %v649_v31 = vld [vmem:[%s4751_s19 + $0x70] sm:$0xff]  ;;  %v639_v32 = vld [vmem:[%s4751_s19 + $0x20] sm:$0xff]  ;;  %v650_v33 = vld [vmem:[%s4751_s19 + $0x78] sm:$0xff]  ;;  %540 = vst.msk [vmem:[#allocation2 + $0xf0] sm:$0x1] %vm529_vm0, %v4548_v44  ;;  %p4470_p7 = scmp.ne.s32.totalorder %s4468_s12, %s4469_s18  ;;  %p4475_p11 = scmp.lt.s32.totalorder %s4473_s16, %s4469_s18 }
  0x4e   : > { %582 = vmatpush.msra.mxu0 %v4802_v5  ;;  %v640_v34 = vld [vmem:[%s4751_s19 + $0x28] sm:$0xff]  ;;  %v651_v35 = vld [vmem:[%s4751_s19 + $0x80] sm:$0xff]  ;;  %v641_v36 = vld [vmem:[%s4751_s19 + $0x30] sm:$0xff]  ;;  %541 = vst.msk [vmem:[#allocation2 + $0x108] sm:$0x1] %vm529_vm0, %v4548_v44 }
  0x4f   : > { %613 = vmatpush.msra.mxu1 %v521_v6  ;;  %4224 = vmatpush.msra.mxu2 %v521_v6  ;;  %v652_v37 = vld [vmem:[%s4751_s19 + $0x88] sm:$0xff]  ;;  %v653_v38 = vld [vmem:[%s4751_s19 + $0x90] sm:$0xff]  ;;  %v654_v39 = vld [vmem:[%s4751_s19 + $0x98] sm:$0xff]  ;;  %542 = vst.msk [vmem:[#allocation2 + $0x120] sm:$0x1] %vm529_vm0, %v4548_v44  ;;  %p4471_p8 = pnand %p4470_p7, %p4690_p0  ;;  %p4476_p12 = por %p4475_p11, %p4474_p10 }
  0x50   : > { %583 = vmatpush.msra.mxu0 %v521_v6  ;;  %v655_v40 = vld [vmem:[%s4751_s19 + $0xa0] sm:$0xff]  ;;  %v656_v41 = vld [vmem:[%s4751_s19 + $0xa8] sm:$0xff]  ;;  %v923_v42 = vld [vmem:[#allocation9 + $0x38] sm:$0xff]  ;;  %543 = vst.msk [vmem:[#allocation2 + $0x138] sm:$0x1] %vm529_vm0, %v4548_v44 }
  0x51   : > { %614 = vmatpush.msra.mxu1 %v520_v7  ;;  %4225 = vmatpush.msra.mxu2 %v520_v7  ;;  %v886_v43 = vld [vmem:[#allocation9 + $0x18] sm:$0xff]  ;;  %v922_v45 = vld [vmem:[#allocation9 + $0x30] sm:$0xff]  ;;  %v921_v48 = vld [vmem:[#allocation9 + $0x28] sm:$0xff]  ;;  %544 = vst.msk [vmem:[#allocation2 + $0x150] sm:$0x1] %vm529_vm0, %v4548_v44  ;;  %p4472_p9 = pneg %p4471_p8 }
  0x52   : > { %584 = vmatpush.msra.mxu0 %v520_v7  ;;  %4234 = vmatpush.msra.mxu3 %v923_v42  ;;  %v885_v46 = vld [vmem:[#allocation9 + $0x10] sm:$0xff]  ;;  %v884_v49 = vld [vmem:[#allocation9 + $0x8] sm:$0xff]  ;;  %v920_v50 = vld [vmem:[#allocation9 + $0x20] sm:$0xff]  ;;  %545 = vst.msk [vmem:[#allocation2 + $0x168] sm:$0x1] %vm529_vm0, %v4548_v44 }
  0x53   : > { %615 = vmatpush.msra.mxu1 %v519_v8  ;;  %4226 = vmatpush.msra.mxu2 %v519_v8  ;;  %v657_v47 = vld [vmem:[%s4751_s19 + $0xb0] sm:$0xff]  ;;  %v883_v51 = vld [vmem:[#allocation9] sm:$0xff]  ;;  %v658_v53 = vld [vmem:[%s4751_s19 + $0xb8] sm:$0xff]  ;;  %546 = vst.msk [vmem:[#allocation2 + $0x180] sm:$0x1] %vm529_vm0, %v4548_v44  ;;  %p4477_p13 = pnand %p4476_p12, %p4472_p9 }
  0x54   : > { %585 = vmatpush.msra.mxu0 %v519_v8  ;;  %4235 = vmatpush.msra.mxu3 %v922_v45  ;;  %v4899_v52 = vld [vmem:[%s6441_s4] ss:$0 sm:$0xff]  ;;  %547 = vst.msk [vmem:[#allocation2 + $0x198] sm:$0x1] %vm529_vm0, %v4548_v44 }
  0x55   : > { %616 = vmatpush.msra.mxu1 %v518_v9  ;;  %4227 = vmatpush.msra.mxu2 %v518_v9  ;;  %548 = vst.msk [vmem:[#allocation2 + $0x11] sm:$0x1] %vm529_vm0, %v4548_v44 }
  0x56   : > { %586 = vmatpush.msra.mxu0 %v518_v9  ;;  %4236 = vmatpush.msra.mxu3 %v921_v48  ;;  %549 = vst.msk [vmem:[#allocation2 + $0x29] sm:$0x1] %vm529_vm0, %v4548_v44 }
  0x57   : > { %617 = vmatpush.msra.mxu1 %v517_v10  ;;  %4228 = vmatpush.msra.mxu2 %v517_v10  ;;  %550 = vst.msk [vmem:[#allocation2 + $0x41] sm:$0x1] %vm529_vm0, %v4548_v44 }
  0x58   : > { %587 = vmatpush.msra.mxu0 %v517_v10  ;;  %4237 = vmatpush.msra.mxu3 %v920_v50  ;;  %551 = vst.msk [vmem:[#allocation2 + $0x59] sm:$0x1] %vm529_vm0, %v4548_v44 }
  0x59   : > { %618 = vmatpush.msra.mxu1 %v516_v11  ;;  %4229 = vmatpush.msra.mxu2 %v516_v11  ;;  %552 = vst.msk [vmem:[#allocation2 + $0x71] sm:$0x1] %vm529_vm0, %v4548_v44 }
  0x5a   : > { %588 = vmatpush.msra.mxu0 %v516_v11  ;;  %553 = vst.msk [vmem:[#allocation2 + $0x89] sm:$0x1] %vm529_vm0, %v4548_v44 }
  0x5b   : > { %619 = vmatpush.msra.mxu1 %v515_v12  ;;  %4230 = vmatpush.msra.mxu2 %v515_v12  ;;  %554 = vst.msk [vmem:[#allocation2 + $0xa1] sm:$0x1] %vm529_vm0, %v4548_v44 }
  0x5c   : > { %589 = vmatpush.msra.mxu0 %v515_v12  ;;  %555 = vst.msk [vmem:[#allocation2 + $0xb9] sm:$0x1] %vm529_vm0, %v4548_v44 }
  0x5d   : > { %620 = vmatpush.msra.mxu1 %v514_v13  ;;  %4231 = vmatpush.msra.mxu2 %v514_v13  ;;  %556 = vst.msk [vmem:[#allocation2 + $0xd1] sm:$0x1] %vm529_vm0, %v4548_v44 }
  0x5e   : > { %590 = vmatpush.msra.mxu0 %v514_v13  ;;  %557 = vst.msk [vmem:[#allocation2 + $0xe9] sm:$0x1] %vm529_vm0, %v4548_v44 }
  0x5f   : > { %621 = vmatpush.msra.mxu1 %v513_v14  ;;  %4232 = vmatpush.msra.mxu2 %v513_v14  ;;  %558 = vst.msk [vmem:[#allocation2 + $0x101] sm:$0x1] %vm529_vm0, %v4548_v44 }
  0x60   : > { %591 = vmatpush.msra.mxu0 %v513_v14  ;;  %559 = vst.msk [vmem:[#allocation2 + $0x119] sm:$0x1] %vm529_vm0, %v4548_v44 }
  0x61   : > { %622 = vmatpush.msra.mxu1 %v512_v15  ;;  %4233 = vmatpush.msra.mxu2 %v512_v15  ;;  %560 = vst.msk [vmem:[#allocation2 + $0x131] sm:$0x1] %vm529_vm0, %v4548_v44 }
  0x62   : > { %704 = vmatmul.f32.vlgmr.msra.gmra.mxu2 %v642_v16  ;;  %623 = vmatmul.f32.vlgmr.msra.gmra.mxu1 %v605_v17  ;;  %561 = vst.msk [vmem:[#allocation2 + $0x149] sm:$0x1] %vm529_vm0, %v4548_v44 }
  0x63   : > { %667 = vmatpush.msrb.mxu1 %v4766_v0  ;;  %592 = vmatpush.msra.mxu0 %v512_v15  ;;  %v659_v0 = vld [vmem:[%s4751_s19 + $0xc0] sm:$0xff]  ;;  %562 = vst.msk [vmem:[#allocation2 + $0x161] sm:$0x1] %vm529_vm0, %v4548_v44 }
  0x64   : > { %593 = vmatmul.f32.vlgmr.msra.gmra.mxu0 %v572_v18  ;;  %v661_v18 = vld [vmem:[%s4751_s19 + $0xd0] sm:$0xff]  ;;  %563 = vst.msk [vmem:[#allocation2 + $0x179] sm:$0x1] %vm529_vm0, %v4548_v44 }
  0x65   : > { %668 = vmatpush.msrb.mxu1 %v4771_v1  ;;  %1241 = vmatpush.msrb.mxu0 %v886_v43  ;;  %564 = vst.msk [vmem:[#allocation2 + $0x191] sm:$0x1] %vm529_vm0, %v4548_v44 }
  0x66   : > { %565 = vst.msk [vmem:[#allocation2 + $0x1a9] sm:$0x1] %vm529_vm0, %v4548_v44 }
  0x67   : > { %669 = vmatpush.msrb.mxu1 %v4778_v2  ;;  %1242 = vmatpush.msrb.mxu0 %v885_v46 }
  0x69   : > { %670 = vmatpush.msrb.mxu1 %v4786_v3  ;;  %1243 = vmatpush.msrb.mxu0 %v884_v49 }
  0x6a   : > { %707 = vmatmul.f32.gmra.mxu2 %v643_v19  ;;  %626 = vmatmul.f32.gmra.mxu1 %v606_v20 }
  0x6b   : > { %671 = vmatpush.msrb.mxu1 %v4794_v4  ;;  %1244 = vmatpush.msrb.mxu0 %v883_v51 }
  0x6c   : > { %596 = vmatmul.f32.gmra.mxu0 %v573_v21 }
  0x6d   : > { %672 = vmatpush.msrb.mxu1 %v4802_v5 }
  0x6f   : > { %673 = vmatpush.msrb.mxu1 %v521_v6 }
  0x71   : > { %674 = vmatpush.msrb.mxu1 %v520_v7 }
  0x72   : > { %710 = vmatmul.f32.gmra.mxu2 %v644_v22  ;;  %v1656_v22 = vld [vmem:[#allocation9 + $0x78] sm:$0xff] }
  0x73   : > { %675 = vmatpush.msrb.mxu1 %v519_v8  ;;  %1765 = vmatpush.msrb.mxu3 %v1656_v22 }
  0x75   : > { %676 = vmatpush.msrb.mxu1 %v518_v9 }
  0x77   : > { %677 = vmatpush.msrb.mxu1 %v517_v10 }
  0x79   : > { %678 = vmatpush.msrb.mxu1 %v516_v11 }
  0x7a   : > { %713 = vmatmul.f32.gmra.mxu2 %v645_v23 }
  0x7b   : > { %679 = vmatpush.msrb.mxu1 %v515_v12  ;;  %v660_v12 = vld [vmem:[%s4751_s19 + $0xc8] sm:$0xff] }
  0x7d   : > { %680 = vmatpush.msrb.mxu1 %v514_v13 }
  0x7f   : > { %681 = vmatpush.msrb.mxu1 %v513_v14 }
  0x81   : > { %682 = vmatpush.msrb.mxu1 %v512_v15 }
  0x82   : > { %683 = vmatmul.f32.vlgmr.msrb.gmra.mxu1 %v635_v24  ;;  %716 = vmatmul.f32.gmra.mxu2 %v646_v25 }
  0x83   : > { %1032 = vmatpush.msra.mxu1 %v923_v42 }
  0x85   : > { %1033 = vmatpush.msra.mxu1 %v922_v45 }
  0x87   : > { %1034 = vmatpush.msra.mxu1 %v921_v48 }
  0x89   : > { %1035 = vmatpush.msra.mxu1 %v920_v50 }
  0x8a   : > { %686 = vmatmul.f32.gmra.mxu1 %v636_v26  ;;  %719 = vmatmul.f32.gmra.mxu2 %v647_v27  ;;  %v662_v27 = vld [vmem:[%s4751_s19 + $0xd8] sm:$0xff] }
  0x8b   : > { %4238 = vmatpush.msrb.mxu1 %v886_v43 }
  0x8d   : > { %4239 = vmatpush.msrb.mxu1 %v885_v46 }
  0x8f   : > { %4240 = vmatpush.msrb.mxu1 %v884_v49 }
  0x91   : > { %4241 = vmatpush.msrb.mxu1 %v883_v51 }
  0x92   : > { %689 = vmatmul.f32.gmra.mxu1 %v637_v28  ;;  %722 = vmatmul.f32.gmra.mxu2 %v648_v29 }
  0x9a   : > { %692 = vmatmul.f32.gmra.mxu1 %v638_v30  ;;  %725 = vmatmul.f32.gmra.mxu2 %v649_v31  ;;  %v1934_v30 = vld [vmem:[#allocation9 + $0x98] sm:$0xff]  ;;  %v1933_v31 = vld [vmem:[#allocation9 + $0x90] sm:$0xff] }
  0x9b   : > { %2043 = vmatpush.msrb.mxu2 %v1934_v30 }
  0x9d   : > { %2044 = vmatpush.msrb.mxu2 %v1933_v31 }
  0xa2   : > { %695 = vmatmul.f32.gmra.mxu1 %v639_v32  ;;  %728 = vmatmul.f32.gmra.mxu2 %v650_v33 }
  0xaa   : > { %698 = vmatmul.f32.gmra.mxu1 %v640_v34  ;;  %731 = vmatmul.f32.gmra.mxu2 %v651_v35  ;;  %v1932_v35 = vld [vmem:[#allocation9 + $0x88] sm:$0xff] }
  0xab   : > { %2045 = vmatpush.msrb.mxu2 %v1932_v35 }
  0xb2   : > { %701 = vmatmul.f32.gmra.mxu1 %v641_v36  ;;  %734 = vmatmul.f32.gmra.mxu2 %v652_v37  ;;  %v663_v37 = vld [vmem:[%s4751_s19 + $0xe0] sm:$0xff] }
  0xba   : > { %737 = vmatmul.f32.gmra.mxu2 %v653_v38 }
  0xc2   : > { %740 = vmatmul.f32.gmra.mxu2 %v654_v39  ;;  %v1931_v39 = vld [vmem:[#allocation9 + $0x80] sm:$0xff] }
  0xc3   : > { %2046 = vmatpush.msrb.mxu2 %v1931_v39 }
  0xca   : > { %743 = vmatmul.f32.gmra.mxu2 %v655_v40 }
  0xd2   : > { %746 = vmatmul.f32.gmra.mxu2 %v656_v41 }
  0xda   : > { %749 = vmatmul.f32.gmra.mxu2 %v657_v47  ;;  %v664_v47 = vld [vmem:[%s4751_s19 + $0xe8] sm:$0xff] }
  0xdf   : > { %v624_v54 = vpop.f32.mrf.mxu1 }
  0xe0   : > { %v625_v55 = vadd.f32 %v4899_v52, %v624_v54 }
  0xe1   : > { %v594_v56 = vpop.f32.mrf.mxu0 }
  0xe2   : > { %752 = vmatmul.f32.gmra.mxu2 %v658_v53  ;;  %v595_v57 = vadd.f32 %v4899_v52, %v594_v56  ;;  %v630_v58 = vmax.f32 %v625_v55, 0.0 }
  0xe4   : > { %v600_v59 = vmax.f32 %v595_v57, 0.0  ;;  %v633_v61 = vmul.f32 0.0, %v630_v58  ;;  %v665_v57 = vld [vmem:[%s4751_s19 + $0xf0] sm:$0xff] }
  0xe5   : > { %v705_v60 = vpop.f32.mrf.mxu2 }
  0xe6   : > { %v706_v62 = vadd.f32 %v4899_v52, %v705_v60  ;;  %v603_v63 = vmul.f32 0.0, %v600_v59  ;;  %816 = vst.msk [vmem:[#allocation2 + $0x199] sm:$0xff] %vm812_vm1, %v633_v61 }
  0xe7   : > { %v627_v2 = vpop.f32.mrf.mxu1 }
  0xe8   : > { %v787_v1 = vmax.f32 %v706_v62, 0.0  ;;  %813 = vst.msk [vmem:[#allocation2 + $0x1] sm:$0xff] %vm812_vm1, %v603_v63  ;;  %v628_v3 = vadd.f32 %v4899_v52, %v627_v2  ;;  %v666_v2 = vld [vmem:[%s4751_s19 + $0xf8] sm:$0xff] }
  0xe9   : > { %v597_v4 = vpop.f32.mrf.mxu0 }
  0xea   : > { %826 = vst.msk [vmem:[#allocation2 + $0x69] sm:$0xff] %vm812_vm1, %v787_v1  ;;  %755 = vmatmul.f32.gmra.mxu2 %v659_v0  ;;  %v598_v5 = vadd.f32 %v4899_v52, %v597_v4  ;;  %v631_v6 = vmax.f32 %v628_v3, 0.0 }
  0xec   : > { %v601_v7 = vmax.f32 %v598_v5, 0.0  ;;  %v634_v9 = vmul.f32 0.0, %v631_v6 }
  0xed   : > { %v708_v8 = vpop.f32.mrf.mxu2 }
  0xee   : > { %v709_v10 = vadd.f32 %v4899_v52, %v708_v8  ;;  %v604_v11 = vmul.f32 0.0, %v601_v7  ;;  %817 = vst.msk [vmem:[#allocation2 + $0x1a1] sm:$0xff] %vm812_vm1, %v634_v9 }
  0xef   : > { %v887_v13 = vld [vmem:[#allocation2 + $0x1] sm:$0xff] }
  0xf0   : > { %v851_v14 = vld [vmem:[#allocation2] sm:$0xff]  ;;  %v788_v15 = vmax.f32 %v709_v10, 0.0  ;;  %814 = vst.msk [vmem:[#allocation2 + $0x9] sm:$0xff] %vm812_vm1, %v604_v11  ;;  %3887 = vmatmul.msk.f32.vlgmr.msra.gmra.mxu1 %vm812_vm1, %v887_v13 }
  0xf1   : > { %3919 = vmatmul.msk.f32.vlgmr.msrb.gmra.mxu0 %vm812_vm1, %v851_v14 }
  0xf2   : > { %827 = vst.msk [vmem:[#allocation2 + $0x79] sm:$0xff] %vm812_vm1, %v788_v15  ;;  %758 = vmatmul.f32.gmra.mxu2 %v660_v12 }
  0xf5   : > { %v711_v16 = vpop.f32.mrf.mxu2 }
  0xf6   : > { %v712_v17 = vadd.f32 %v4899_v52, %v711_v16 }
  0xf7   : > { %v888_v19 = vld [vmem:[#allocation2 + $0x9] sm:$0xff] }
  0xf8   : > { %v852_v20 = vld [vmem:[#allocation2 + $0x8] sm:$0xff]  ;;  %v789_v21 = vmax.f32 %v712_v17, 0.0  ;;  %3888 = vmatmul.msk.f32.gmra.mxu1 %vm812_vm1, %v888_v19 }
  0xf9   : > { %3920 = vmatmul.msk.f32.gmra.mxu0 %vm812_vm1, %v852_v20 }
  0xfa   : > { %828 = vst.msk [vmem:[#allocation2 + $0x81] sm:$0xff] %vm812_vm1, %v789_v21  ;;  %761 = vmatmul.f32.gmra.mxu2 %v661_v18 }
  0xfd   : > { %v714_v23 = vpop.f32.mrf.mxu2 }
  0xfe   : > { %v715_v24 = vadd.f32 %v4899_v52, %v714_v23  ;;  %v1655_v23 = vld [vmem:[#allocation9 + $0x70] sm:$0xff] }
  0xff   : > { %v684_v25 = vpop.f32.mrf.mxu1  ;;  %1766 = vmatpush.msrb.mxu3 %v1655_v23 }
 0x100   : > { %v685_v26 = vadd.f32 %v4899_v52, %v684_v25  ;;  %v790_v28 = vmax.f32 %v715_v24, 0.0 }
 0x102   : > { %v780_v29 = vmax.f32 %v685_v26, 0.0  ;;  %829 = vst.msk [vmem:[#allocation2 + $0x91] sm:$0xff] %vm812_vm1, %v790_v28  ;;  %764 = vmatmul.f32.gmra.mxu2 %v662_v27 }
 0x104   : > { %819 = vst.msk [vmem:[#allocation2 + $0x19] sm:$0xff] %vm812_vm1, %v780_v29 }
 0x105   : > { %v717_v32 = vpop.f32.mrf.mxu2 }
 0x106   : > { %v718_v33 = vadd.f32 %v4899_v52, %v717_v32  ;;  %v896_v32 = vld [vmem:[#allocation2 + $0x69] sm:$0xff] }
 0x107   : > { %v687_v34 = vpop.f32.mrf.mxu1 }
 0x108   : > { %v688_v36 = vadd.f32 %v4899_v52, %v687_v34  ;;  %v791_v38 = vmax.f32 %v718_v33, 0.0 }
 0x10a   : > { %v781_v40 = vmax.f32 %v688_v36, 0.0  ;;  %830 = vst.msk [vmem:[#allocation2 + $0x99] sm:$0xff] %vm812_vm1, %v791_v38  ;;  %767 = vmatmul.f32.gmra.mxu2 %v663_v37  ;;  %v897_v37 = vld [vmem:[#allocation2 + $0x79] sm:$0xff] }
 0x10b   : > { %v889_v41 = vld [vmem:[#allocation2 + $0x19] sm:$0xff] }
 0x10c   : > { %v4982_v42 = vld [vmem:[#allocation2 + $0x18] sm:$0xff]  ;;  %820 = vst.msk [vmem:[#allocation2 + $0x21] sm:$0xff] %vm812_vm1, %v781_v40  ;;  %3889 = vmatmul.msk.f32.gmra.mxu1 %vm812_vm1, %v889_v41 }
 0x10d   : > { %3921 = vmatmul.msk.f32.gmra.mxu0 %vm812_vm1, %v4982_v42  ;;  %v720_v43 = vpop.f32.mrf.mxu2  ;;  %v5055_v38 = vld [vmem:[#allocation2 + $0x78] sm:$0xff] }
 0x10e   : > { %v721_v44 = vadd.f32 %v4899_v52, %v720_v43  ;;  %v898_v43 = vld [vmem:[#allocation2 + $0x81] sm:$0xff] }
 0x10f   : > { %v690_v45 = vpop.f32.mrf.mxu1 }
 0x110   : > { %v691_v46 = vadd.f32 %v4899_v52, %v690_v45  ;;  %v792_v48 = vmax.f32 %v721_v44, 0.0  ;;  %v5065_v44 = vld [vmem:[#allocation2 + $0x80] sm:$0xff] }
 0x112   : > { %v782_v49 = vmax.f32 %v691_v46, 0.0  ;;  %831 = vst.msk [vmem:[#allocation2 + $0xa9] sm:$0xff] %vm812_vm1, %v792_v48  ;;  %770 = vmatmul.f32.gmra.mxu2 %v664_v47  ;;  %v899_v48 = vld [vmem:[#allocation2 + $0x91] sm:$0xff] }
 0x113   : > { %v890_v50 = vld [vmem:[#allocation2 + $0x21] sm:$0xff] }
 0x114   : > { %v4992_v51 = vld [vmem:[#allocation2 + $0x20] sm:$0xff]  ;;  %821 = vst.msk [vmem:[#allocation2 + $0x31] sm:$0xff] %vm812_vm1, %v782_v49  ;;  %3890 = vmatmul.msk.f32.gmra.mxu1 %vm812_vm1, %v890_v50  ;;  %v5071_v49 = vld [vmem:[#allocation2 + $0x90] sm:$0xff] }
 0x115   : > { %3922 = vmatmul.msk.f32.gmra.mxu0 %vm812_vm1, %v4992_v51  ;;  %v723_v53 = vpop.f32.mrf.mxu2 }
 0x116   : > { %v724_v54 = vadd.f32 %v4899_v52, %v723_v53 }
 0x117   : > { %v693_v55 = vpop.f32.mrf.mxu1 }
 0x118   : > { %v694_v56 = vadd.f32 %v4899_v52, %v693_v55  ;;  %v793_v58 = vmax.f32 %v724_v54, 0.0  ;;  %v900_v55 = vld [vmem:[#allocation2 + $0x99] sm:$0xff] }
 0x11a   : > { %v783_v59 = vmax.f32 %v694_v56, 0.0  ;;  %832 = vst.msk [vmem:[#allocation2 + $0xb1] sm:$0xff] %vm812_vm1, %v793_v58  ;;  %773 = vmatmul.f32.gmra.mxu2 %v665_v57  ;;  %v5082_v57 = vld [vmem:[#allocation2 + $0x98] sm:$0xff] }
 0x11b   : > { %v891_v60 = vld [vmem:[#allocation2 + $0x31] sm:$0xff] }
 0x11c   : > { %v5002_v61 = vld [vmem:[#allocation2 + $0x30] sm:$0xff]  ;;  %822 = vst.msk [vmem:[#allocation2 + $0x39] sm:$0xff] %vm812_vm1, %v783_v59  ;;  %3891 = vmatmul.msk.f32.vlgmr.msra.gmra.mxu3 %vm812_vm1, %v891_v60 }
 0x11d   : > { %3923 = vmatmul.msk.f32.gmra.mxu0 %vm812_vm1, %v5002_v61  ;;  %v726_v62 = vpop.f32.mrf.mxu2 }
 0x11e   : > { %v727_v63 = vadd.f32 %v4899_v52, %v726_v62  ;;  %v901_v62 = vld [vmem:[#allocation2 + $0xa9] sm:$0xff] }
 0x11f   : > { %v696_v0 = vpop.f32.mrf.mxu1 }
 0x120   : > { %v697_v1 = vadd.f32 %v4899_v52, %v696_v0  ;;  %v794_v3 = vmax.f32 %v727_v63, 0.0  ;;  %v5088_v63 = vld [vmem:[#allocation2 + $0xa8] sm:$0xff] }
 0x122   : > { %v784_v4 = vmax.f32 %v697_v1, 0.0  ;;  %833 = vst.msk [vmem:[#allocation2 + $0xc1] sm:$0xff] %vm812_vm1, %v794_v3  ;;  %776 = vmatmul.f32.gmra.mxu2 %v666_v2  ;;  %v1654_v1 = vld [vmem:[#allocation9 + $0x68] sm:$0xff] }
 0x123   : > { %v892_v5 = vld [vmem:[#allocation2 + $0x39] sm:$0xff]  ;;  %1767 = vmatpush.msrb.mxu3 %v1654_v1 }
 0x124   : > { %v5012_v6 = vld [vmem:[#allocation2 + $0x38] sm:$0xff]  ;;  %823 = vst.msk [vmem:[#allocation2 + $0x49] sm:$0xff] %vm812_vm1, %v784_v4  ;;  %3892 = vmatmul.msk.f32.gmra.mxu3 %vm812_vm1, %v892_v5 }
 0x125   : > { %3924 = vmatmul.msk.f32.gmra.mxu0 %vm812_vm1, %v5012_v6  ;;  %v729_v7 = vpop.f32.mrf.mxu2 }
 0x126   : > { %v730_v8 = vadd.f32 %v4899_v52, %v729_v7 }
 0x127   : > { %v699_v9 = vpop.f32.mrf.mxu1 }
 0x128   : > { %v700_v10 = vadd.f32 %v4899_v52, %v699_v9  ;;  %v795_v11 = vmax.f32 %v730_v8, 0.0  ;;  %v5102_v8 = vld [vmem:[#allocation2 + $0xb0] sm:$0xff] }
 0x12a   : > { %v785_v12 = vmax.f32 %v700_v10, 0.0  ;;  %834 = vst.msk [vmem:[#allocation2 + $0xc9] sm:$0xff] %vm812_vm1, %v795_v11  ;;  %4015 = vmatmul.msk.f32.vlgmr.msrb.gmra.mxu2 %vm812_vm1, %v889_v41 }
 0x12b   : > { %v893_v13 = vld [vmem:[#allocation2 + $0x49] sm:$0xff] }
 0x12c   : > { %v5022_v14 = vld [vmem:[#allocation2 + $0x48] sm:$0xff]  ;;  %824 = vst.msk [vmem:[#allocation2 + $0x51] sm:$0xff] %vm812_vm1, %v785_v12  ;;  %3893 = vmatmul.msk.f32.gmra.mxu3 %vm812_vm1, %v893_v13 }
 0x12d   : > { %3925 = vmatmul.msk.f32.gmra.mxu0 %vm812_vm1, %v5022_v14  ;;  %v732_v15 = vpop.f32.mrf.mxu2 }
 0x12e   : > { %v733_v16 = vadd.f32 %v4899_v52, %v732_v15  ;;  %v5113_v15 = vld [vmem:[#allocation2 + $0xc0] sm:$0xff] }
 0x12f   : > { %v702_v17 = vpop.f32.mrf.mxu1 }
 0x130   : > { %v703_v18 = vadd.f32 %v4899_v52, %v702_v17  ;;  %v796_v19 = vmax.f32 %v733_v16, 0.0 }
 0x132   : > { %v786_v20 = vmax.f32 %v703_v18, 0.0  ;;  %835 = vst.msk [vmem:[#allocation2 + $0xd9] sm:$0xff] %vm812_vm1, %v796_v19  ;;  %4016 = vmatmul.msk.f32.gmra.mxu2 %vm812_vm1, %v890_v50 }
 0x133   : > { %v894_v21 = vld [vmem:[#allocation2 + $0x51] sm:$0xff] }
 0x134   : > { %v5032_v22 = vld [vmem:[#allocation2 + $0x50] sm:$0xff]  ;;  %825 = vst.msk [vmem:[#allocation2 + $0x61] sm:$0xff] %vm812_vm1, %v786_v20  ;;  %3894 = vmatmul.msk.f32.gmra.mxu3 %vm812_vm1, %v894_v21 }
 0x135   : > { %3926 = vmatmul.msk.f32.gmra.mxu0 %vm812_vm1, %v5032_v22  ;;  %v735_v24 = vpop.f32.mrf.mxu2 }
 0x136   : > { %v736_v25 = vadd.f32 %v4899_v52, %v735_v24  ;;  %v5130_v24 = vld [vmem:[#allocation2 + $0xc8] sm:$0xff] }
 0x138   : > { %v797_v26 = vmax.f32 %v736_v25, 0.0  ;;  %v1378_v25 = vld [vmem:[#allocation9 + $0x58] sm:$0xff] }
 0x139   : > { %1487 = vmatpush.msra.mxu1 %v1378_v25 }
 0x13a   : > { %836 = vst.msk [vmem:[#allocation2 + $0xe1] sm:$0xff] %vm812_vm1, %v797_v26  ;;  %4017 = vmatmul.msk.f32.gmra.mxu2 %vm812_vm1, %v891_v60  ;;  %v1377_v26 = vld [vmem:[#allocation9 + $0x50] sm:$0xff] }
 0x13b   : > { %v895_v27 = vld [vmem:[#allocation2 + $0x61] sm:$0xff]  ;;  %1488 = vmatpush.msra.mxu1 %v1377_v26 }
 0x13c   : > { %v5041_v28 = vld [vmem:[#allocation2 + $0x60] sm:$0xff]  ;;  %3895 = vmatmul.msk.f32.gmra.mxu3 %vm812_vm1, %v895_v27  ;;  %v5049_v33 = vld [vmem:[#allocation2 + $0x68] sm:$0xff] }
 0x13d   : > { %3927 = vmatmul.msk.f32.gmra.mxu0 %vm812_vm1, %v5041_v28  ;;  %v738_v29 = vpop.f32.mrf.mxu2 }
 0x13e   : > { %v739_v30 = vadd.f32 %v4899_v52, %v738_v29 }
 0x140   : > { %v798_v31 = vmax.f32 %v739_v30, 0.0  ;;  %v1376_v30 = vld [vmem:[#allocation9 + $0x48] sm:$0xff] }
 0x141   : > { %1489 = vmatpush.msra.mxu1 %v1376_v30 }
 0x142   : > { %837 = vst.msk [vmem:[#allocation2 + $0xf1] sm:$0xff] %vm812_vm1, %v798_v31  ;;  %4018 = vmatmul.msk.f32.gmra.mxu2 %vm812_vm1, %v892_v5  ;;  %v5097_v5 = vld [vmem:[#allocation2 + $0xb1] sm:$0xff] }
 0x144   : > { %3896 = vmatmul.msk.f32.gmra.mxu3 %vm812_vm1, %v896_v32 }
 0x145   : > { %3928 = vmatmul.msk.f32.gmra.mxu0 %vm812_vm1, %v5049_v33  ;;  %v741_v34 = vpop.f32.mrf.mxu2 }
 0x146   : > { %v742_v35 = vadd.f32 %v4899_v52, %v741_v34  ;;  %v5139_v34 = vld [vmem:[#allocation2 + $0xd9] sm:$0xff] }
 0x148   : > { %v799_v36 = vmax.f32 %v742_v35, 0.0  ;;  %v5141_v35 = vld [vmem:[#allocation2 + $0xd8] sm:$0xff] }
 0x14a   : > { %838 = vst.msk [vmem:[#allocation2 + $0xf9] sm:$0xff] %vm812_vm1, %v799_v36  ;;  %4019 = vmatmul.msk.f32.gmra.mxu2 %vm812_vm1, %v893_v13  ;;  %v5111_v13 = vld [vmem:[#allocation2 + $0xc1] sm:$0xff] }
 0x14c   : > { %3897 = vmatmul.msk.f32.gmra.mxu3 %vm812_vm1, %v897_v37 }
 0x14d   : > { %3929 = vmatmul.msk.f32.gmra.mxu0 %vm812_vm1, %v5055_v38  ;;  %v744_v39 = vpop.f32.mrf.mxu2 }
 0x14e   : > { %v745_v40 = vadd.f32 %v4899_v52, %v744_v39  ;;  %v2212_v39 = vld [vmem:[#allocation9 + $0xb8] sm:$0xff] }
 0x14f   : > { %2321 = vmatpush.msra.mxu0 %v2212_v39  ;;  %v2176_v39 = vld [vmem:[#allocation2 + $0x1a] sm:$0xff] }
 0x150   : > { %v800_v41 = vmax.f32 %v745_v40, 0.0 }
 0x152   : > { %839 = vst.msk [vmem:[#allocation2 + $0x109] sm:$0xff] %vm812_vm1, %v800_v41  ;;  %4020 = vmatmul.msk.f32.gmra.mxu2 %vm812_vm1, %v894_v21  ;;  %v5125_v21 = vld [vmem:[#allocation2 + $0xc9] sm:$0xff]  ;;  %v2211_v41 = vld [vmem:[#allocation9 + $0xb0] sm:$0xff] }
 0x153   : > { %2322 = vmatpush.msra.mxu0 %v2211_v41 }
 0x154   : > { %3898 = vmatmul.msk.f32.gmra.mxu3 %vm812_vm1, %v898_v43 }
 0x155   : > { %3930 = vmatmul.msk.f32.gmra.mxu0 %vm812_vm1, %v5065_v44  ;;  %v747_v45 = vpop.f32.mrf.mxu2 }
 0x156   : > { %v748_v46 = vadd.f32 %v4899_v52, %v747_v45  ;;  %v2210_v45 = vld [vmem:[#allocation9 + $0xa8] sm:$0xff] }
 0x157   : > { %2323 = vmatpush.msra.mxu0 %v2210_v45 }
 0x158   : > { %v801_v47 = vmax.f32 %v748_v46, 0.0 }
 0x159   : > { %v909_v26 = vld [vmem:[#allocation2 + $0x109] sm:$0xff] }
 0x15a   : > { %840 = vst.msk [vmem:[#allocation2 + $0x111] sm:$0xff] %vm812_vm1, %v801_v47  ;;  %4021 = vmatmul.msk.f32.gmra.mxu2 %vm812_vm1, %v895_v27 }
 0x15c   : > { %3899 = vmatmul.msk.f32.gmra.mxu3 %vm812_vm1, %v899_v48 }
 0x15d   : > { %3931 = vmatmul.msk.f32.gmra.mxu0 %vm812_vm1, %v5071_v49  ;;  %v750_v50 = vpop.f32.mrf.mxu2 }
 0x15e   : > { %v751_v53 = vadd.f32 %v4899_v52, %v750_v50 }
 0x160   : > { %v802_v54 = vmax.f32 %v751_v53, 0.0  ;;  %v2209_v53 = vld [vmem:[#allocation9 + $0xa0] sm:$0xff] }
 0x161   : > { %v874_v56 = vld [vmem:[#allocation2 + $0x110] sm:$0xff]  ;;  %2324 = vmatpush.msra.mxu0 %v2209_v53 }
 0x162   : > { %841 = vst.msk [vmem:[#allocation2 + $0x121] sm:$0xff] %vm812_vm1, %v802_v54  ;;  %3942 = vmatmul.msk.f32.vlgmr.msrb.gmra.mxu1 %vm812_vm1, %v874_v56  ;;  %4022 = vmatmul.msk.f32.gmra.mxu2 %vm812_vm1, %v896_v32  ;;  %v5157_v54 = vld [vmem:[#allocation2 + $0xe0] sm:$0xff] }
 0x164   : > { %3900 = vmatmul.msk.f32.gmra.mxu3 %vm812_vm1, %v900_v55 }
 0x165   : > { %3932 = vmatmul.msk.f32.gmra.mxu0 %vm812_vm1, %v5082_v57  ;;  %v753_v58 = vpop.f32.mrf.mxu2 }
 0x166   : > { %v754_v59 = vadd.f32 %v4899_v52, %v753_v58 }
 0x168   : > { %v803_v60 = vmax.f32 %v754_v59, 0.0 }
 0x169   : > { %v875_v0 = vld [vmem:[#allocation2 + $0x120] sm:$0xff] }
 0x16a   : > { %842 = vst.msk [vmem:[#allocation2 + $0x129] sm:$0xff] %vm812_vm1, %v803_v60  ;;  %3943 = vmatmul.msk.f32.gmra.mxu1 %vm812_vm1, %v875_v0  ;;  %4023 = vmatmul.msk.f32.gmra.mxu2 %vm812_vm1, %v897_v37  ;;  %v1375_v37 = vld [vmem:[#allocation9 + $0x40] sm:$0xff]  ;;  %v911_v45 = vld [vmem:[#allocation2 + $0x121] sm:$0xff] }
 0x16b   : > { %1490 = vmatpush.msra.mxu1 %v1375_v37  ;;  %v907_v60 = vld [vmem:[#allocation2 + $0xf1] sm:$0xff] }
 0x16c   : > { %3901 = vmatmul.msk.f32.gmra.mxu3 %vm812_vm1, %v901_v62  ;;  %v1343_v37 = vld [vmem:[#allocation2 + $0xa] sm:$0xff] }
 0x16d   : > { %3933 = vmatmul.msk.f32.gmra.mxu0 %vm812_vm1, %v5088_v63  ;;  %v756_v2 = vpop.f32.mrf.mxu2 }
 0x16e   : > { %v757_v3 = vadd.f32 %v4899_v52, %v756_v2  ;;  %v5108_v9 = vpop.f32.mrf.mxu0 }
 0x16f   : > { %6481 = vst [vmem:[#allocation24_spill] sm:$0xff] %v5108_v9 }
 0x170   : > { %v804_v4 = vmax.f32 %v757_v3, 0.0 }
 0x171   : > { %v876_v7 = vld [vmem:[#allocation2 + $0x128] sm:$0xff] }
 0x172   : > { %843 = vst.msk [vmem:[#allocation2 + $0x139] sm:$0xff] %vm812_vm1, %v804_v4  ;;  %3944 = vmatmul.msk.f32.gmra.mxu1 %vm812_vm1, %v876_v7  ;;  %4024 = vmatmul.msk.f32.gmra.mxu2 %vm812_vm1, %v898_v43 }
 0x174   : > { %3902 = vmatmul.msk.f32.gmra.mxu3 %vm812_vm1, %v5097_v5 }
 0x175   : > { %3934 = vmatmul.msk.f32.gmra.mxu0 %vm812_vm1, %v5102_v8  ;;  %v759_v10 = vpop.f32.mrf.mxu2 }
 0x176   : > { %v760_v11 = vadd.f32 %v4899_v52, %v759_v10  ;;  %v5123_v19 = vpop.f32.mrf.mxu0  ;;  %v908_v10 = vld [vmem:[#allocation2 + $0xf9] sm:$0xff] }
 0x177   : > { %6482 = vst [vmem:[#allocation25_spill] sm:$0xff] %v5123_v19 }
 0x178   : > { %v805_v12 = vmax.f32 %v760_v11, 0.0 }
 0x179   : > { %v877_v16 = vld [vmem:[#allocation2 + $0x138] sm:$0xff] }
 0x17a   : > { %844 = vst.msk [vmem:[#allocation2 + $0x141] sm:$0xff] %vm812_vm1, %v805_v12  ;;  %3945 = vmatmul.msk.f32.gmra.mxu1 %vm812_vm1, %v877_v16  ;;  %4025 = vmatmul.msk.f32.gmra.mxu2 %vm812_vm1, %v899_v48  ;;  %v906_v48 = vld [vmem:[#allocation2 + $0xe1] sm:$0xff]  ;;  %v5179_v12 = vld [vmem:[#allocation2 + $0xf8] sm:$0xff] }
 0x17c   : > { %3903 = vmatmul.msk.f32.gmra.mxu3 %vm812_vm1, %v5111_v13 }
 0x17d   : > { %3935 = vmatmul.msk.f32.gmra.mxu0 %vm812_vm1, %v5113_v15  ;;  %v762_v17 = vpop.f32.mrf.mxu2 }
 0x17e   : > { %v763_v18 = vadd.f32 %v4899_v52, %v762_v17 }
 0x180   : > { %v806_v20 = vmax.f32 %v763_v18, 0.0 }
 0x181   : > { %v878_v23 = vld [vmem:[#allocation2 + $0x140] sm:$0xff] }
 0x182   : > { %845 = vst.msk [vmem:[#allocation2 + $0x151] sm:$0xff] %vm812_vm1, %v806_v20  ;;  %3946 = vmatmul.msk.f32.gmra.mxu1 %vm812_vm1, %v878_v23  ;;  %4026 = vmatmul.msk.f32.gmra.mxu2 %vm812_vm1, %v900_v55 }
 0x184   : > { %3904 = vmatmul.msk.f32.gmra.mxu3 %vm812_vm1, %v5125_v21 }
 0x185   : > { %3936 = vmatmul.msk.f32.gmra.mxu0 %vm812_vm1, %v5130_v24  ;;  %v765_v27 = vpop.f32.mrf.mxu2 }
 0x186   : > { %v766_v29 = vadd.f32 %v4899_v52, %v765_v27  ;;  %v5187_v27 = vld [vmem:[#allocation2 + $0x108] sm:$0xff] }
 0x188   : > { %v807_v31 = vmax.f32 %v766_v29, 0.0 }
 0x189   : > { %v879_v36 = vld [vmem:[#allocation2 + $0x150] sm:$0xff] }
 0x18a   : > { %v5137_v32 = vpop.f32.mrf.mxu0  ;;  %846 = vst.msk [vmem:[#allocation2 + $0x159] sm:$0xff] %vm812_vm1, %v807_v31  ;;  %3947 = vmatmul.msk.f32.gmra.mxu1 %vm812_vm1, %v879_v36  ;;  %4027 = vmatmul.msk.f32.gmra.mxu2 %vm812_vm1, %v901_v62  ;;  %v5163_v62 = vld [vmem:[#allocation2 + $0xf0] sm:$0xff] }
 0x18b   : > { %6483 = vst [vmem:[#allocation26_spill] sm:$0xff] %v5137_v32  ;;  %v910_v36 = vld [vmem:[#allocation2 + $0x111] sm:$0xff] }
 0x18c   : > { %3905 = vmatmul.msk.f32.gmra.mxu3 %vm812_vm1, %v5139_v34  ;;  %v3044_v32 = vld [vmem:[#allocation9 + $0x100] sm:$0xff] }
 0x18d   : > { %3937 = vmatmul.msk.f32.gmra.mxu0 %vm812_vm1, %v5141_v35  ;;  %v768_v40 = vpop.f32.mrf.mxu2 }
 0x18e   : > { %v769_v43 = vadd.f32 %v4899_v52, %v768_v40 }
 0x190   : > { %v808_v46 = vmax.f32 %v769_v43, 0.0 }
 0x191   : > { %v880_v50 = vld [vmem:[#allocation2 + $0x158] sm:$0xff] }
 0x192   : > { %v5151_v47 = vpop.f32.mrf.mxu0  ;;  %847 = vst.msk [vmem:[#allocation2 + $0x169] sm:$0xff] %vm812_vm1, %v808_v46  ;;  %3948 = vmatmul.msk.f32.gmra.mxu1 %vm812_vm1, %v880_v50  ;;  %4028 = vmatmul.msk.f32.gmra.mxu2 %vm812_vm1, %v5097_v5  ;;  %v5208_v46 = vpop.f32.mrf.mxu1  ;;  %v2177_v50 = vld [vmem:[#allocation2 + $0x22] sm:$0xff] }
 0x193   : > { %6484 = vst [vmem:[#allocation27_spill] sm:$0xff] %v5151_v47 }
 0x194   : > { %3906 = vmatmul.msk.f32.gmra.mxu3 %vm812_vm1, %v906_v48  ;;  %6487 = vst [vmem:[#allocation30_spill] sm:$0xff] %v5208_v46 }
 0x195   : > { %3938 = vmatmul.msk.f32.gmra.mxu0 %vm812_vm1, %v5157_v54  ;;  %v771_v55 = vpop.f32.mrf.mxu2 }
 0x196   : > { %v772_v56 = vadd.f32 %v4899_v52, %v771_v55 }
 0x198   : > { %v809_v58 = vmax.f32 %v772_v56, 0.0 }
 0x199   : > { %v881_v0 = vld [vmem:[#allocation2 + $0x168] sm:$0xff] }
 0x19a   : > { %v1258_v59 = vpop.f32.mrf.mxu0  ;;  %848 = vst.msk [vmem:[#allocation2 + $0x171] sm:$0xff] %vm812_vm1, %v809_v58  ;;  %3949 = vmatmul.msk.f32.gmra.mxu1 %vm812_vm1, %v881_v0  ;;  %4029 = vmatmul.msk.f32.gmra.mxu2 %vm812_vm1, %v5111_v13  ;;  %v1653_v13 = vld [vmem:[#allocation9 + $0x60] sm:$0xff]  ;;  %v5222_v0 = vpop.f32.mrf.mxu1 }
 0x19b   : > { %1768 = vmatpush.msrb.mxu3 %v1653_v13  ;;  %v912_v58 = vld [vmem:[#allocation2 + $0x129] sm:$0xff]  ;;  %6489 = vst [vmem:[#allocation32_spill] sm:$0xff] %v5222_v0  ;;  %v2490_v0 = vld [vmem:[#allocation9 + $0xd0] sm:$0xff] }
 0x19c   : > { %3907 = vmatmul.msk.f32.gmra.mxu3 %vm812_vm1, %v907_v60 }
 0x19d   : > { %3939 = vmatmul.msk.f32.gmra.mxu0 %vm812_vm1, %v5163_v62  ;;  %v774_v1 = vpop.f32.mrf.mxu2 }
 0x19e   : > { %v775_v2 = vadd.f32 %v4899_v52, %v774_v1 }
 0x19f   : > { %v1049_v3 = vpop.f32.mrf.mxu3 }
 0x1a0   : > { %v5173_v4 = vadd.f32 %v1258_v59, %v1049_v3  ;;  %v810_v5 = vmax.f32 %v775_v2, 0.0  ;;  %v5220_v59 = vld [vmem:[#allocation2 + $0x32] sm:$0xff] }
 0x1a1   : > { %v882_v11 = vld [vmem:[#allocation2 + $0x170] sm:$0xff] }
 0x1a2   : > { %v1261_v7 = vpop.f32.mrf.mxu0  ;;  %849 = vst.msk [vmem:[#allocation2 + $0x181] sm:$0xff] %vm812_vm1, %v810_v5  ;;  %3950 = vmatmul.msk.f32.gmra.mxu1 %vm812_vm1, %v882_v11  ;;  %4030 = vmatmul.msk.f32.gmra.mxu2 %vm812_vm1, %v5125_v21  ;;  %v1342_v21 = vld [vmem:[#allocation2 + $0x2] sm:$0xff]  ;;  %v913_v5 = vld [vmem:[#allocation2 + $0x139] sm:$0xff] }
 0x1a4   : > { %3908 = vmatmul.msk.f32.gmra.mxu3 %vm812_vm1, %v908_v10 }
 0x1a5   : > { %3940 = vmatmul.msk.f32.gmra.mxu0 %vm812_vm1, %v5179_v12  ;;  %v777_v16 = vpop.f32.mrf.mxu2 }
 0x1a6   : > { %v778_v17 = vadd.f32 %v4899_v52, %v777_v16 }
 0x1a7   : > { %v1052_v18 = vpop.f32.mrf.mxu3 }
 0x1a8   : > { %v5185_v20 = vadd.f32 %v1261_v7, %v1052_v18  ;;  %v811_v23 = vmax.f32 %v778_v17, 0.0  ;;  %v5234_v7 = vld [vmem:[#allocation2 + $0x3a] sm:$0xff] }
 0x1a9   : > { %v914_v18 = vld [vmem:[#allocation2 + $0x141] sm:$0xff] }
 0x1aa   : > { %v1264_v25 = vpop.f32.mrf.mxu0  ;;  %850 = vst.msk [vmem:[#allocation2 + $0x189] sm:$0xff] %vm812_vm1, %v811_v23  ;;  %3951 = vmatmul.msk.f32.vlgmr.msra.gmra.mxu1 %vm812_vm1, %v1342_v21  ;;  %4031 = vmatmul.msk.f32.gmra.mxu2 %vm812_vm1, %v5139_v34  ;;  %v5248_v23 = vld [vmem:[#allocation2 + $0x4a] sm:$0xff] }
 0x1ac   : > { %3909 = vmatmul.msk.f32.gmra.mxu3 %vm812_vm1, %v909_v26 }
 0x1ad   : > { %3941 = vmatmul.msk.f32.gmra.mxu0 %vm812_vm1, %v5187_v27  ;;  %v5196_v52 = vpop.f32.mrf.mxu2 }
 0x1ae   : > { %6485 = vst [vmem:[#allocation28_spill] sm:$0xff] %v5196_v52 }
 0x1af   : > { %v1055_v29 = vpop.f32.mrf.mxu3 }
 0x1b0   : > { %v5198_v30 = vadd.f32 %v1264_v25, %v1055_v29 }
 0x1b1   : > { %v1929_v19 = vld [vmem:[#allocation2 + $0x189] sm:$0xff] }
 0x1b2   : > { %v1267_v31 = vpop.f32.mrf.mxu0  ;;  %3952 = vmatmul.msk.f32.gmra.mxu1 %vm812_vm1, %v1343_v37  ;;  %4032 = vmatmul.msk.f32.gmra.mxu2 %vm812_vm1, %v906_v48  ;;  %v915_v37 = vld [vmem:[#allocation2 + $0x151] sm:$0xff] }
 0x1b4   : > { %3910 = vmatmul.msk.f32.gmra.mxu3 %vm812_vm1, %v910_v36 }
 0x1b5   : > { %4047 = vmatmul.msk.f32.vlgmr.msra.gmra.mxu0 %vm812_vm1, %v2176_v39  ;;  %v5204_v34 = vpop.f32.mrf.mxu2 }
 0x1b6   : > { %6486 = vst [vmem:[#allocation29_spill] sm:$0xff] %v5204_v34  ;;  %v3045_v34 = vld [vmem:[#allocation9 + $0x108] sm:$0xff] }
 0x1b7   : > { %v1058_v40 = vpop.f32.mrf.mxu3 }
 0x1b8   : > { %v5206_v41 = vadd.f32 %v1267_v31, %v1058_v40 }
 0x1ba   : > { %v1270_v43 = vpop.f32.mrf.mxu0  ;;  %3953 = vmatmul.msk.f32.gmra.mxu1 %vm812_vm1, %v2176_v39  ;;  %4033 = vmatmul.msk.f32.gmra.mxu2 %vm812_vm1, %v907_v60  ;;  %v2769_v39 = vld [vmem:[#allocation9 + $0xf8] sm:$0xff] }
 0x1bb   : > { %2878 = vmatpush.msra.mxu3 %v2769_v39 }
 0x1bc   : > { %3911 = vmatmul.msk.f32.gmra.mxu3 %vm812_vm1, %v911_v45 }
 0x1bd   : > { %4048 = vmatmul.msk.f32.gmra.mxu0 %vm812_vm1, %v2177_v50  ;;  %v5214_v48 = vpop.f32.mrf.mxu2 }
 0x1be   : > { %6488 = vst [vmem:[#allocation31_spill] sm:$0xff] %v5214_v48 }
 0x1bf   : > { %v1061_v53 = vpop.f32.mrf.mxu3 }
 0x1c0   : > { %v5216_v55 = vadd.f32 %v1270_v43, %v1061_v53  ;;  %v3047_v43 = vld [vmem:[#allocation9 + $0x118] sm:$0xff] }
 0x1c1   : > { %3156 = vmatpush.msra.mxu2 %v3047_v43 }
 0x1c2   : > { %v1273_v56 = vpop.f32.mrf.mxu0  ;;  %3954 = vmatmul.msk.f32.gmra.mxu1 %vm812_vm1, %v2177_v50  ;;  %4034 = vmatmul.msk.f32.gmra.mxu2 %vm812_vm1, %v908_v10  ;;  %v5239_v10 = vpop.f32.mrf.mxu1 }
 0x1c3   : > { %6491 = vst [vmem:[#allocation34_spill] sm:$0xff] %v5239_v10 }
 0x1c4   : > { %3912 = vmatmul.msk.f32.gmra.mxu3 %vm812_vm1, %v912_v58 }
 0x1c5   : > { %4049 = vmatmul.msk.f32.gmra.mxu0 %vm812_vm1, %v5220_v59  ;;  %v5227_v60 = vpop.f32.mrf.mxu2 }
 0x1c6   : > { %6490 = vst [vmem:[#allocation33_spill] sm:$0xff] %v5227_v60 }
 0x1c7   : > { %v1064_v1 = vpop.f32.mrf.mxu3 }
 0x1c8   : > { %v5229_v2 = vadd.f32 %v1273_v56, %v1064_v1  ;;  %v2491_v1 = vld [vmem:[#allocation9 + $0xd8] sm:$0xff] }
 0x1c9   : > { %2600 = vmatpush.msrb.mxu1 %v2491_v1 }
 0x1ca   : > { %v1276_v3 = vpop.f32.mrf.mxu0  ;;  %3955 = vmatmul.msk.f32.gmra.mxu1 %vm812_vm1, %v5220_v59  ;;  %4035 = vmatmul.msk.f32.gmra.mxu2 %vm812_vm1, %v909_v26  ;;  %v5255_v21 = vpop.f32.mrf.mxu1 }
 0x1cb   : > { %6494 = vst [vmem:[#allocation37_spill] sm:$0xff] %v5255_v21  ;;  %2601 = vmatpush.msrb.mxu1 %v2490_v0 }
 0x1cc   : > { %3913 = vmatmul.msk.f32.gmra.mxu3 %vm812_vm1, %v913_v5 }
 0x1cd   : > { %4050 = vmatmul.msk.f32.gmra.mxu0 %vm812_vm1, %v5234_v7  ;;  %v5241_v11 = vpop.f32.mrf.mxu2 }
 0x1ce   : > { %6492 = vst [vmem:[#allocation35_spill] sm:$0xff] %v5241_v11 }
 0x1cf   : > { %v1067_v13 = vpop.f32.mrf.mxu3 }
 0x1d0   : > { %v5243_v16 = vadd.f32 %v1276_v3, %v1067_v13  ;;  %v916_v3 = vld [vmem:[#allocation2 + $0x159] sm:$0xff]  ;;  %v5276_v13 = vld [vmem:[#allocation2 + $0x62] sm:$0xff] }
 0x1d2   : > { %v1279_v17 = vpop.f32.mrf.mxu0  ;;  %3956 = vmatmul.msk.f32.gmra.mxu1 %vm812_vm1, %v5234_v7  ;;  %4036 = vmatmul.msk.f32.gmra.mxu2 %vm812_vm1, %v910_v36  ;;  %v5262_v36 = vld [vmem:[#allocation2 + $0x52] sm:$0xff] }
 0x1d4   : > { %3914 = vmatmul.msk.f32.gmra.mxu3 %vm812_vm1, %v914_v18 }
 0x1d5   : > { %4051 = vmatmul.msk.f32.gmra.mxu0 %vm812_vm1, %v5248_v23  ;;  %v5253_v25 = vpop.f32.mrf.mxu2 }
 0x1d6   : > { %6493 = vst [vmem:[#allocation36_spill] sm:$0xff] %v5253_v25  ;;  %v918_v25 = vld [vmem:[#allocation2 + $0x171] sm:$0xff] }
 0x1d7   : > { %v1070_v26 = vpop.f32.mrf.mxu3 }
 0x1d8   : > { %v5257_v29 = vadd.f32 %v1279_v17, %v1070_v26 }
 0x1da   : > { %v1282_v31 = vpop.f32.mrf.mxu0  ;;  %3957 = vmatmul.msk.f32.gmra.mxu1 %vm812_vm1, %v5248_v23  ;;  %4037 = vmatmul.msk.f32.gmra.mxu2 %vm812_vm1, %v911_v45 }
 0x1dc   : > { %3915 = vmatmul.msk.f32.gmra.mxu3 %vm812_vm1, %v915_v37 }
 0x1dd   : > { %4052 = vmatmul.msk.f32.gmra.mxu0 %vm812_vm1, %v5262_v36  ;;  %v5267_v40 = vpop.f32.mrf.mxu2 }
 0x1de   : > { %6495 = vst [vmem:[#allocation38_spill] sm:$0xff] %v5267_v40 }
 0x1df   : > { %v1073_v50 = vpop.f32.mrf.mxu3  ;;  %v5271_v56 = vpop.f32.mrf.mxu1 }
 0x1e0   : > { %v5269_v53 = vadd.f32 %v1282_v31, %v1073_v50  ;;  %v917_v50 = vld [vmem:[#allocation2 + $0x169] sm:$0xff] }
 0x1e2   : > { %v1285_v45 = vpop.f32.mrf.mxu0  ;;  %3958 = vmatmul.msk.f32.gmra.mxu1 %vm812_vm1, %v5262_v36  ;;  %4038 = vmatmul.msk.f32.gmra.mxu2 %vm812_vm1, %v912_v58  ;;  %v5290_v58 = vld [vmem:[#allocation2 + $0x6a] sm:$0xff] }
 0x1e4   : > { %3916 = vmatmul.msk.f32.gmra.mxu3 %vm812_vm1, %v916_v3 }
 0x1e5   : > { %4053 = vmatmul.msk.f32.gmra.mxu0 %vm812_vm1, %v5276_v13  ;;  %v5281_v17 = vpop.f32.mrf.mxu2 }
 0x1e6   : > { %6496 = vst [vmem:[#allocation39_spill] sm:$0xff] %v5281_v17 }
 0x1e7   : > { %v1076_v26 = vpop.f32.mrf.mxu3  ;;  %v5285_v39 = vpop.f32.mrf.mxu1 }
 0x1e8   : > { %v5283_v31 = vadd.f32 %v1285_v45, %v1076_v26 }
 0x1ea   : > { %v1288_v43 = vpop.f32.mrf.mxu0  ;;  %3959 = vmatmul.msk.f32.gmra.mxu1 %vm812_vm1, %v5276_v13  ;;  %4039 = vmatmul.msk.f32.gmra.mxu2 %vm812_vm1, %v913_v5  ;;  %v5304_v5 = vld [vmem:[#allocation2 + $0x7a] sm:$0xff] }
 0x1ec   : > { %3917 = vmatmul.msk.f32.gmra.mxu3 %vm812_vm1, %v917_v50 }
 0x1ed   : > { %4054 = vmatmul.msk.f32.gmra.mxu0 %vm812_vm1, %v5290_v58  ;;  %v5295_v1 = vpop.f32.mrf.mxu2 }
 0x1ee   : > { %6497 = vst [vmem:[#allocation40_spill] sm:$0xff] %v5295_v1 }
 0x1ef   : > { %v1079_v45 = vpop.f32.mrf.mxu3  ;;  %v5299_v17 = vpop.f32.mrf.mxu1 }
 0x1f0   : > { %v5297_v26 = vadd.f32 %v1288_v43, %v1079_v45 }
 0x1f2   : > { %v1291_v40 = vpop.f32.mrf.mxu0  ;;  %3960 = vmatmul.msk.f32.gmra.mxu1 %vm812_vm1, %v5290_v58  ;;  %4040 = vmatmul.msk.f32.gmra.mxu2 %vm812_vm1, %v914_v18  ;;  %v5318_v18 = vld [vmem:[#allocation2 + $0x82] sm:$0xff] }
 0x1f4   : > { %3918 = vmatmul.msk.f32.gmra.mxu3 %vm812_vm1, %v918_v25 }
 0x1f5   : > { %4055 = vmatmul.msk.f32.gmra.mxu0 %vm812_vm1, %v5304_v5  ;;  %v5309_v1 = vpop.f32.mrf.mxu2 }
 0x1f6   : > { %6498 = vst [vmem:[#allocation41_spill] sm:$0xff] %v5309_v1 }
 0x1f7   : > { %v1082_v43 = vpop.f32.mrf.mxu3  ;;  %v5313_v11 = vpop.f32.mrf.mxu1 }
 0x1f8   : > { %v5311_v45 = vadd.f32 %v1291_v40, %v1082_v43 }
 0x1fa   : > { %v1294_v60 = vpop.f32.mrf.mxu0  ;;  %3961 = vmatmul.msk.f32.gmra.mxu1 %vm812_vm1, %v5304_v5  ;;  %4041 = vmatmul.msk.f32.gmra.mxu2 %vm812_vm1, %v915_v37  ;;  %v5333_v37 = vld [vmem:[#allocation2 + $0x92] sm:$0xff] }
 0x1fc   : > { %3983 = vmatmul.msk.f32.vlgmr.msrb.gmra.mxu3 %vm812_vm1, %v4982_v42  ;;  %v3046_v42 = vld [vmem:[#allocation9 + $0x110] sm:$0xff] }
 0x1fd   : > { %4056 = vmatmul.msk.f32.gmra.mxu0 %vm812_vm1, %v5318_v18  ;;  %v5328_v43 = vpop.f32.mrf.mxu2  ;;  %3157 = vmatpush.msra.mxu2 %v3046_v42 }
 0x1fe   : > { %6499 = vst [vmem:[#allocation42_spill] sm:$0xff] %v5328_v43 }
 0x1ff   : > { %v1085_v1 = vpop.f32.mrf.mxu3  ;;  %v5326_v40 = vpop.f32.mrf.mxu1  ;;  %3158 = vmatpush.msra.mxu2 %v3045_v34 }
 0x200   : > { %v5324_v48 = vadd.f32 %v1294_v60, %v1085_v1 }
 0x201   : > { %3159 = vmatpush.msra.mxu2 %v3044_v32 }
 0x202   : > { %v1297_v47 = vpop.f32.mrf.mxu0  ;;  %3962 = vmatmul.msk.f32.gmra.mxu1 %vm812_vm1, %v5318_v18  ;;  %4042 = vmatmul.msk.f32.gmra.mxu2 %vm812_vm1, %v916_v3 }
 0x204   : > { %3984 = vmatmul.msk.f32.gmra.mxu3 %vm812_vm1, %v4992_v51  ;;  %v5348_v51 = vld [vmem:[#allocation2 + $0x9a] sm:$0xff] }
 0x205   : > { %4057 = vmatmul.msk.f32.gmra.mxu0 %vm812_vm1, %v5333_v37  ;;  %v5343_v3 = vpop.f32.mrf.mxu2 }
 0x206   : > { %6500 = vst [vmem:[#allocation43_spill] sm:$0xff] %v5343_v3  ;;  %v1928_v3 = vld [vmem:[#allocation2 + $0x181] sm:$0xff] }
 0x207   : > { %v1088_v60 = vpop.f32.mrf.mxu3  ;;  %v5341_v43 = vpop.f32.mrf.mxu1 }
 0x208   : > { %v5339_v1 = vadd.f32 %v1297_v47, %v1088_v60 }
 0x20a   : > { %v1300_v21 = vpop.f32.mrf.mxu0  ;;  %3963 = vmatmul.msk.f32.gmra.mxu1 %vm812_vm1, %v5333_v37  ;;  %4043 = vmatmul.msk.f32.gmra.mxu2 %vm812_vm1, %v917_v50  ;;  %v5361_v50 = vld [vmem:[#allocation2 + $0xaa] sm:$0xff] }
 0x20c   : > { %3985 = vmatmul.msk.f32.gmra.mxu3 %vm812_vm1, %v5002_v61 }
 0x20d   : > { %4058 = vmatmul.msk.f32.gmra.mxu0 %vm812_vm1, %v5348_v51  ;;  %v5367_v61 = vpop.f32.mrf.mxu2 }
 0x20e   : > { %6502 = vst [vmem:[#allocation45_spill] sm:$0xff] %v5367_v61 }
 0x20f   : > { %v1091_v47 = vpop.f32.mrf.mxu3  ;;  %v5356_v34 = vpop.f32.mrf.mxu1 }
 0x210   : > { %v5354_v42 = vadd.f32 %v1300_v21, %v1091_v47  ;;  %6501 = vst [vmem:[#allocation44_spill] sm:$0xff] %v5356_v34 }
 0x212   : > { %v1303_v60 = vpop.f32.mrf.mxu0  ;;  %3964 = vmatmul.msk.f32.gmra.mxu1 %vm812_vm1, %v5348_v51  ;;  %4044 = vmatmul.msk.f32.gmra.mxu2 %vm812_vm1, %v918_v25  ;;  %v5376_v25 = vld [vmem:[#allocation2 + $0xb2] sm:$0xff] }
 0x214   : > { %3986 = vmatmul.msk.f32.gmra.mxu3 %vm812_vm1, %v5012_v6  ;;  %v2768_v6 = vld [vmem:[#allocation9 + $0xf0] sm:$0xff] }
 0x215   : > { %4059 = vmatmul.msk.f32.gmra.mxu0 %vm812_vm1, %v5361_v50  ;;  %2879 = vmatpush.msra.mxu3 %v2768_v6 }
 0x217   : > { %v1094_v32 = vpop.f32.mrf.mxu3  ;;  %v5371_v47 = vpop.f32.mrf.mxu1 }
 0x218   : > { %v5369_v21 = vadd.f32 %v1303_v60, %v1094_v32  ;;  %6503 = vst [vmem:[#allocation46_spill] sm:$0xff] %v5371_v47  ;;  %v5382_v60 = vpop.f32.mrf.mxu2 }
 0x219   : > { %6504 = vst [vmem:[#allocation47_spill] sm:$0xff] %v5382_v60 }
 0x21a   : > { %v1306_v10 = vpop.f32.mrf.mxu0  ;;  %3965 = vmatmul.msk.f32.gmra.mxu1 %vm812_vm1, %v5361_v50  ;;  %4045 = vmatmul.msk.f32.gmra.mxu2 %vm812_vm1, %v1928_v3 }
 0x21c   : > { %3987 = vmatmul.msk.f32.gmra.mxu3 %vm812_vm1, %v5022_v14  ;;  %v5391_v14 = vld [vmem:[#allocation2 + $0xc2] sm:$0xff] }
 0x21d   : > { %4060 = vmatmul.msk.f32.gmra.mxu0 %vm812_vm1, %v5376_v25 }
 0x21f   : > { %v1097_v32 = vpop.f32.mrf.mxu3  ;;  %v5386_v52 = vpop.f32.mrf.mxu1 }
 0x220   : > { %v5384_v61 = vadd.f32 %v1306_v10, %v1097_v32  ;;  %6505 = vst [vmem:[#allocation48_spill] sm:$0xff] %v5386_v52  ;;  %v5401_v0 = vpop.f32.mrf.mxu2 }
 0x221   : > { %6507 = vst [vmem:[#allocation50_spill] sm:$0xff] %v5401_v0 }
 0x222   : > { %3966 = vmatmul.msk.f32.gmra.mxu1 %vm812_vm1, %v5376_v25  ;;  %4046 = vmatmul.msk.f32.gmra.mxu2 %vm812_vm1, %v1929_v19  ;;  %v1309_v10 = vpop.f32.mrf.mxu0  ;;  %v5407_v19 = vld [vmem:[#allocation2 + $0xca] sm:$0xff] }
 0x224   : > { %3988 = vmatmul.msk.f32.gmra.mxu3 %vm812_vm1, %v5032_v22 }
 0x225   : > { %4061 = vmatmul.msk.f32.gmra.mxu0 %vm812_vm1, %v5391_v14 }
 0x227   : > { %v1100_v3 = vpop.f32.mrf.mxu3  ;;  %v5399_v32 = vpop.f32.mrf.mxu1 }
 0x228   : > { %v5397_v6 = vadd.f32 %v1309_v10, %v1100_v3  ;;  %6506 = vst [vmem:[#allocation49_spill] sm:$0xff] %v5399_v32  ;;  %v5417_v0 = vpop.f32.mrf.mxu2 }
 0x229   : > { %6509 = vst [vmem:[#allocation52_spill] sm:$0xff] %v5417_v0 }
 0x22a   : > { %3967 = vmatmul.msk.f32.gmra.mxu1 %vm812_vm1, %v5391_v14  ;;  %4143 = vmatmul.msk.f32.vlgmr.msra.gmra.mxu2 %vm812_vm1, %v5220_v59  ;;  %v1312_v22 = vpop.f32.mrf.mxu0  ;;  %v5423_v59 = vld [vmem:[#allocation2 + $0xda] sm:$0xff] }
 0x22c   : > { %3989 = vmatmul.msk.f32.gmra.mxu3 %vm812_vm1, %v5041_v28 }
 0x22d   : > { %4062 = vmatmul.msk.f32.gmra.mxu0 %vm812_vm1, %v5407_v19 }
 0x22f   : > { %v1103_v10 = vpop.f32.mrf.mxu3  ;;  %v5415_v60 = vpop.f32.mrf.mxu1 }
 0x230   : > { %v5413_v3 = vadd.f32 %v1312_v22, %v1103_v10  ;;  %6508 = vst [vmem:[#allocation51_spill] sm:$0xff] %v5415_v60  ;;  %v5437_v10 = vld [vmem:[#allocation2 + $0xe2] sm:$0xff] }
 0x232   : > { %3968 = vmatmul.msk.f32.gmra.mxu1 %vm812_vm1, %v5407_v19  ;;  %4144 = vmatmul.msk.f32.gmra.mxu2 %vm812_vm1, %v5234_v7 }
 0x234   : > { %3990 = vmatmul.msk.f32.gmra.mxu3 %vm812_vm1, %v5049_v33  ;;  %v5443_v33 = vpop.f32.mrf.mxu2 }
 0x235   : > { %4063 = vmatmul.msk.f32.gmra.mxu0 %vm812_vm1, %v5423_v59  ;;  %6511 = vst [vmem:[#allocation54_spill] sm:$0xff] %v5443_v33 }
 0x237   : > { %v5429_v28 = vpop.f32.mrf.mxu3  ;;  %v5431_v22 = vpop.f32.mrf.mxu1 }
 0x238   : > { %6510 = vst [vmem:[#allocation53_spill] sm:$0xff] %v5431_v22 }
 0x23a   : > { %3969 = vmatmul.msk.f32.gmra.mxu1 %vm812_vm1, %v5423_v59  ;;  %4145 = vmatmul.msk.f32.gmra.mxu2 %vm812_vm1, %v5248_v23  ;;  %v5453_v23 = vld [vmem:[#allocation2 + $0xf2] sm:$0xff] }
 0x23c   : > { %3991 = vmatmul.msk.f32.gmra.mxu3 %vm812_vm1, %v5055_v38  ;;  %v5459_v38 = vpop.f32.mrf.mxu2 }
 0x23d   : > { %4064 = vmatmul.msk.f32.gmra.mxu0 %vm812_vm1, %v5437_v10  ;;  %6513 = vst [vmem:[#allocation56_spill] sm:$0xff] %v5459_v38 }
 0x23f   : > { %v5445_v7 = vpop.f32.mrf.mxu3  ;;  %v5447_v0 = vpop.f32.mrf.mxu1 }
 0x240   : > { %6512 = vst [vmem:[#allocation55_spill] sm:$0xff] %v5447_v0 }
 0x242   : > { %3970 = vmatmul.msk.f32.gmra.mxu1 %vm812_vm1, %v5437_v10  ;;  %4146 = vmatmul.msk.f32.gmra.mxu2 %vm812_vm1, %v5262_v36  ;;  %v5469_v36 = vld [vmem:[#allocation2 + $0xfa] sm:$0xff] }
 0x244   : > { %3992 = vmatmul.msk.f32.gmra.mxu3 %vm812_vm1, %v5065_v44  ;;  %v5479_v0 = vpop.f32.mrf.mxu2 }
 0x245   : > { %4065 = vmatmul.msk.f32.gmra.mxu0 %vm812_vm1, %v5453_v23  ;;  %6514 = vst [vmem:[#allocation57_spill] sm:$0xff] %v5479_v0 }
 0x247   : > { %v5461_v33 = vpop.f32.mrf.mxu3  ;;  %v5463_v22 = vpop.f32.mrf.mxu1 }
 0x24a   : > { %3971 = vmatmul.msk.f32.gmra.mxu1 %vm812_vm1, %v5453_v23  ;;  %4147 = vmatmul.msk.f32.gmra.mxu2 %vm812_vm1, %v5276_v13  ;;  %v5485_v13 = vld [vmem:[#allocation2 + $0x10a] sm:$0xff] }
 0x24c   : > { %3993 = vmatmul.msk.f32.gmra.mxu3 %vm812_vm1, %v5071_v49  ;;  %v5495_v52 = vpop.f32.mrf.mxu2 }
 0x24d   : > { %4066 = vmatmul.msk.f32.gmra.mxu0 %vm812_vm1, %v5469_v36  ;;  %6515 = vst [vmem:[#allocation58_spill] sm:$0xff] %v5495_v52  ;;  %v2489_v52 = vld [vmem:[#allocation9 + $0xc8] sm:$0xff] }
 0x24e   : > { %2602 = vmatpush.msrb.mxu1 %v2489_v52 }
 0x24f   : > { %v5475_v44 = vpop.f32.mrf.mxu3  ;;  %v5477_v38 = vpop.f32.mrf.mxu1 }
 0x252   : > { %3972 = vmatmul.msk.f32.gmra.mxu1 %vm812_vm1, %v5469_v36  ;;  %4148 = vmatmul.msk.f32.gmra.mxu2 %vm812_vm1, %v5290_v58  ;;  %v5501_v58 = vld [vmem:[#allocation2 + $0x112] sm:$0xff] }
 0x254   : > { %3994 = vmatmul.msk.f32.gmra.mxu3 %vm812_vm1, %v5082_v57  ;;  %v2767_v57 = vld [vmem:[#allocation9 + $0xe8] sm:$0xff] }
 0x255   : > { %4067 = vmatmul.msk.f32.gmra.mxu0 %vm812_vm1, %v5485_v13  ;;  %2880 = vmatpush.msra.mxu3 %v2767_v57  ;;  %v5523_v57 = vpop.f32.mrf.mxu0 }
 0x256   : > { %6517 = vst [vmem:[#allocation60_spill] sm:$0xff] %v5523_v57 }
 0x257   : > { %v5491_v49 = vpop.f32.mrf.mxu3  ;;  %v5493_v60 = vpop.f32.mrf.mxu1 }
 0x25a   : > { %3973 = vmatmul.msk.f32.gmra.mxu1 %vm812_vm1, %v5485_v13  ;;  %4149 = vmatmul.msk.f32.gmra.mxu2 %vm812_vm1, %v5304_v5  ;;  %v5515_v5 = vld [vmem:[#allocation2 + $0x122] sm:$0xff] }
 0x25c   : > { %3995 = vmatmul.msk.f32.gmra.mxu3 %vm812_vm1, %v5088_v63  ;;  %v5521_v63 = vpop.f32.mrf.mxu2 }
 0x25d   : > { %4068 = vmatmul.msk.f32.gmra.mxu0 %vm812_vm1, %v5501_v58  ;;  %6516 = vst [vmem:[#allocation59_spill] sm:$0xff] %v5521_v63  ;;  %v5546_v57 = vpop.f32.mrf.mxu0 }
 0x25e   : > { %6520 = vst [vmem:[#allocation63_spill] sm:$0xff] %v5546_v57 }
 0x25f   : > { %v5507_v0 = vpop.f32.mrf.mxu3  ;;  %v5509_v32 = vpop.f32.mrf.mxu1 }
 0x262   : > { %3974 = vmatmul.msk.f32.gmra.mxu1 %vm812_vm1, %v5501_v58  ;;  %4150 = vmatmul.msk.f32.gmra.mxu2 %vm812_vm1, %v5318_v18  ;;  %v3392_v18 = vld [vmem:[%s6444_s7 + $0x18] sm:$0xff] }
 0x263   : > { %3505 = vmatpush.msrb.mxu0 %v3392_v18 }
 0x264   : > { %3996 = vmatmul.msk.f32.gmra.mxu3 %vm812_vm1, %v5102_v8  ;;  %v5536_v8 = vld [vmem:[#allocation2 + $0x12a] sm:$0xff]  ;;  %v5542_v52 = vpop.f32.mrf.mxu2 }
 0x265   : > { %4069 = vmatmul.msk.f32.gmra.mxu0 %vm812_vm1, %v5515_v5  ;;  %6518 = vst [vmem:[#allocation61_spill] sm:$0xff] %v5542_v52  ;;  %v5566_v57 = vpop.f32.mrf.mxu0 }
 0x266   : > { %6523 = vst [vmem:[#allocation66_spill] sm:$0xff] %v5566_v57 }
 0x267   : > { %v5525_v9 = vpop.f32.mrf.mxu3  ;;  %v5527_v46 = vpop.f32.mrf.mxu1 }
 0x26a   : > { %3975 = vmatmul.msk.f32.gmra.mxu1 %vm812_vm1, %v5515_v5  ;;  %4151 = vmatmul.msk.f32.gmra.mxu2 %vm812_vm1, %v5333_v37  ;;  %v5554_v37 = vld [vmem:[#allocation2 + $0x13a] sm:$0xff] }
 0x26c   : > { %3997 = vmatmul.msk.f32.gmra.mxu3 %vm812_vm1, %v5113_v15  ;;  %v5564_v52 = vpop.f32.mrf.mxu2 }
 0x26d   : > { %4070 = vmatmul.msk.f32.gmra.mxu0 %vm812_vm1, %v5536_v8  ;;  %6522 = vst [vmem:[#allocation65_spill] sm:$0xff] %v5564_v52  ;;  %v5590_v57 = vpop.f32.mrf.mxu0 }
 0x26e   : > { %6526 = vst [vmem:[#allocation69_spill] sm:$0xff] %v5590_v57 }
 0x26f   : > { %v5544_v63 = vpop.f32.mrf.mxu3  ;;  %v5548_v47 = vpop.f32.mrf.mxu1 }
 0x270   : > { %6519 = vst [vmem:[#allocation62_spill] sm:$0xff] %v5544_v63 }
 0x272   : > { %3976 = vmatmul.msk.f32.gmra.mxu1 %vm812_vm1, %v5536_v8  ;;  %4152 = vmatmul.msk.f32.gmra.mxu2 %vm812_vm1, %v5348_v51  ;;  %v5572_v51 = vld [vmem:[#allocation2 + $0x142] sm:$0xff] }
 0x274   : > { %3998 = vmatmul.msk.f32.gmra.mxu3 %vm812_vm1, %v5130_v24  ;;  %v5582_v52 = vpop.f32.mrf.mxu2 }
 0x275   : > { %4071 = vmatmul.msk.f32.gmra.mxu0 %vm812_vm1, %v5554_v37  ;;  %6525 = vst [vmem:[#allocation68_spill] sm:$0xff] %v5582_v52  ;;  %v2488_v52 = vld [vmem:[#allocation9 + $0xc0] sm:$0xff]  ;;  %v5612_v57 = vpop.f32.mrf.mxu0 }
 0x276   : > { %2603 = vmatpush.msrb.mxu1 %v2488_v52  ;;  %6529 = vst [vmem:[#allocation72_spill] sm:$0xff] %v5612_v57 }
 0x277   : > { %v5560_v15 = vpop.f32.mrf.mxu3  ;;  %v5562_v18 = vpop.f32.mrf.mxu1 }
 0x278   : > { %6521 = vst [vmem:[#allocation64_spill] sm:$0xff] %v5560_v15 }
 0x27a   : > { %3977 = vmatmul.msk.f32.gmra.mxu1 %vm812_vm1, %v5554_v37  ;;  %4153 = vmatmul.msk.f32.gmra.mxu2 %vm812_vm1, %v5361_v50  ;;  %v5588_v50 = vld [vmem:[#allocation2 + $0x152] sm:$0xff] }
 0x27c   : > { %3999 = vmatmul.msk.f32.gmra.mxu3 %vm812_vm1, %v5141_v35 }
 0x27d   : > { %4072 = vmatmul.msk.f32.gmra.mxu0 %vm812_vm1, %v5572_v51 }
 0x27f   : > { %v5578_v24 = vpop.f32.mrf.mxu3  ;;  %v5580_v15 = vpop.f32.mrf.mxu1 }
 0x280   : > { %6524 = vst [vmem:[#allocation67_spill] sm:$0xff] %v5578_v24 }
 0x282   : > { %3978 = vmatmul.msk.f32.gmra.mxu1 %vm812_vm1, %v5572_v51  ;;  %4154 = vmatmul.msk.f32.gmra.mxu2 %vm812_vm1, %v5376_v25  ;;  %v5604_v25 = vld [vmem:[#allocation2 + $0x15a] sm:$0xff] }
 0x284   : > { %4000 = vmatmul.msk.f32.gmra.mxu3 %vm812_vm1, %v5157_v54  ;;  %v5610_v54 = vpop.f32.mrf.mxu2 }
 0x285   : > { %4073 = vmatmul.msk.f32.gmra.mxu0 %vm812_vm1, %v5588_v50  ;;  %6528 = vst [vmem:[#allocation71_spill] sm:$0xff] %v5610_v54  ;;  %v5632_v54 = vpop.f32.mrf.mxu0 }
 0x286   : > { %6533 = vst [vmem:[#allocation76_spill] sm:$0xff] %v5632_v54 }
 0x287   : > { %v5596_v35 = vpop.f32.mrf.mxu3  ;;  %v5598_v24 = vpop.f32.mrf.mxu1 }
 0x288   : > { %6527 = vst [vmem:[#allocation70_spill] sm:$0xff] %v5596_v35 }
 0x28a   : > { %3979 = vmatmul.msk.f32.gmra.mxu1 %vm812_vm1, %v5588_v50  ;;  %4155 = vmatmul.msk.f32.gmra.mxu2 %vm812_vm1, %v5391_v14  ;;  %v5622_v14 = vld [vmem:[#allocation2 + $0x16a] sm:$0xff] }
 0x28c   : > { %4001 = vmatmul.msk.f32.gmra.mxu3 %vm812_vm1, %v5163_v62  ;;  %v5628_v62 = vpop.f32.mrf.mxu2 }
 0x28d   : > { %4074 = vmatmul.msk.f32.gmra.mxu0 %vm812_vm1, %v5604_v25  ;;  %6531 = vst [vmem:[#allocation74_spill] sm:$0xff] %v5628_v62  ;;  %v1592_v62 = vadd.f32 %v5463_v22, %v5173_v4  ;;  %v1593_v4 = vadd.f32 %v5477_v38, %v5185_v20  ;;  %v5684_v20 = vld [vmem:[#allocation2 + $0x18a] sm:$0xff] }
 0x28f   : > { %v5614_v35 = vpop.f32.mrf.mxu3  ;;  %v5616_v63 = vpop.f32.mrf.mxu1 }
 0x290   : > { %6530 = vst [vmem:[#allocation73_spill] sm:$0xff] %v5614_v35 }
 0x292   : > { %3980 = vmatmul.msk.f32.gmra.mxu1 %vm812_vm1, %v5604_v25  ;;  %4156 = vmatmul.msk.f32.gmra.mxu2 %vm812_vm1, %v5407_v19  ;;  %v5640_v19 = vld [vmem:[#allocation2 + $0x172] sm:$0xff] }
 0x294   : > { %4002 = vmatmul.msk.f32.gmra.mxu3 %vm812_vm1, %v5179_v12  ;;  %v2766_v12 = vld [vmem:[#allocation9 + $0xe0] sm:$0xff]  ;;  %v5652_v34 = vpop.f32.mrf.mxu2 }
 0x295   : > { %4075 = vmatmul.msk.f32.gmra.mxu0 %vm812_vm1, %v5622_v14  ;;  %2881 = vmatpush.msra.mxu3 %v2766_v12  ;;  %6535 = vst [vmem:[#allocation78_spill] sm:$0xff] %v5652_v34  ;;  %v5662_v12 = vld [vmem:[#allocation2 + $0x182] sm:$0xff]  ;;  %v2455_v34 = vld [vmem:[#allocation2 + $0x30] sm:$0xff] }
 0x297   : > { %v5630_v52 = vpop.f32.mrf.mxu3  ;;  %v5634_v57 = vpop.f32.mrf.mxu1 }
 0x298   : > { %6532 = vst [vmem:[#allocation75_spill] sm:$0xff] %v5630_v52 }
 0x29a   : > { %3981 = vmatmul.msk.f32.gmra.mxu1 %vm812_vm1, %v5622_v14  ;;  %4157 = vmatmul.msk.f32.gmra.mxu2 %vm812_vm1, %v5423_v59  ;;  %v5654_v59 = vpop.f32.mrf.mxu0 }
 0x29b   : > { %6536 = vst [vmem:[#allocation79_spill] sm:$0xff] %v5654_v59 }
 0x29c   : > { %4003 = vmatmul.msk.f32.gmra.mxu3 %vm812_vm1, %v5187_v27  ;;  %v5660_v27 = vld [vmem:[#allocation2 + $0x110] sm:$0xff]  ;;  %v5677_v59 = vpop.f32.mrf.mxu2 }
 0x29d   : > { %4076 = vmatmul.msk.f32.gmra.mxu0 %vm812_vm1, %v5640_v19  ;;  %6537 = vst [vmem:[#allocation80_spill] sm:$0xff] %v5677_v59  ;;  %v2456_v59 = vld [vmem:[#allocation2 + $0x38] sm:$0xff] }
 0x29f   : > { %v1782_v54 = vpop.f32.mrf.mxu3  ;;  %v5650_v35 = vpop.f32.mrf.mxu1 }
 0x2a0   : > { %v5648_v52 = vadd.f32 %v1782_v54, %v1592_v62 }
 0x2a2   : > { %6534 = vst [vmem:[#allocation77_spill] sm:$0xff] %v5648_v52  ;;  %3982 = vmatmul.msk.f32.gmra.mxu1 %vm812_vm1, %v5640_v19  ;;  %4158 = vmatmul.msk.f32.gmra.mxu2 %vm812_vm1, %v5437_v10  ;;  %v3391_v10 = vld [vmem:[%s6444_s7 + $0x10] sm:$0xff]  ;;  %v5682_v52 = vld [vmem:[#allocation2 + $0x120] sm:$0xff]  ;;  %v5686_v38 = vpop.f32.mrf.mxu0 }
 0x2a3   : > { %6538 = vst [vmem:[#allocation81_spill] sm:$0xff] %v5686_v38  ;;  %3506 = vmatpush.msrb.mxu0 %v3391_v10  ;;  %v5701_v38 = vld [vmem:[#allocation2 + $0x128] sm:$0xff] }
 0x2a4   : > { %4004 = vmatmul.msk.f32.gmra.mxu3 %vm812_vm1, %v5660_v27  ;;  %v5705_v10 = vpop.f32.mrf.mxu2 }
 0x2a5   : > { %4077 = vmatmul.msk.f32.gmra.mxu0 %vm812_vm1, %v5662_v12  ;;  %6540 = vst [vmem:[#allocation83_spill] sm:$0xff] %v5705_v10  ;;  %v2458_v10 = vld [vmem:[#allocation2 + $0x50] sm:$0xff] }
 0x2a7   : > { %v1785_v22 = vpop.f32.mrf.mxu3  ;;  %v5672_v62 = vpop.f32.mrf.mxu1 }
 0x2a8   : > { %v5670_v54 = vadd.f32 %v1785_v22, %v1593_v4  ;;  %v1594_v4 = vadd.f32 %v5493_v60, %v5198_v30  ;;  %v1595_v30 = vadd.f32 %v5509_v32, %v5206_v41 }
 0x2aa   : > { %4079 = vmatmul.msk.f32.vlgmr.msrb.gmra.mxu1 %vm812_vm1, %v2455_v34  ;;  %4159 = vmatmul.msk.f32.gmra.mxu2 %vm812_vm1, %v5453_v23 }
 0x2ac   : > { %4005 = vmatmul.msk.f32.gmra.mxu3 %vm812_vm1, %v5682_v52  ;;  %v5722_v41 = vpop.f32.mrf.mxu2 }
 0x2ad   : > { %4078 = vmatmul.msk.f32.gmra.mxu0 %vm812_vm1, %v5684_v20  ;;  %6541 = vst [vmem:[#allocation84_spill] sm:$0xff] %v5722_v41  ;;  %v2459_v41 = vld [vmem:[#allocation2 + $0x60] sm:$0xff] }
 0x2af   : > { %v1788_v34 = vpop.f32.mrf.mxu3  ;;  %v5696_v23 = vpop.f32.mrf.mxu1 }
 0x2b0   : > { %v5694_v22 = vadd.f32 %v1788_v34, %v1594_v4 }
 0x2b2   : > { %6539 = vst [vmem:[#allocation82_spill] sm:$0xff] %v5694_v22  ;;  %4080 = vmatmul.msk.f32.gmra.mxu1 %vm812_vm1, %v2456_v59  ;;  %4160 = vmatmul.msk.f32.gmra.mxu2 %vm812_vm1, %v5469_v36  ;;  %v2457_v22 = vld [vmem:[#allocation2 + $0x48] sm:$0xff]  ;;  %v5716_v36 = vld [vmem:[#allocation2 + $0x138] sm:$0xff]  ;;  %v1596_v59 = vadd.f32 %v5527_v46, %v5216_v55  ;;  %v1597_v46 = vadd.f32 %v5548_v47, %v5229_v2 }
 0x2b3   : > { %v1598_v2 = vadd.f32 %v5562_v18, %v5243_v16  ;;  %v1599_v16 = vadd.f32 %v5580_v15, %v5257_v29  ;;  %v1600_v29 = vadd.f32 %v5598_v24, %v5269_v53 }
 0x2b4   : > { %4006 = vmatmul.msk.f32.gmra.mxu3 %vm812_vm1, %v5701_v38 }
 0x2b7   : > { %v1791_v60 = vpop.f32.mrf.mxu3  ;;  %v5711_v34 = vpop.f32.mrf.mxu1 }
 0x2b8   : > { %v5709_v4 = vadd.f32 %v1791_v60, %v1595_v30 }
 0x2ba   : > { %4081 = vmatmul.msk.f32.gmra.mxu1 %vm812_vm1, %v2457_v22  ;;  %4161 = vmatmul.msk.f32.gmra.mxu2 %vm812_vm1, %v5485_v13  ;;  %v5731_v13 = vld [vmem:[#allocation2 + $0x140] sm:$0xff] }
 0x2bc   : > { %4007 = vmatmul.msk.f32.gmra.mxu3 %vm812_vm1, %v5716_v36 }
 0x2bf   : > { %v1794_v32 = vpop.f32.mrf.mxu3  ;;  %v5726_v60 = vpop.f32.mrf.mxu1 }
 0x2c0   : > { %v5724_v30 = vadd.f32 %v1794_v32, %v1596_v59  ;;  %v5741_v32 = vpop.f32.mrf.mxu2 }
 0x2c1   : > { %6542 = vst [vmem:[#allocation85_spill] sm:$0xff] %v5741_v32 }
 0x2c2   : > { %4082 = vmatmul.msk.f32.gmra.mxu1 %vm812_vm1, %v2458_v10  ;;  %4162 = vmatmul.msk.f32.gmra.mxu2 %vm812_vm1, %v5501_v58  ;;  %v5746_v58 = vld [vmem:[#allocation2 + $0x150] sm:$0xff] }
 0x2c4   : > { %4008 = vmatmul.msk.f32.gmra.mxu3 %vm812_vm1, %v5731_v13 }
 0x2c7   : > { %v1797_v55 = vpop.f32.mrf.mxu3  ;;  %v5739_v59 = vpop.f32.mrf.mxu1 }
 0x2c8   : > { %v5737_v22 = vadd.f32 %v1797_v55, %v1597_v46  ;;  %v2460_v55 = vld [vmem:[#allocation2 + $0x68] sm:$0xff]  ;;  %v5756_v32 = vpop.f32.mrf.mxu2 }
 0x2c9   : > { %6543 = vst [vmem:[#allocation86_spill] sm:$0xff] %v5756_v32 }
 0x2ca   : > { %4083 = vmatmul.msk.f32.gmra.mxu1 %vm812_vm1, %v2459_v41  ;;  %4163 = vmatmul.msk.f32.gmra.mxu2 %vm812_vm1, %v5515_v5  ;;  %v5761_v5 = vld [vmem:[#allocation2 + $0x158] sm:$0xff] }
 0x2cc   : > { %4009 = vmatmul.msk.f32.gmra.mxu3 %vm812_vm1, %v5746_v58 }
 0x2cf   : > { %v1800_v47 = vpop.f32.mrf.mxu3  ;;  %v5754_v46 = vpop.f32.mrf.mxu1 }
 0x2d0   : > { %v5752_v10 = vadd.f32 %v1800_v47, %v1598_v2  ;;  %v2461_v47 = vld [vmem:[#allocation2 + $0x78] sm:$0xff] }
 0x2d2   : > { %4084 = vmatmul.msk.f32.gmra.mxu1 %vm812_vm1, %v2460_v55  ;;  %4164 = vmatmul.msk.f32.gmra.mxu2 %vm812_vm1, %v5536_v8  ;;  %v5774_v8 = vld [vmem:[#allocation2 + $0x168] sm:$0xff]  ;;  %v5778_v55 = vpop.f32.mrf.mxu2 }
 0x2d4   : > { %4010 = vmatmul.msk.f32.gmra.mxu3 %vm812_vm1, %v5761_v5 }
 0x2d7   : > { %v1803_v18 = vpop.f32.mrf.mxu3  ;;  %v5769_v2 = vpop.f32.mrf.mxu1 }
 0x2d8   : > { %v5767_v41 = vadd.f32 %v1803_v18, %v1599_v16  ;;  %v2462_v18 = vld [vmem:[#allocation2 + $0x80] sm:$0xff] }
 0x2da   : > { %4085 = vmatmul.msk.f32.gmra.mxu1 %vm812_vm1, %v2461_v47  ;;  %4165 = vmatmul.msk.f32.gmra.mxu2 %vm812_vm1, %v5554_v37  ;;  %v5789_v37 = vld [vmem:[#allocation2 + $0x170] sm:$0xff]  ;;  %v1601_v47 = vadd.f32 %v5616_v63, %v5283_v31  ;;  %v5795_v53 = vpop.f32.mrf.mxu2  ;;  %v1602_v63 = vadd.f32 %v5634_v57, %v5297_v26 }
 0x2dc   : > { %4011 = vmatmul.msk.f32.gmra.mxu3 %vm812_vm1, %v5774_v8 }
 0x2df   : > { %v1806_v15 = vpop.f32.mrf.mxu3  ;;  %v5784_v32 = vpop.f32.mrf.mxu1 }
 0x2e0   : > { %v5782_v16 = vadd.f32 %v1806_v15, %v1600_v29  ;;  %v2463_v15 = vld [vmem:[#allocation2 + $0x90] sm:$0xff] }
 0x2e2   : > { %6544 = vst [vmem:[#allocation87_spill] sm:$0xff] %v5782_v16  ;;  %4086 = vmatmul.msk.f32.gmra.mxu1 %vm812_vm1, %v2462_v18  ;;  %4166 = vmatmul.msk.f32.gmra.mxu2 %vm812_vm1, %v5572_v51  ;;  %v3390_v18 = vld [vmem:[%s6444_s7 + $0x8] sm:$0xff]  ;;  %v5805_v51 = vld [vmem:[#allocation2 + $0x180] sm:$0xff] }
 0x2e3   : > { %3507 = vmatpush.msrb.mxu0 %v3390_v18  ;;  %v1603_v18 = vadd.f32 %v5650_v35, %v5311_v45 }
 0x2e4   : > { %4012 = vmatmul.msk.f32.gmra.mxu3 %vm812_vm1, %v5789_v37 }
 0x2e7   : > { %v1809_v24 = vpop.f32.mrf.mxu3  ;;  %v5809_v31 = vpop.f32.mrf.mxu1 }
 0x2e8   : > { %v5797_v29 = vadd.f32 %v1809_v24, %v1601_v47 }
 0x2ea   : > { %6545 = vst [vmem:[#allocation88_spill] sm:$0xff] %v5797_v29  ;;  %4087 = vmatmul.msk.f32.gmra.mxu1 %vm812_vm1, %v2463_v15  ;;  %4167 = vmatmul.msk.f32.gmra.mxu2 %vm812_vm1, %v5588_v50  ;;  %v5815_v29 = vpop.f32.mrf.mxu2  ;;  %v2464_v15 = vld [vmem:[#allocation2 + $0x98] sm:$0xff]  ;;  %v5820_v50 = vld [vmem:[#allocation2 + $0x188] sm:$0xff] }
 0x2ec   : > { %4013 = vmatmul.msk.f32.gmra.mxu3 %vm812_vm1, %v5805_v51 }
 0x2ef   : > { %v1812_v47 = vpop.f32.mrf.mxu3  ;;  %v5826_v26 = vpop.f32.mrf.mxu1 }
 0x2f0   : > { %v5813_v24 = vadd.f32 %v1812_v47, %v1602_v63  ;;  %v2465_v47 = vld [vmem:[#allocation2 + $0xa8] sm:$0xff] }
 0x2f2   : > { %6546 = vst [vmem:[#allocation89_spill] sm:$0xff] %v5813_v24  ;;  %4088 = vmatmul.msk.f32.gmra.mxu1 %vm812_vm1, %v2464_v15  ;;  %4168 = vmatmul.msk.f32.gmra.mxu2 %vm812_vm1, %v5604_v25  ;;  %v5830_v24 = vpop.f32.mrf.mxu2  ;;  %v2733_v25 = vld [vmem:[#allocation2 + $0x31] sm:$0xff]  ;;  %v1604_v15 = vadd.f32 %v5672_v62, %v5324_v48 }
 0x2f4   : > { %4014 = vmatmul.msk.f32.gmra.mxu3 %vm812_vm1, %v5820_v50 }
 0x2f7   : > { %v1815_v57 = vpop.f32.mrf.mxu3  ;;  %v5840_v16 = vpop.f32.mrf.mxu1 }
 0x2f8   : > { %v5828_v63 = vadd.f32 %v1815_v57, %v1603_v18  ;;  %v2466_v18 = vld [vmem:[#allocation2 + $0xb0] sm:$0xff]  ;;  %v2734_v57 = vld [vmem:[#allocation2 + $0x39] sm:$0xff] }
 0x2fa   : > { %4089 = vmatmul.msk.f32.gmra.mxu1 %vm812_vm1, %v2465_v47  ;;  %4169 = vmatmul.msk.f32.gmra.mxu2 %vm812_vm1, %v5622_v14  ;;  %v5846_v14 = vpop.f32.mrf.mxu2  ;;  %v1605_v47 = vadd.f32 %v5696_v23, %v5339_v1 }
 0x2fc   : > { %4111 = vmatmul.msk.f32.vlgmr.msra.gmra.mxu3 %vm812_vm1, %v2733_v25  ;;  %v2467_v25 = vld [vmem:[#allocation2 + $0xc0] sm:$0xff] }
 0x2ff   : > { %v1818_v45 = vpop.f32.mrf.mxu3 }
 0x300   : > { %v5838_v35 = vadd.f32 %v1818_v45, %v1604_v15  ;;  %v5852_v15 = vpop.f32.mrf.mxu1  ;;  %v1606_v45 = vadd.f32 %v5711_v34, %v5354_v42  ;;  %v5872_v42 = vpop.f32.mrf.mxu0 }
 0x302   : > { %4090 = vmatmul.msk.f32.gmra.mxu1 %vm812_vm1, %v2466_v18  ;;  %4170 = vmatmul.msk.f32.gmra.mxu2 %vm812_vm1, %v5640_v19  ;;  %v2735_v19 = vld [vmem:[#allocation2 + $0x49] sm:$0xff]  ;;  %v5860_v18 = vpop.f32.mrf.mxu2 }
 0x304   : > { %4112 = vmatmul.msk.f32.gmra.mxu3 %vm812_vm1, %v2734_v57  ;;  %v2468_v57 = vld [vmem:[#allocation2 + $0xc8] sm:$0xff] }
 0x307   : > { %v1821_v48 = vpop.f32.mrf.mxu3 }
 0x308   : > { %v5850_v62 = vadd.f32 %v1821_v48, %v1605_v47  ;;  %v2736_v47 = vld [vmem:[#allocation2 + $0x51] sm:$0xff]  ;;  %v1607_v48 = vadd.f32 %v5726_v60, %v5369_v21 }
 0x30a   : > { %4091 = vmatmul.msk.f32.gmra.mxu1 %vm812_vm1, %v2467_v25  ;;  %4171 = vmatmul.msk.f32.gmra.mxu2 %vm812_vm1, %v5662_v12  ;;  %v5868_v12 = vpop.f32.mrf.mxu1 }
 0x30c   : > { %4113 = vmatmul.msk.f32.gmra.mxu3 %vm812_vm1, %v2735_v19  ;;  %v5876_v19 = vpop.f32.mrf.mxu2 }
 0x30f   : > { %v1824_v1 = vpop.f32.mrf.mxu3 }
 0x310   : > { %v5862_v23 = vadd.f32 %v1824_v1, %v1606_v45  ;;  %v2469_v45 = vld [vmem:[#allocation2 + $0xd8] sm:$0xff] }
 0x311   : > { %v3041_v1 = vld [vmem:[#allocation2 + $0x19a] sm:$0xff] }
 0x312   : > { %6547 = vst [vmem:[#allocation90_spill] sm:$0xff] %v5862_v23  ;;  %4092 = vmatmul.msk.f32.gmra.mxu1 %vm812_vm1, %v2468_v57  ;;  %4172 = vmatmul.msk.f32.gmra.mxu2 %vm812_vm1, %v5684_v20  ;;  %v2737_v20 = vld [vmem:[#allocation2 + $0x61] sm:$0xff]  ;;  %v1608_v57 = vadd.f32 %v5739_v59, %v5384_v61  ;;  %v5883_v21 = vpop.f32.mrf.mxu1  ;;  %v1609_v61 = vadd.f32 %v5754_v46, %v5397_v6 }
 0x313   : > { %v1610_v6 = vadd.f32 %v5769_v2, %v5413_v3  ;;  %v2473_v2 = vld [vmem:[#allocation2 + $0x108] sm:$0xff] }
 0x314   : > { %4114 = vmatmul.msk.f32.gmra.mxu3 %vm812_vm1, %v2736_v47  ;;  %v5889_v23 = vpop.f32.mrf.mxu2 }
 0x317   : > { %v1827_v34 = vpop.f32.mrf.mxu3 }
 0x318   : > { %v5874_v25 = vadd.f32 %v1827_v34, %v1607_v48  ;;  %v5887_v48 = vpop.f32.mrf.mxu0  ;;  %v2470_v34 = vld [vmem:[#allocation2 + $0xe0] sm:$0xff] }
 0x31a   : > { %6548 = vst [vmem:[#allocation91_spill] sm:$0xff] %v5874_v25  ;;  %4093 = vmatmul.msk.f32.gmra.mxu1 %vm812_vm1, %v2469_v45  ;;  %4173 = vmatmul.msk.f32.gmra.mxu2 %vm812_vm1, %v3041_v1  ;;  %v3042_v25 = vld [vmem:[#allocation2 + $0x1a2] sm:$0xff] }
 0x31b   : > { %v2738_v45 = vld [vmem:[#allocation2 + $0x69] sm:$0xff] }
 0x31c   : > { %4115 = vmatmul.msk.f32.gmra.mxu3 %vm812_vm1, %v2737_v20  ;;  %v5898_v20 = vpop.f32.mrf.mxu1 }
 0x31f   : > { %v1830_v60 = vpop.f32.mrf.mxu3 }
 0x320   : > { %v5885_v47 = vadd.f32 %v1830_v60, %v1608_v57  ;;  %v2471_v57 = vld [vmem:[#allocation2 + $0xf0] sm:$0xff]  ;;  %v3389_v60 = vld [vmem:[%s6444_s7] sm:$0xff] }
 0x321   : > { %3508 = vmatpush.msrb.mxu0 %v3389_v60 }
 0x322   : > { %6549 = vst [vmem:[#allocation92_spill] sm:$0xff] %v5885_v47  ;;  %4094 = vmatmul.msk.f32.gmra.mxu1 %vm812_vm1, %v2470_v34  ;;  %4174 = vmatmul.msk.f32.gmra.mxu2 %vm812_vm1, %v3042_v25  ;;  %v5903_v47 = vpop.f32.mrf.mxu0  ;;  %v2739_v25 = vld [vmem:[#allocation2 + $0x79] sm:$0xff] }
 0x324   : > { %4116 = vmatmul.msk.f32.gmra.mxu3 %vm812_vm1, %v2738_v45  ;;  %v2472_v45 = vld [vmem:[#allocation2 + $0xf8] sm:$0xff] }
 0x327   : > { %v1833_v59 = vpop.f32.mrf.mxu3 }
 0x328   : > { %v5896_v1 = vadd.f32 %v1833_v59, %v1609_v61  ;;  %v5911_v61 = vpop.f32.mrf.mxu1  ;;  %v2740_v59 = vld [vmem:[#allocation2 + $0x81] sm:$0xff] }
 0x32a   : > { %6550 = vst [vmem:[#allocation93_spill] sm:$0xff] %v5896_v1  ;;  %4095 = vmatmul.msk.f32.gmra.mxu1 %vm812_vm1, %v2471_v57  ;;  %v1316_v1 = vadd.f32 %v5271_v56, %v5429_v28  ;;  %v5917_v57 = vpop.f32.mrf.mxu0 }
 0x32c   : > { %4117 = vmatmul.msk.f32.gmra.mxu3 %vm812_vm1, %v2739_v25  ;;  %v1611_v60 = vadd.f32 %v5784_v32, %v1316_v1  ;;  %v2742_v1 = vld [vmem:[#allocation2 + $0x99] sm:$0xff] }
 0x32f   : > { %v1836_v46 = vpop.f32.mrf.mxu3 }
 0x330   : > { %v5909_v34 = vadd.f32 %v1836_v46, %v1610_v6  ;;  %v2741_v6 = vld [vmem:[#allocation2 + $0x91] sm:$0xff]  ;;  %v1319_v46 = vadd.f32 %v5285_v39, %v5445_v7 }
 0x332   : > { %4096 = vmatmul.msk.f32.gmra.mxu1 %vm812_vm1, %v2472_v45  ;;  %v5926_v45 = vpop.f32.mrf.mxu1  ;;  %v1612_v56 = vadd.f32 %v5809_v31, %v1319_v46  ;;  %v5929_v28 = vpop.f32.mrf.mxu0 }
 0x334   : > { %4118 = vmatmul.msk.f32.gmra.mxu3 %vm812_vm1, %v2740_v59 }
 0x337   : > { %v1839_v25 = vpop.f32.mrf.mxu3 }
 0x338   : > { %v5920_v3 = vadd.f32 %v1839_v25, %v1611_v60  ;;  %v1322_v60 = vadd.f32 %v5299_v17, %v5461_v33 }
 0x33a   : > { %4097 = vmatmul.msk.f32.gmra.mxu1 %vm812_vm1, %v2473_v2  ;;  %v1613_v39 = vadd.f32 %v5826_v26, %v1322_v60  ;;  %v5939_v7 = vpop.f32.mrf.mxu1  ;;  %v5943_v2 = vpop.f32.mrf.mxu0  ;;  %v2745_v60 = vld [vmem:[#allocation2 + $0xc1] sm:$0xff] }
 0x33c   : > { %4119 = vmatmul.msk.f32.gmra.mxu3 %vm812_vm1, %v2741_v6  ;;  %v2743_v6 = vld [vmem:[#allocation2 + $0xa9] sm:$0xff] }
 0x33f   : > { %v1842_v59 = vpop.f32.mrf.mxu3 }
 0x340   : > { %v5931_v32 = vadd.f32 %v1842_v59, %v1612_v56  ;;  %v2744_v59 = vld [vmem:[#allocation2 + $0xb1] sm:$0xff] }
 0x342   : > { %4098 = vmatmul.msk.f32.gmra.mxu1 %vm812_vm1, %v5660_v27  ;;  %v1325_v27 = vadd.f32 %v5313_v11, %v5475_v44  ;;  %v5953_v46 = vpop.f32.mrf.mxu1  ;;  %v5955_v56 = vpop.f32.mrf.mxu0 }
 0x344   : > { %4120 = vmatmul.msk.f32.gmra.mxu3 %vm812_vm1, %v2742_v1  ;;  %v1614_v17 = vadd.f32 %v5840_v16, %v1325_v27 }
 0x347   : > { %v1845_v25 = vpop.f32.mrf.mxu3 }
 0x348   : > { %v5941_v31 = vadd.f32 %v1845_v25, %v1613_v39  ;;  %v2746_v25 = vld [vmem:[#allocation2 + $0xc9] sm:$0xff] }
 0x34a   : > { %4099 = vmatmul.msk.f32.gmra.mxu1 %vm812_vm1, %v5682_v52  ;;  %v1328_v52 = vadd.f32 %v5326_v40, %v5491_v49  ;;  %v5965_v1 = vpop.f32.mrf.mxu1  ;;  %v5972_v39 = vpop.f32.mrf.mxu0 }
 0x34c   : > { %4121 = vmatmul.msk.f32.gmra.mxu3 %vm812_vm1, %v2743_v6  ;;  %v1615_v11 = vadd.f32 %v5852_v15, %v1328_v52  ;;  %v6551_v6 = vld [vmem:[#allocation44_spill] sm:$0xff] }
 0x34f   : > { %v1848_v33 = vpop.f32.mrf.mxu3 }
 0x350   : > { %v5951_v26 = vadd.f32 %v1848_v33, %v1614_v17  ;;  %v2747_v33 = vld [vmem:[#allocation2 + $0xd9] sm:$0xff] }
 0x352   : > { %4100 = vmatmul.msk.f32.gmra.mxu1 %vm812_vm1, %v5701_v38  ;;  %v1331_v38 = vadd.f32 %v5341_v43, %v5507_v0  ;;  %v5982_v27 = vpop.f32.mrf.mxu1  ;;  %v5985_v0 = vpop.f32.mrf.mxu0 }
 0x354   : > { %4122 = vmatmul.msk.f32.gmra.mxu3 %vm812_vm1, %v2744_v59  ;;  %v1616_v40 = vadd.f32 %v5868_v12, %v1331_v38  ;;  %v6554_v59 = vld [vmem:[#allocation46_spill] sm:$0xff] }
 0x357   : > { %v1851_v44 = vpop.f32.mrf.mxu3 }
 0x358   : > { %v5963_v16 = vadd.f32 %v1851_v44, %v1615_v11 }
 0x35a   : > { %4101 = vmatmul.msk.f32.gmra.mxu1 %vm812_vm1, %v5716_v36  ;;  %v1334_v36 = vadd.f32 %v6551_v6, %v5525_v9  ;;  %v5995_v11 = vpop.f32.mrf.mxu1  ;;  %v2748_v6 = vld [vmem:[#allocation2 + $0xe1] sm:$0xff] }
 0x35c   : > { %4123 = vmatmul.msk.f32.gmra.mxu3 %vm812_vm1, %v2745_v60  ;;  %v1617_v43 = vadd.f32 %v5883_v21, %v1334_v36  ;;  %v6555_v21 = vld [vmem:[#allocation30_spill] sm:$0xff]  ;;  %v6556_v60 = vld [vmem:[#allocation24_spill] sm:$0xff] }
 0x35d   : > { %v1247_v38 = vadd.f32 %v6556_v60, %v6555_v21  ;;  %v6559_v36 = vld [vmem:[#allocation64_spill] sm:$0xff] }
 0x35e   : > { %v6564_v21 = vld [vmem:[#allocation28_spill] sm:$0xff] }
 0x35f   : > { %v1854_v49 = vpop.f32.mrf.mxu3 }
 0x360   : > { %v5975_v15 = vadd.f32 %v1854_v49, %v1616_v40  ;;  %v6001_v49 = vpop.f32.mrf.mxu0 }
 0x362   : > { %4102 = vmatmul.msk.f32.gmra.mxu1 %vm812_vm1, %v5731_v13  ;;  %v6553_v13 = vld [vmem:[#allocation62_spill] sm:$0xff] }
 0x363   : > { %v1337_v52 = vadd.f32 %v6554_v59, %v6553_v13 }
 0x364   : > { %4124 = vmatmul.msk.f32.gmra.mxu3 %vm812_vm1, %v2746_v25  ;;  %v6558_v25 = vld [vmem:[#allocation49_spill] sm:$0xff] }
 0x365   : > { %v1618_v9 = vadd.f32 %v5898_v20, %v1337_v52  ;;  %v6561_v20 = vld [vmem:[#allocation67_spill] sm:$0xff]  ;;  %v6562_v52 = vld [vmem:[#allocation32_spill] sm:$0xff] }
 0x367   : > { %v1857_v17 = vpop.f32.mrf.mxu3 }
 0x368   : > { %v5987_v12 = vadd.f32 %v1857_v17, %v1617_v43  ;;  %v6560_v43 = vld [vmem:[#allocation48_spill] sm:$0xff] }
 0x369   : > { %v1340_v17 = vadd.f32 %v6560_v43, %v6559_v36  ;;  %v6567_v36 = vld [vmem:[#allocation60_spill] sm:$0xff] }
 0x36a   : > { %6552 = vst [vmem:[#allocation44_spill] sm:$0xff] %v5987_v12  ;;  %4103 = vmatmul.msk.f32.gmra.mxu1 %vm812_vm1, %v5746_v58  ;;  %v1588_v58 = vadd.f32 %v6558_v25, %v1247_v38  ;;  %v6016_v25 = vpop.f32.mrf.mxu1  ;;  %v6019_v12 = vpop.f32.mrf.mxu0 }
 0x36b   : > { %v1619_v13 = vadd.f32 %v5911_v61, %v1340_v17 }
 0x36c   : > { %4125 = vmatmul.msk.f32.gmra.mxu3 %vm812_vm1, %v2747_v33  ;;  %v1866_v33 = vadd.f32 %v6561_v20, %v1588_v58  ;;  %v2749_v58 = vld [vmem:[#allocation2 + $0xf1] sm:$0xff] }
 0x36e   : > { %v2144_v60 = vadd.f32 %v6564_v21, %v1866_v33  ;;  %v6568_v33 = vld [vmem:[#allocation34_spill] sm:$0xff]  ;;  %v6571_v21 = vld [vmem:[#allocation53_spill] sm:$0xff] }
 0x36f   : > { %v1860_v44 = vpop.f32.mrf.mxu3 }
 0x370   : > { %v5999_v40 = vadd.f32 %v1860_v44, %v1618_v9  ;;  %v6563_v9 = vld [vmem:[#allocation25_spill] sm:$0xff]  ;;  %v2422_v43 = vadd.f32 %v6567_v36, %v2144_v60  ;;  %v6573_v36 = vld [vmem:[#allocation63_spill] sm:$0xff] }
 0x371   : > { %v1250_v44 = vadd.f32 %v6563_v9, %v6562_v52  ;;  %v6570_v52 = vld [vmem:[#allocation29_spill] sm:$0xff] }
 0x372   : > { %6557 = vst [vmem:[#allocation62_spill] sm:$0xff] %v5999_v40  ;;  %4104 = vmatmul.msk.f32.gmra.mxu1 %vm812_vm1, %v5761_v5  ;;  %v6565_v5 = vld [vmem:[#allocation51_spill] sm:$0xff]  ;;  %v2701_v17 = vadd.f32 %v5926_v45, %v2422_v43  ;;  %v2750_v45 = vld [vmem:[#allocation2 + $0xf9] sm:$0xff] }
 0x373   : > { %v1589_v40 = vadd.f32 %v6565_v5, %v1250_v44  ;;  %v6037_v5 = vpop.f32.mrf.mxu1 }
 0x374   : > { %4126 = vmatmul.msk.f32.gmra.mxu3 %vm812_vm1, %v2748_v6  ;;  %v6566_v6 = vld [vmem:[#allocation70_spill] sm:$0xff] }
 0x375   : > { %v1867_v61 = vadd.f32 %v6566_v6, %v1589_v40 }
 0x377   : > { %v1863_v59 = vpop.f32.mrf.mxu3  ;;  %v2145_v9 = vadd.f32 %v6570_v52, %v1867_v61 }
 0x378   : > { %v6014_v38 = vadd.f32 %v1863_v59, %v1619_v13  ;;  %v6569_v13 = vld [vmem:[#allocation26_spill] sm:$0xff] }
 0x379   : > { %v1253_v59 = vadd.f32 %v6569_v13, %v6568_v33  ;;  %v2423_v61 = vadd.f32 %v6573_v36, %v2145_v9  ;;  %v6574_v13 = vld [vmem:[#allocation37_spill] sm:$0xff]  ;;  %v6579_v36 = vld [vmem:[#allocation66_spill] sm:$0xff] }
 0x37a   : > { %4105 = vmatmul.msk.f32.gmra.mxu1 %vm812_vm1, %v5774_v8  ;;  %v6033_v8 = vld [vmem:[%s6443_s6] ss:$0 sm:$0xff] }
 0x37b   : > { %v1590_v40 = vadd.f32 %v6571_v21, %v1253_v59  ;;  %v6575_v59 = vld [vmem:[#allocation27_spill] sm:$0xff] }
 0x37c   : > { %4127 = vmatmul.msk.f32.gmra.mxu3 %vm812_vm1, %v2749_v58  ;;  %v6572_v58 = vld [vmem:[#allocation73_spill] sm:$0xff]  ;;  %v1256_v52 = vadd.f32 %v6575_v59, %v6574_v13 }
 0x37d   : > { %v1868_v6 = vadd.f32 %v6572_v58, %v1590_v40  ;;  %v6577_v40 = vld [vmem:[#allocation55_spill] sm:$0xff]  ;;  %v6580_v13 = vld [vmem:[#allocation33_spill] sm:$0xff] }
 0x37e   : > { %v1591_v9 = vadd.f32 %v6577_v40, %v1256_v52  ;;  %v6578_v58 = vld [vmem:[#allocation75_spill] sm:$0xff] }
 0x37f   : > { %v2883_v20 = vpop.f32.mrf.mxu3 }
 0x380   : > { %v2979_v44 = vadd.f32 %v2883_v20, %v2701_v17  ;;  %v6045_v17 = vpop.f32.mrf.mxu0  ;;  %v2702_v20 = vadd.f32 %v5939_v7, %v2423_v61  ;;  %v1869_v7 = vadd.f32 %v6578_v58, %v1591_v9 }
 0x382   : > { %v3257_v60 = vadd.f32 %v5778_v55, %v2979_v44  ;;  %4106 = vmatmul.msk.f32.gmra.mxu1 %vm812_vm1, %v5789_v37  ;;  %v6576_v44 = vld [vmem:[#allocation31_spill] sm:$0xff]  ;;  %v2147_v59 = vadd.f32 %v6580_v13, %v1869_v7  ;;  %v6582_v7 = vld [vmem:[#allocation77_spill] sm:$0xff] }
 0x383   : > { %v2146_v37 = vadd.f32 %v6576_v44, %v1868_v6  ;;  %v6060_v6 = vpop.f32.mrf.mxu1  ;;  %v6068_v44 = vpop.f32.mrf.mxu2 }
 0x384   : > { %v3293_v43 = vadd.f32 %v6033_v8, %v3257_v60  ;;  %4128 = vmatmul.msk.f32.gmra.mxu3 %vm812_vm1, %v2750_v45  ;;  %v2751_v45 = vld [vmem:[#allocation2 + $0x109] sm:$0xff] }
 0x385   : > { %v2424_v61 = vadd.f32 %v6579_v36, %v2146_v37  ;;  %v2752_v37 = vld [vmem:[#allocation2 + $0x111] sm:$0xff] }
 0x386   : > { %v3325_v33 = vmax.f32 %v3293_v43, 0.0 }
 0x387   : > { %v2886_v55 = vpop.f32.mrf.mxu3 }
 0x388   : > { %v2980_v21 = vadd.f32 %v2886_v55, %v2702_v20  ;;  %4175 = vmatmul.msk.f32.vlgmr.msrb.gmra.mxu0 %vm812_vm1, %v3325_v33  ;;  %v2703_v20 = vadd.f32 %v5953_v46, %v2424_v61  ;;  %v6063_v55 = vpop.f32.mrf.mxu0 }
 0x38a   : > { %v3258_v60 = vadd.f32 %v5795_v53, %v2980_v21  ;;  %4107 = vmatmul.msk.f32.gmra.mxu1 %vm812_vm1, %v5805_v51  ;;  %v6581_v21 = vld [vmem:[#allocation69_spill] sm:$0xff] }
 0x38b   : > { %v2425_v40 = vadd.f32 %v6581_v21, %v2147_v59  ;;  %v6088_v59 = vpop.f32.mrf.mxu2  ;;  %v6585_v21 = vld [vmem:[#allocation36_spill] sm:$0xff] }
 0x38c   : > { %v3294_v43 = vadd.f32 %v6033_v8, %v3258_v60  ;;  %4129 = vmatmul.msk.f32.gmra.mxu3 %vm812_vm1, %v2751_v45  ;;  %v6076_v45 = vpop.f32.mrf.mxu1 }
 0x38d   : > { %v2704_v9 = vadd.f32 %v5965_v1, %v2425_v40  ;;  %v2149_v40 = vadd.f32 %v6585_v21, %v5670_v54 }
 0x38e   : > { %v3326_v33 = vmax.f32 %v3294_v43, 0.0 }
 0x38f   : > { %v2889_v53 = vpop.f32.mrf.mxu3 }
 0x390   : > { %v2981_v51 = vadd.f32 %v2889_v53, %v2703_v20  ;;  %4176 = vmatmul.msk.f32.gmra.mxu0 %vm812_vm1, %v3326_v33  ;;  %v2485_v20 = vld [vmem:[#allocation2 + $0x198] sm:$0xff]  ;;  %v2753_v33 = vld [vmem:[#allocation2 + $0x121] sm:$0xff]  ;;  %v6584_v53 = vld [vmem:[#allocation72_spill] sm:$0xff] }
 0x392   : > { %v3259_v52 = vadd.f32 %v5815_v29, %v2981_v51  ;;  %4108 = vmatmul.msk.f32.gmra.mxu1 %vm812_vm1, %v5820_v50  ;;  %v6583_v29 = vld [vmem:[#allocation35_spill] sm:$0xff]  ;;  %v6081_v50 = vpop.f32.mrf.mxu0 }
 0x393   : > { %v2148_v36 = vadd.f32 %v6583_v29, %v6582_v7  ;;  %v2754_v7 = vld [vmem:[#allocation2 + $0x129] sm:$0xff] }
 0x394   : > { %v3295_v46 = vadd.f32 %v6033_v8, %v3259_v52  ;;  %4130 = vmatmul.msk.f32.gmra.mxu3 %vm812_vm1, %v2752_v37  ;;  %v6586_v29 = vld [vmem:[#allocation76_spill] sm:$0xff] }
 0x395   : > { %v2426_v1 = vadd.f32 %v6584_v53, %v2148_v36 }
 0x396   : > { %v3327_v60 = vmax.f32 %v3295_v46, 0.0  ;;  %v6094_v46 = vpop.f32.mrf.mxu1 }
 0x397   : > { %v2892_v58 = vpop.f32.mrf.mxu3  ;;  %v2705_v51 = vadd.f32 %v5982_v27, %v2426_v1  ;;  %v2427_v27 = vadd.f32 %v6586_v29, %v2149_v40 }
 0x398   : > { %v2982_v61 = vadd.f32 %v2892_v58, %v2704_v9  ;;  %4177 = vmatmul.msk.f32.gmra.mxu0 %vm812_vm1, %v3327_v60  ;;  %v2486_v60 = vld [vmem:[#allocation2 + $0x1a0] sm:$0xff] }
 0x399   : > { %v2706_v54 = vadd.f32 %v5995_v11, %v2427_v27 }
 0x39a   : > { %v3260_v43 = vadd.f32 %v5830_v24, %v2982_v61  ;;  %4109 = vmatmul.msk.f32.gmra.mxu1 %vm812_vm1, %v2485_v20  ;;  %v6097_v58 = vpop.f32.mrf.mxu0 }
 0x39c   : > { %v3296_v13 = vadd.f32 %v6033_v8, %v3260_v43  ;;  %4131 = vmatmul.msk.f32.gmra.mxu3 %vm812_vm1, %v2753_v33  ;;  %v6104_v43 = vpop.f32.mrf.mxu2  ;;  %v6587_v33 = vld [vmem:[#allocation82_spill] sm:$0xff] }
 0x39e   : > { %v3328_v52 = vmax.f32 %v3296_v13, 0.0 }
 0x39f   : > { %v2895_v37 = vpop.f32.mrf.mxu3 }
 0x3a0   : > { %v2983_v24 = vadd.f32 %v2895_v37, %v2705_v51  ;;  %4178 = vmatmul.msk.f32.gmra.mxu0 %vm812_vm1, %v3328_v52  ;;  %v6110_v51 = vpop.f32.mrf.mxu1  ;;  %v2755_v52 = vld [vmem:[#allocation2 + $0x139] sm:$0xff]  ;;  %v6589_v37 = vld [vmem:[#allocation79_spill] sm:$0xff] }
 0x3a2   : > { %v3261_v9 = vadd.f32 %v5846_v14, %v2983_v24  ;;  %4110 = vmatmul.msk.f32.gmra.mxu1 %vm812_vm1, %v2486_v60  ;;  %v6588_v14 = vld [vmem:[#allocation38_spill] sm:$0xff]  ;;  %v6115_v11 = vpop.f32.mrf.mxu0 }
 0x3a3   : > { %v2150_v53 = vadd.f32 %v6588_v14, %v6587_v33 }
 0x3a4   : > { %v3297_v36 = vadd.f32 %v6033_v8, %v3261_v9  ;;  %4132 = vmatmul.msk.f32.gmra.mxu3 %vm812_vm1, %v2754_v7  ;;  %v6590_v7 = vld [vmem:[#allocation39_spill] sm:$0xff] }
 0x3a5   : > { %v2428_v21 = vadd.f32 %v6589_v37, %v2150_v53  ;;  %v2151_v29 = vadd.f32 %v6590_v7, %v5709_v4 }
 0x3a6   : > { %v3329_v61 = vmax.f32 %v3297_v36, 0.0 }
 0x3a7   : > { %v2898_v20 = vpop.f32.mrf.mxu3  ;;  %v2707_v24 = vadd.f32 %v6016_v25, %v2428_v21 }
 0x3a8   : > { %v2984_v1 = vadd.f32 %v2898_v20, %v2706_v54  ;;  %4179 = vmatmul.msk.f32.gmra.mxu0 %vm812_vm1, %v3329_v61  ;;  %v2756_v54 = vld [vmem:[#allocation2 + $0x141] sm:$0xff]  ;;  %v6591_v61 = vld [vmem:[#allocation81_spill] sm:$0xff]  ;;  %v6127_v25 = vpop.f32.mrf.mxu1 }
 0x3a9   : > { %v2429_v20 = vadd.f32 %v6591_v61, %v2151_v29  ;;  %v6593_v29 = vld [vmem:[#allocation41_spill] sm:$0xff] }
 0x3aa   : > { %v3262_v13 = vadd.f32 %v5860_v18, %v2984_v1  ;;  %v6121_v18 = vpop.f32.mrf.mxu2  ;;  %v6130_v4 = vpop.f32.mrf.mxu0 }
 0x3ab   : > { %v2708_v14 = vadd.f32 %v6037_v5, %v2429_v20 }
 0x3ac   : > { %v3298_v40 = vadd.f32 %v6033_v8, %v3262_v13  ;;  %4133 = vmatmul.msk.f32.gmra.mxu3 %vm812_vm1, %v2755_v52  ;;  %v6592_v13 = vld [vmem:[#allocation40_spill] sm:$0xff] }
 0x3ad   : > { %v2152_v52 = vadd.f32 %v6592_v13, %v5724_v30 }
 0x3ae   : > { %v3330_v9 = vmax.f32 %v3298_v40, 0.0  ;;  %v2757_v40 = vld [vmem:[#allocation2 + $0x151] sm:$0xff] }
 0x3af   : > { %v2901_v60 = vpop.f32.mrf.mxu3 }
 0x3b0   : > { %v2985_v27 = vadd.f32 %v2901_v60, %v2707_v24  ;;  %4180 = vmatmul.msk.f32.gmra.mxu0 %vm812_vm1, %v3330_v9  ;;  %v2430_v24 = vadd.f32 %v5872_v42, %v2152_v52  ;;  %v6142_v7 = vpop.f32.mrf.mxu1 }
 0x3b2   : > { %v3263_v36 = vadd.f32 %v5876_v19, %v2985_v27  ;;  %v6136_v21 = vpop.f32.mrf.mxu2  ;;  %v2709_v5 = vadd.f32 %v6060_v6, %v2430_v24  ;;  %v2153_v27 = vadd.f32 %v6593_v29, %v5737_v22  ;;  %v6594_v22 = vld [vmem:[#allocation42_spill] sm:$0xff] }
 0x3b4   : > { %v3299_v33 = vadd.f32 %v6033_v8, %v3263_v36  ;;  %4134 = vmatmul.msk.f32.gmra.mxu3 %vm812_vm1, %v2756_v54  ;;  %v2758_v54 = vld [vmem:[#allocation2 + $0x159] sm:$0xff]  ;;  %v2431_v61 = vadd.f32 %v5887_v48, %v2153_v27  ;;  %v2759_v48 = vld [vmem:[#allocation2 + $0x169] sm:$0xff]  ;;  %v2760_v27 = vld [vmem:[#allocation2 + $0x171] sm:$0xff] }
 0x3b6   : > { %v3331_v53 = vmax.f32 %v3299_v33, 0.0  ;;  %v2710_v33 = vadd.f32 %v6076_v45, %v2431_v61 }
 0x3b7   : > { %v2904_v1 = vpop.f32.mrf.mxu3 }
 0x3b8   : > { %v2986_v37 = vadd.f32 %v2904_v1, %v2708_v14  ;;  %4181 = vmatmul.msk.f32.gmra.mxu0 %vm812_vm1, %v3331_v53  ;;  %v2154_v1 = vadd.f32 %v6594_v22, %v5752_v10  ;;  %v2647_v52 = vpop.f32.mrf.mxu1 }
 0x3ba   : > { %v3264_v19 = vadd.f32 %v5889_v23, %v2986_v37  ;;  %v6147_v23 = vpop.f32.mrf.mxu0  ;;  %v3200_v6 = vpop.f32.mrf.mxu2 }
 0x3bc   : > { %v3300_v9 = vadd.f32 %v6033_v8, %v3264_v19  ;;  %4135 = vmatmul.msk.f32.gmra.mxu3 %vm812_vm1, %v2757_v40  ;;  %v2432_v19 = vadd.f32 %v5903_v47, %v2154_v1 }
 0x3be   : > { %v3332_v60 = vmax.f32 %v3300_v9, 0.0  ;;  %v2711_v45 = vadd.f32 %v6094_v46, %v2432_v19 }
 0x3bf   : > { %v2907_v30 = vpop.f32.mrf.mxu3 }
 0x3c0   : > { %v2987_v36 = vadd.f32 %v2907_v30, %v2709_v5  ;;  %4182 = vmatmul.msk.f32.gmra.mxu0 %vm812_vm1, %v3332_v60  ;;  %v6595_v5 = vld [vmem:[#allocation43_spill] sm:$0xff]  ;;  %v2650_v29 = vpop.f32.mrf.mxu1 }
 0x3c1   : > { %v2155_v60 = vadd.f32 %v6595_v5, %v5767_v41  ;;  %v6596_v41 = vld [vmem:[#allocation87_spill] sm:$0xff] }
 0x3c2   : > { %v3265_v42 = vadd.f32 %v6068_v44, %v2987_v36  ;;  %v6158_v37 = vpop.f32.mrf.mxu0  ;;  %v3203_v9 = vpop.f32.mrf.mxu2  ;;  %v2762_v5 = vld [vmem:[#allocation2 + $0x189] sm:$0xff] }
 0x3c3   : > { %v2433_v47 = vadd.f32 %v5917_v57, %v2155_v60  ;;  %v2761_v57 = vld [vmem:[#allocation2 + $0x181] sm:$0xff] }
 0x3c4   : > { %v3301_v20 = vadd.f32 %v6033_v8, %v3265_v42  ;;  %4136 = vmatmul.msk.f32.gmra.mxu3 %vm812_vm1, %v2758_v54 }
 0x3c5   : > { %v2712_v42 = vadd.f32 %v6110_v51, %v2433_v47 }
 0x3c6   : > { %v3333_v14 = vmax.f32 %v3301_v20, 0.0  ;;  %v6597_v20 = vld [vmem:[#allocation45_spill] sm:$0xff] }
 0x3c7   : > { %v2910_v53 = vpop.f32.mrf.mxu3 }
 0x3c8   : > { %v2988_v13 = vadd.f32 %v2910_v53, %v2710_v33  ;;  %4183 = vmatmul.msk.f32.gmra.mxu0 %vm812_vm1, %v3333_v14  ;;  %v2156_v33 = vadd.f32 %v6597_v20, %v6596_v41  ;;  %v2763_v20 = vld [vmem:[#allocation2 + $0x199] sm:$0xff] }
 0x3ca   : > { %v3266_v44 = vadd.f32 %v6088_v59, %v2988_v13  ;;  %v6171_v46 = vpop.f32.mrf.mxu0  ;;  %v2434_v22 = vadd.f32 %v5929_v28, %v2156_v33  ;;  %v2653_v13 = vpop.f32.mrf.mxu1 }
 0x3cc   : > { %v3302_v40 = vadd.f32 %v6033_v8, %v3266_v44  ;;  %4137 = vmatmul.msk.f32.gmra.mxu3 %vm812_vm1, %v2759_v48  ;;  %v2713_v51 = vadd.f32 %v6127_v25, %v2434_v22  ;;  %v6602_v22 = vld [vmem:[#allocation52_spill] sm:$0xff] }
 0x3ce   : > { %v3334_v24 = vmax.f32 %v3302_v40, 0.0  ;;  %v6598_v40 = vld [vmem:[#allocation88_spill] sm:$0xff] }
 0x3cf   : > { %v2913_v10 = vpop.f32.mrf.mxu3 }
 0x3d0   : > { %v2989_v30 = vadd.f32 %v2913_v10, %v2711_v45  ;;  %4184 = vmatmul.msk.f32.gmra.mxu0 %vm812_vm1, %v3334_v24  ;;  %v6599_v45 = vld [vmem:[#allocation47_spill] sm:$0xff] }
 0x3d1   : > { %v2157_v24 = vadd.f32 %v6599_v45, %v6598_v40  ;;  %v2764_v40 = vld [vmem:[#allocation2 + $0x1a1] sm:$0xff] }
 0x3d2   : > { %v3267_v59 = vadd.f32 %v6104_v43, %v2989_v30  ;;  %v3206_v43 = vpop.f32.mrf.mxu2  ;;  %v6182_v48 = vpop.f32.mrf.mxu0 }
 0x3d3   : > { %v2435_v60 = vadd.f32 %v5943_v2, %v2157_v24 }
 0x3d4   : > { %v3303_v36 = vadd.f32 %v6033_v8, %v3267_v59  ;;  %4138 = vmatmul.msk.f32.gmra.mxu3 %vm812_vm1, %v2760_v27  ;;  %v2656_v27 = vpop.f32.mrf.mxu1 }
 0x3d5   : > { %v2714_v25 = vadd.f32 %v6142_v7, %v2435_v60 }
 0x3d6   : > { %v3335_v54 = vmax.f32 %v3303_v36, 0.0  ;;  %v6600_v36 = vld [vmem:[#allocation89_spill] sm:$0xff] }
 0x3d7   : > { %v2916_v61 = vpop.f32.mrf.mxu3 }
 0x3d8   : > { %v2990_v14 = vadd.f32 %v2916_v61, %v2712_v42  ;;  %4185 = vmatmul.msk.f32.gmra.mxu0 %vm812_vm1, %v3335_v54  ;;  %v6601_v42 = vld [vmem:[#allocation50_spill] sm:$0xff] }
 0x3d9   : > { %v2158_v54 = vadd.f32 %v6601_v42, %v6600_v36  ;;  %v6604_v42 = vld [vmem:[#allocation56_spill] sm:$0xff] }
 0x3da   : > { %v3268_v53 = vadd.f32 %v6121_v18, %v2990_v14  ;;  %v3209_v28 = vpop.f32.mrf.mxu2 }
 0x3db   : > { %v2436_v2 = vadd.f32 %v5955_v56, %v2158_v54  ;;  %v2161_v54 = vadd.f32 %v6604_v42, %v5850_v62 }
 0x3dc   : > { %v3304_v1 = vadd.f32 %v6033_v8, %v3268_v53  ;;  %4139 = vmatmul.msk.f32.gmra.mxu3 %vm812_vm1, %v2761_v57 }
 0x3dd   : > { %v2715_v14 = vadd.f32 %v2647_v52, %v2436_v2  ;;  %v3357_v2 = vld [vmem:[%s4751_s19] sm:$0xff] }
 0x3de   : > { %v3336_v44 = vmax.f32 %v3304_v1, 0.0  ;;  %v2159_v1 = vadd.f32 %v6602_v22, %v5828_v63  ;;  %v6603_v63 = vld [vmem:[#allocation54_spill] sm:$0xff]  ;;  %v6606_v22 = vld [vmem:[#allocation57_spill] sm:$0xff] }
 0x3df   : > { %v2919_v19 = vpop.f32.mrf.mxu3 }
 0x3e0   : > { %v2991_v10 = vadd.f32 %v2919_v19, %v2713_v51  ;;  %4186 = vmatmul.msk.f32.gmra.mxu0 %vm812_vm1, %v3336_v44  ;;  %v2659_v44 = vpop.f32.mrf.mxu1  ;;  %v2437_v56 = vadd.f32 %v5972_v39, %v2159_v1 }
 0x3e2   : > { %v3269_v18 = vadd.f32 %v6136_v21, %v2991_v10  ;;  %v6195_v21 = vpop.f32.mrf.mxu0  ;;  %v3212_v7 = vpop.f32.mrf.mxu2  ;;  %v2716_v52 = vadd.f32 %v2650_v29, %v2437_v56 }
 0x3e4   : > { %v3305_v30 = vadd.f32 %v6033_v8, %v3269_v18  ;;  %4140 = vmatmul.msk.f32.gmra.mxu3 %vm812_vm1, %v2762_v5  ;;  %v2160_v5 = vadd.f32 %v6603_v63, %v5838_v35 }
 0x3e6   : > { %v3337_v59 = vmax.f32 %v3305_v30, 0.0 }
 0x3e7   : > { %v2922_v47 = vpop.f32.mrf.mxu3 }
 0x3e8   : > { %v2992_v61 = vadd.f32 %v2922_v47, %v2714_v25  ;;  %4187 = vmatmul.msk.f32.gmra.mxu0 %vm812_vm1, %v3337_v59  ;;  %v2662_v30 = vpop.f32.mrf.mxu1  ;;  %v2438_v25 = vadd.f32 %v5985_v0, %v2160_v5  ;;  %v2439_v0 = vadd.f32 %v6001_v49, %v2161_v54 }
 0x3ea   : > { %v3270_v41 = vadd.f32 %v3200_v6, %v2992_v61  ;;  %v6203_v6 = vpop.f32.mrf.mxu0  ;;  %v3215_v10 = vpop.f32.mrf.mxu2  ;;  %v2717_v47 = vadd.f32 %v2653_v13, %v2438_v25  ;;  %v2718_v62 = vadd.f32 %v2656_v27, %v2439_v0  ;;  %v6608_v25 = vld [vmem:[#allocation58_spill] sm:$0xff] }
 0x3ec   : > { %v3306_v33 = vadd.f32 %v6033_v8, %v3270_v41  ;;  %4141 = vmatmul.msk.f32.gmra.mxu3 %vm812_vm1, %v2763_v20 }
 0x3ee   : > { %v3338_v53 = vmax.f32 %v3306_v33, 0.0 }
 0x3ef   : > { %v2925_v57 = vpop.f32.mrf.mxu3 }
 0x3f0   : > { %v2993_v51 = vadd.f32 %v2925_v57, %v2715_v14  ;;  %4188 = vmatmul.msk.f32.gmra.mxu0 %vm812_vm1, %v3338_v53  ;;  %v2665_v13 = vpop.f32.mrf.mxu1 }
 0x3f2   : > { %v3271_v19 = vadd.f32 %v3203_v9, %v2993_v51  ;;  %v6213_v59 = vpop.f32.mrf.mxu0  ;;  %v3218_v35 = vpop.f32.mrf.mxu2 }
 0x3f4   : > { %v3307_v45 = vadd.f32 %v6033_v8, %v3271_v19  ;;  %4142 = vmatmul.msk.f32.gmra.mxu3 %vm812_vm1, %v2764_v40 }
 0x3f6   : > { %v3339_v24 = vmax.f32 %v3307_v45, 0.0 }
 0x3f7   : > { %v2928_v18 = vpop.f32.mrf.mxu3 }
 0x3f8   : > { %v2994_v60 = vadd.f32 %v2928_v18, %v2716_v52  ;;  %4189 = vmatmul.msk.f32.gmra.mxu0 %vm812_vm1, %v3339_v24  ;;  %v3358_v52 = vld [vmem:[%s4751_s19 + $0x8] sm:$0xff] }
 0x3fa   : > { %v3272_v9 = vadd.f32 %v3206_v43, %v2994_v60  ;;  %v6221_v43 = vld [vmem:[%s6445_s8] ss:$0 sm:$0xff]  ;;  %v3221_v56 = vpop.f32.mrf.mxu2  ;;  %v2668_v60 = vpop.f32.mrf.mxu1 }
 0x3fc   : > { %v3308_v39 = vadd.f32 %v6033_v8, %v3272_v9  ;;  %v6607_v9 = vld [vmem:[#allocation91_spill] sm:$0xff] }
 0x3fe   : > { %v3340_v29 = vmax.f32 %v3308_v39, 0.0 }
 0x3ff   : > { %v2931_v36 = vpop.f32.mrf.mxu3 }
 0x400   : > { %v2995_v61 = vadd.f32 %v2931_v36, %v2717_v47  ;;  %4190 = vmatmul.msk.f32.gmra.mxu0 %vm812_vm1, %v3340_v29 }
 0x402   : > { %v3273_v41 = vadd.f32 %v3209_v28, %v2995_v61  ;;  %v6605_v28 = vld [vmem:[#allocation90_spill] sm:$0xff] }
 0x403   : > { %v2162_v1 = vadd.f32 %v6606_v22, %v6605_v28  ;;  %v3359_v61 = vld [vmem:[%s4751_s19 + $0x10] sm:$0xff] }
 0x404   : > { %v3309_v20 = vadd.f32 %v6033_v8, %v3273_v41 }
 0x405   : > { %v3510_v33 = vpop.f32.mrf.mxu0  ;;  %v2440_v45 = vadd.f32 %v6019_v12, %v2162_v1  ;;  %v2163_v12 = vadd.f32 %v6608_v25, %v6607_v9 }
 0x406   : > { %v3341_v14 = vmax.f32 %v3309_v20, 0.0  ;;  %v3511_v53 = vadd.f32 %v6221_v43, %v3510_v33 }
 0x407   : > { %v2934_v57 = vpop.f32.mrf.mxu3  ;;  %v2719_v18 = vadd.f32 %v2659_v44, %v2440_v45  ;;  %v2441_v42 = vadd.f32 %v6045_v17, %v2163_v12  ;;  %v3224_v44 = vpop.f32.mrf.mxu2  ;;  %v3361_v12 = vld [vmem:[%s4751_s19 + $0x20] sm:$0xff] }
 0x408   : > { %v3606_v51 = vadd.f32 %v3511_v53, %v3357_v2  ;;  %v2996_v19 = vadd.f32 %v2934_v57, %v2718_v62  ;;  %4191 = vmatmul.msk.f32.gmra.mxu0 %vm812_vm1, %v3341_v14  ;;  %v6609_v62 = vld [vmem:[#allocation92_spill] sm:$0xff]  ;;  %v6610_v14 = vld [vmem:[#allocation59_spill] sm:$0xff]  ;;  %v2671_v17 = vpop.f32.mrf.mxu1 }
 0x409   : > { %v2720_v0 = vadd.f32 %v2662_v30, %v2441_v42  ;;  %v2164_v53 = vadd.f32 %v6610_v14, %v6609_v62  ;;  %v3360_v30 = vld [vmem:[%s4751_s19 + $0x18] sm:$0xff]  ;;  %v3362_v62 = vld [vmem:[%s4751_s19 + $0x28] sm:$0xff] }
 0x40a   : > { %v3638_v49 = vmax.f32 %v3606_v51, 0.0  ;;  %v3274_v40 = vadd.f32 %v3212_v7, %v2996_v19 }
 0x40b   : > { %v2442_v1 = vadd.f32 %v6063_v55, %v2164_v53 }
 0x40c   : > { %3670 = vst [vmem:[%s6233_s27] sm:$0xff] %v3638_v49  ;;  %v3310_v27 = vadd.f32 %v6033_v8, %v3274_v40 }
 0x40d   : > { %v3513_v24 = vpop.f32.mrf.mxu0  ;;  %v2721_v49 = vadd.f32 %v2665_v13, %v2442_v1 }
 0x40e   : > { %v3342_v63 = vmax.f32 %v3310_v27, 0.0  ;;  %v3514_v5 = vadd.f32 %v6221_v43, %v3513_v24  ;;  %v6611_v24 = vld [vmem:[#allocation93_spill] sm:$0xff] }
 0x40f   : > { %v2937_v7 = vpop.f32.mrf.mxu3  ;;  %v3227_v27 = vpop.f32.mrf.mxu2 }
 0x410   : > { %v3607_v39 = vadd.f32 %v3514_v5, %v3358_v52  ;;  %v2997_v47 = vadd.f32 %v2937_v7, %v2719_v18  ;;  %4192 = vmatmul.msk.f32.gmra.mxu0 %vm812_vm1, %v3342_v63  ;;  %v6612_v18 = vld [vmem:[#allocation61_spill] sm:$0xff]  ;;  %v2674_v9 = vpop.f32.mrf.mxu1 }
 0x411   : > { %v2165_v63 = vadd.f32 %v6612_v18, %v6611_v24 }
 0x412   : > { %v3639_v29 = vmax.f32 %v3607_v39, 0.0  ;;  %v3275_v36 = vadd.f32 %v3215_v10, %v2997_v47 }
 0x413   : > { %v2443_v25 = vadd.f32 %v6081_v50, %v2165_v63  ;;  %v6615_v63 = vld [vmem:[#allocation71_spill] sm:$0xff] }
 0x414   : > { %3671 = vst [vmem:[%s6233_s27 + $0x8] sm:$0xff] %v3639_v29  ;;  %v3311_v54 = vadd.f32 %v6033_v8, %v3275_v36 }
 0x415   : > { %v3516_v41 = vpop.f32.mrf.mxu0  ;;  %v2722_v47 = vadd.f32 %v2668_v60, %v2443_v25 }
 0x416   : > { %v3343_v20 = vmax.f32 %v3311_v54, 0.0  ;;  %v3517_v2 = vadd.f32 %v6221_v43, %v3516_v41  ;;  %v6613_v54 = vld [vmem:[#allocation65_spill] sm:$0xff] }
 0x417   : > { %v2940_v33 = vpop.f32.mrf.mxu3  ;;  %v3230_v50 = vpop.f32.mrf.mxu2 }
 0x418   : > { %v3608_v57 = vadd.f32 %v3517_v2, %v3359_v61  ;;  %v2998_v10 = vadd.f32 %v2940_v33, %v2720_v0  ;;  %4193 = vmatmul.msk.f32.gmra.mxu0 %vm812_vm1, %v3343_v20  ;;  %v2166_v61 = vadd.f32 %v6613_v54, %v5909_v34  ;;  %v2677_v60 = vpop.f32.mrf.mxu1 }
 0x41a   : > { %v3640_v28 = vmax.f32 %v3608_v57, 0.0  ;;  %v3276_v22 = vadd.f32 %v3218_v35, %v2998_v10  ;;  %v2444_v2 = vadd.f32 %v6097_v58, %v2166_v61 }
 0x41c   : > { %3672 = vst [vmem:[%s6233_s27 + $0x10] sm:$0xff] %v3640_v28  ;;  %v3312_v51 = vadd.f32 %v6033_v8, %v3276_v22  ;;  %v2723_v53 = vadd.f32 %v2671_v17, %v2444_v2  ;;  %v6614_v28 = vld [vmem:[#allocation68_spill] sm:$0xff] }
 0x41d   : > { %v3519_v19 = vpop.f32.mrf.mxu0  ;;  %v2167_v22 = vadd.f32 %v6614_v28, %v5920_v3 }
 0x41e   : > { %v3344_v40 = vmax.f32 %v3312_v51, 0.0  ;;  %v3520_v45 = vadd.f32 %v6221_v43, %v3519_v19 }
 0x41f   : > { %v2943_v52 = vpop.f32.mrf.mxu3  ;;  %v2445_v19 = vadd.f32 %v6115_v11, %v2167_v22 }
 0x420   : > { %v3609_v5 = vadd.f32 %v3520_v45, %v3360_v30  ;;  %v2999_v35 = vadd.f32 %v2943_v52, %v2721_v49  ;;  %4194 = vmatmul.msk.f32.gmra.mxu0 %vm812_vm1, %v3344_v40  ;;  %v3233_v30 = vpop.f32.mrf.mxu2  ;;  %v3363_v49 = vld [vmem:[%s4751_s19 + $0x30] sm:$0xff]  ;;  %v2680_v24 = vpop.f32.mrf.mxu1 }
 0x421   : > { %v2724_v45 = vadd.f32 %v2674_v9, %v2445_v19 }
 0x422   : > { %v3641_v55 = vmax.f32 %v3609_v5, 0.0  ;;  %v3277_v7 = vadd.f32 %v3221_v56, %v2999_v35  ;;  %v2168_v5 = vadd.f32 %v6615_v63, %v5931_v32 }
 0x424   : > { %3673 = vst [vmem:[%s6233_s27 + $0x18] sm:$0xff] %v3641_v55  ;;  %v3313_v13 = vadd.f32 %v6033_v8, %v3277_v7  ;;  %v2446_v7 = vadd.f32 %v6130_v4, %v2168_v5 }
 0x425   : > { %v3522_v39 = vpop.f32.mrf.mxu0 }
 0x426   : > { %v3345_v29 = vmax.f32 %v3313_v13, 0.0  ;;  %v3523_v36 = vadd.f32 %v6221_v43, %v3522_v39  ;;  %v3364_v13 = vld [vmem:[%s4751_s19 + $0x38] sm:$0xff]  ;;  %v2725_v39 = vadd.f32 %v2677_v60, %v2446_v7 }
 0x427   : > { %v2946_v42 = vpop.f32.mrf.mxu3 }
 0x428   : > { %v3610_v41 = vadd.f32 %v3523_v36, %v3361_v12  ;;  %v3000_v56 = vadd.f32 %v2946_v42, %v2722_v47  ;;  %4195 = vmatmul.msk.f32.gmra.mxu0 %vm812_vm1, %v3345_v29  ;;  %v3236_v9 = vpop.f32.mrf.mxu2  ;;  %v6616_v36 = vld [vmem:[#allocation74_spill] sm:$0xff]  ;;  %v2683_v4 = vpop.f32.mrf.mxu1 }
 0x429   : > { %v2169_v42 = vadd.f32 %v6616_v36, %v5941_v31  ;;  %v3368_v36 = vld [vmem:[%s4751_s19 + $0x58] sm:$0xff] }
 0x42a   : > { %v3642_v0 = vmax.f32 %v3610_v41, 0.0  ;;  %v3278_v20 = vadd.f32 %v3224_v44, %v3000_v56 }
 0x42c   : > { %3674 = vst [vmem:[%s6233_s27 + $0x20] sm:$0xff] %v3642_v0  ;;  %v3314_v33 = vadd.f32 %v6033_v8, %v3278_v20  ;;  %v3365_v20 = vld [vmem:[%s4751_s19 + $0x40] sm:$0xff] }
 0x42d   : > { %v3525_v14 = vpop.f32.mrf.mxu0 }
 0x42e   : > { %v3346_v57 = vmax.f32 %v3314_v33, 0.0  ;;  %v3526_v34 = vadd.f32 %v6221_v43, %v3525_v14 }
 0x42f   : > { %v2949_v10 = vpop.f32.mrf.mxu3 }
 0x430   : > { %v3611_v1 = vadd.f32 %v3526_v34, %v3362_v62  ;;  %v3001_v44 = vadd.f32 %v2949_v10, %v2723_v53  ;;  %4196 = vmatmul.msk.f32.gmra.mxu0 %vm812_vm1, %v3346_v57  ;;  %v3239_v62 = vpop.f32.mrf.mxu2  ;;  %v6617_v53 = vld [vmem:[#allocation78_spill] sm:$0xff]  ;;  %v2686_v22 = vpop.f32.mrf.mxu1 }
 0x431   : > { %v2170_v57 = vadd.f32 %v6617_v53, %v5951_v26 }
 0x432   : > { %v3643_v58 = vmax.f32 %v3611_v1, 0.0  ;;  %v3279_v51 = vadd.f32 %v3227_v27, %v3001_v44 }
 0x433   : > { %v2448_v1 = vadd.f32 %v6158_v37, %v2170_v57 }
 0x434   : > { %3675 = vst [vmem:[%s6233_s27 + $0x28] sm:$0xff] %v3643_v58  ;;  %v3315_v17 = vadd.f32 %v6033_v8, %v3279_v51  ;;  %v3366_v58 = vld [vmem:[%s4751_s19 + $0x48] sm:$0xff] }
 0x435   : > { %v3528_v40 = vpop.f32.mrf.mxu0 }
 0x436   : > { %v3347_v52 = vmax.f32 %v3315_v17, 0.0  ;;  %v3529_v3 = vadd.f32 %v6221_v43, %v3528_v40 }
 0x437   : > { %v2952_v18 = vpop.f32.mrf.mxu3 }
 0x438   : > { %v3612_v27 = vadd.f32 %v3529_v3, %v3363_v49  ;;  %v3002_v35 = vadd.f32 %v2952_v18, %v2724_v45  ;;  %4197 = vmatmul.msk.f32.gmra.mxu0 %vm812_vm1, %v3347_v52  ;;  %v6618_v49 = vld [vmem:[#allocation80_spill] sm:$0xff]  ;;  %v3242_v37 = vpop.f32.mrf.mxu2  ;;  %v2689_v5 = vpop.f32.mrf.mxu1 }
 0x439   : > { %v2171_v40 = vadd.f32 %v6618_v49, %v5963_v16 }
 0x43a   : > { %v3644_v11 = vmax.f32 %v3612_v27, 0.0  ;;  %v3280_v55 = vadd.f32 %v3230_v50, %v3002_v35  ;;  %v2447_v50 = vadd.f32 %v6147_v23, %v2169_v42  ;;  %v3367_v27 = vld [vmem:[%s4751_s19 + $0x50] sm:$0xff] }
 0x43b   : > { %v2449_v18 = vadd.f32 %v6171_v46, %v2171_v40 }
 0x43c   : > { %3676 = vst [vmem:[%s6233_s27 + $0x30] sm:$0xff] %v3644_v11  ;;  %v3316_v25 = vadd.f32 %v6033_v8, %v3280_v55  ;;  %v2726_v33 = vadd.f32 %v2680_v24, %v2447_v50  ;;  %v6621_v50 = vld [vmem:[#allocation84_spill] sm:$0xff] }
 0x43d   : > { %v3531_v12 = vpop.f32.mrf.mxu0  ;;  %v2728_v11 = vadd.f32 %v2686_v22, %v2449_v18  ;;  %v6623_v22 = vld [vmem:[#allocation85_spill] sm:$0xff] }
 0x43e   : > { %v3348_v47 = vmax.f32 %v3316_v25, 0.0  ;;  %v3532_v32 = vadd.f32 %v6221_v43, %v3531_v12  ;;  %v6619_v25 = vld [vmem:[#allocation83_spill] sm:$0xff] }
 0x43f   : > { %v2955_v29 = vpop.f32.mrf.mxu3 }
 0x440   : > { %v3613_v54 = vadd.f32 %v3532_v32, %v3364_v13  ;;  %v3003_v61 = vadd.f32 %v2955_v29, %v2725_v39  ;;  %4198 = vmatmul.msk.f32.gmra.mxu0 %vm812_vm1, %v3348_v47  ;;  %v3245_v47 = vpop.f32.mrf.mxu2 }
 0x442   : > { %v3645_v41 = vmax.f32 %v3613_v54, 0.0  ;;  %v3281_v56 = vadd.f32 %v3233_v30, %v3003_v61  ;;  %v2727_v30 = vadd.f32 %v2683_v4, %v2448_v1  ;;  %v2692_v4 = vpop.f32.mrf.mxu1 }
 0x444   : > { %3677 = vst [vmem:[%s6233_s27 + $0x38] sm:$0xff] %v3645_v41  ;;  %v3317_v0 = vadd.f32 %v6033_v8, %v3281_v56  ;;  %v6620_v56 = vld [vmem:[#allocation44_spill] sm:$0xff] }
 0x445   : > { %v3534_v2 = vpop.f32.mrf.mxu0 }
 0x446   : > { %v3349_v60 = vmax.f32 %v3317_v0, 0.0  ;;  %v3535_v31 = vadd.f32 %v6221_v43, %v3534_v2  ;;  %v2173_v0 = vadd.f32 %v6621_v50, %v6620_v56 }
 0x447   : > { %v2958_v14 = vpop.f32.mrf.mxu3 }
 0x448   : > { %v3614_v34 = vadd.f32 %v3535_v31, %v3365_v20  ;;  %v3004_v10 = vadd.f32 %v2958_v14, %v2726_v33  ;;  %4199 = vmatmul.msk.f32.gmra.mxu0 %vm812_vm1, %v3349_v60  ;;  %v2451_v60 = vadd.f32 %v6195_v21, %v2173_v0  ;;  %v3369_v14 = vld [vmem:[%s4751_s19 + $0x60] sm:$0xff]  ;;  %v3374_v0 = vld [vmem:[%s4751_s19 + $0x88] sm:$0xff] }
 0x44a   : > { %v3646_v23 = vmax.f32 %v3614_v34, 0.0  ;;  %v3282_v28 = vadd.f32 %v3236_v9, %v3004_v10  ;;  %v2172_v9 = vadd.f32 %v6619_v25, %v5975_v15  ;;  %v2730_v57 = vadd.f32 %v2692_v4, %v2451_v60  ;;  %v2695_v21 = vpop.f32.mrf.mxu1  ;;  %v3373_v4 = vld [vmem:[%s4751_s19 + $0x80] sm:$0xff]  ;;  %v3375_v60 = vld [vmem:[%s4751_s19 + $0x90] sm:$0xff] }
 0x44c   : > { %3678 = vst [vmem:[%s6233_s27 + $0x40] sm:$0xff] %v3646_v23  ;;  %v3318_v44 = vadd.f32 %v6033_v8, %v3282_v28  ;;  %v2450_v32 = vadd.f32 %v6182_v48, %v2172_v9  ;;  %v6622_v28 = vld [vmem:[#allocation62_spill] sm:$0xff] }
 0x44d   : > { %v3537_v51 = vpop.f32.mrf.mxu0  ;;  %v2174_v1 = vadd.f32 %v6623_v22, %v6622_v28  ;;  %v3377_v22 = vld [vmem:[%s4751_s19 + $0xa0] sm:$0xff] }
 0x44e   : > { %v3350_v19 = vmax.f32 %v3318_v44, 0.0  ;;  %v3538_v26 = vadd.f32 %v6221_v43, %v3537_v51  ;;  %v2729_v54 = vadd.f32 %v2689_v5, %v2450_v32 }
 0x44f   : > { %v2961_v17 = vpop.f32.mrf.mxu3 }
 0x450   : > { %v3615_v45 = vadd.f32 %v3538_v26, %v3366_v58  ;;  %v3005_v52 = vadd.f32 %v2961_v17, %v2727_v30  ;;  %4200 = vmatmul.msk.f32.gmra.mxu0 %vm812_vm1, %v3350_v19  ;;  %v2452_v19 = vadd.f32 %v6203_v6, %v2174_v1  ;;  %v3370_v17 = vld [vmem:[%s4751_s19 + $0x68] sm:$0xff] }
 0x452   : > { %v3647_v3 = vmax.f32 %v3615_v45, 0.0  ;;  %v3283_v24 = vadd.f32 %v3239_v62, %v3005_v52  ;;  %v3248_v62 = vpop.f32.mrf.mxu2  ;;  %v2731_v40 = vadd.f32 %v2695_v21, %v2452_v19 }
 0x454   : > { %3679 = vst [vmem:[%s6233_s27 + $0x48] sm:$0xff] %v3647_v3  ;;  %v3319_v63 = vadd.f32 %v6033_v8, %v3283_v24  ;;  %v6624_v24 = vld [vmem:[#allocation86_spill] sm:$0xff] }
 0x455   : > { %v3540_v35 = vpop.f32.mrf.mxu0  ;;  %v2175_v18 = vadd.f32 %v6624_v24, %v6014_v38 }
 0x456   : > { %v3351_v55 = vmax.f32 %v3319_v63, 0.0  ;;  %v3541_v16 = vadd.f32 %v6221_v43, %v3540_v35  ;;  %v2698_v35 = vpop.f32.mrf.mxu1 }
 0x457   : > { %v2964_v7 = vpop.f32.mrf.mxu3 }
 0x458   : > { %v3616_v13 = vadd.f32 %v3541_v16, %v3367_v27  ;;  %v3006_v12 = vadd.f32 %v2964_v7, %v2728_v11  ;;  %4201 = vmatmul.msk.f32.gmra.mxu0 %vm812_vm1, %v3351_v55  ;;  %v2453_v11 = vadd.f32 %v6213_v59, %v2175_v18  ;;  %v3371_v16 = vld [vmem:[%s4751_s19 + $0x70] sm:$0xff] }
 0x45a   : > { %v3648_v46 = vmax.f32 %v3616_v13, 0.0  ;;  %v3284_v39 = vadd.f32 %v3242_v37, %v3006_v12  ;;  %v3251_v37 = vpop.f32.mrf.mxu2  ;;  %v2732_v25 = vadd.f32 %v2698_v35, %v2453_v11 }
 0x45c   : > { %3680 = vst [vmem:[%s6233_s27 + $0x50] sm:$0xff] %v3648_v46  ;;  %v3320_v29 = vadd.f32 %v6033_v8, %v3284_v39 }
 0x45d   : > { %v3543_v42 = vpop.f32.mrf.mxu0 }
 0x45e   : > { %v3352_v61 = vmax.f32 %v3320_v29, 0.0  ;;  %v3544_v15 = vadd.f32 %v6221_v43, %v3543_v42  ;;  %v3372_v29 = vld [vmem:[%s4751_s19 + $0x78] sm:$0xff] }
 0x45f   : > { %v2967_v41 = vpop.f32.mrf.mxu3 }
 0x460   : > { %v3617_v20 = vadd.f32 %v3544_v15, %v3368_v36  ;;  %v3007_v2 = vadd.f32 %v2967_v41, %v2729_v54  ;;  %4202 = vmatmul.msk.f32.gmra.mxu0 %vm812_vm1, %v3352_v61 }
 0x462   : > { %v3649_v48 = vmax.f32 %v3617_v20, 0.0  ;;  %v3285_v33 = vadd.f32 %v3245_v47, %v3007_v2  ;;  %v3254_v39 = vpop.f32.mrf.mxu2 }
 0x464   : > { %3681 = vst [vmem:[%s6233_s27 + $0x58] sm:$0xff] %v3649_v48  ;;  %v3321_v31 = vadd.f32 %v6033_v8, %v3285_v33 }
 0x465   : > { %v3546_v53 = vpop.f32.mrf.mxu0 }
 0x466   : > { %v3353_v34 = vmax.f32 %v3321_v31, 0.0  ;;  %v3547_v10 = vadd.f32 %v6221_v43, %v3546_v53 }
 0x467   : > { %v2970_v23 = vpop.f32.mrf.mxu3 }
 0x468   : > { %v3618_v44 = vadd.f32 %v3547_v10, %v3369_v14  ;;  %v3008_v58 = vadd.f32 %v2970_v23, %v2730_v57  ;;  %4203 = vmatmul.msk.f32.gmra.mxu0 %vm812_vm1, %v3353_v34  ;;  %v3376_v57 = vld [vmem:[%s4751_s19 + $0x98] sm:$0xff] }
 0x46a   : > { %v3650_v51 = vmax.f32 %v3618_v44, 0.0  ;;  %v3286_v30 = vadd.f32 %v3248_v62, %v3008_v58 }
 0x46c   : > { %3682 = vst [vmem:[%s6233_s27 + $0x60] sm:$0xff] %v3650_v51  ;;  %v3322_v26 = vadd.f32 %v6033_v8, %v3286_v30  ;;  %v3378_v51 = vld [vmem:[%s4751_s19 + $0xa8] sm:$0xff] }
 0x46d   : > { %v3549_v49 = vpop.f32.mrf.mxu0 }
 0x46e   : > { %v3354_v45 = vmax.f32 %v3322_v26, 0.0  ;;  %v3550_v52 = vadd.f32 %v6221_v43, %v3549_v49  ;;  %v3379_v49 = vld [vmem:[%s4751_s19 + $0xb0] sm:$0xff] }
 0x46f   : > { %v2973_v3 = vpop.f32.mrf.mxu3 }
 0x470   : > { %v3619_v63 = vadd.f32 %v3550_v52, %v3370_v17  ;;  %v3009_v5 = vadd.f32 %v2973_v3, %v2731_v40  ;;  %4204 = vmatmul.msk.f32.gmra.mxu0 %vm812_vm1, %v3354_v45  ;;  %v3380_v3 = vld [vmem:[%s4751_s19 + $0xb8] sm:$0xff] }
 0x472   : > { %v3651_v6 = vmax.f32 %v3619_v63, 0.0  ;;  %v3287_v27 = vadd.f32 %v3251_v37, %v3009_v5 }
 0x474   : > { %3683 = vst [vmem:[%s6233_s27 + $0x68] sm:$0xff] %v3651_v6  ;;  %v3323_v55 = vadd.f32 %v6033_v8, %v3287_v27  ;;  %v3381_v6 = vld [vmem:[%s4751_s19 + $0xc0] sm:$0xff] }
 0x475   : > { %v3552_v7 = vpop.f32.mrf.mxu0 }
 0x476   : > { %v3355_v9 = vmax.f32 %v3323_v55, 0.0  ;;  %v3553_v38 = vadd.f32 %v6221_v43, %v3552_v7 }
 0x477   : > { %v2976_v13 = vpop.f32.mrf.mxu3 }
 0x478   : > { %v3620_v12 = vadd.f32 %v3553_v38, %v3371_v16  ;;  %v3010_v46 = vadd.f32 %v2976_v13, %v2732_v25  ;;  %4205 = vmatmul.msk.f32.gmra.mxu0 %vm812_vm1, %v3355_v9  ;;  %v3382_v16 = vld [vmem:[%s4751_s19 + $0xc8] sm:$0xff]  ;;  %v3383_v13 = vld [vmem:[%s4751_s19 + $0xd0] sm:$0xff] }
 0x47a   : > { %v3652_v47 = vmax.f32 %v3620_v12, 0.0  ;;  %v3288_v59 = vadd.f32 %v3254_v39, %v3010_v46 }
 0x47c   : > { %3684 = vst [vmem:[%s6233_s27 + $0x70] sm:$0xff] %v3652_v47  ;;  %v3324_v32 = vadd.f32 %v6033_v8, %v3288_v59  ;;  %v3384_v59 = vld [vmem:[%s4751_s19 + $0xd8] sm:$0xff] }
 0x47d   : > { %v3555_v36 = vpop.f32.mrf.mxu0 }
 0x47e   : > { %v3356_v42 = vmax.f32 %v3324_v32, 0.0  ;;  %v3556_v54 = vadd.f32 %v6221_v43, %v3555_v36 }
 0x480   : > { %v3621_v61 = vadd.f32 %v3556_v54, %v3372_v29  ;;  %4206 = vmatmul.msk.f32.gmra.mxu0 %vm812_vm1, %v3356_v42  ;;  %v3385_v54 = vld [vmem:[%s4751_s19 + $0xe0] sm:$0xff] }
 0x482   : > { %v3653_v15 = vmax.f32 %v3621_v61, 0.0 }
 0x484   : > { %3685 = vst [vmem:[%s6233_s27 + $0x78] sm:$0xff] %v3653_v15 }
 0x485   : > { %v3558_v41 = vpop.f32.mrf.mxu0 }
 0x486   : > { %v3559_v56 = vadd.f32 %v6221_v43, %v3558_v41 }
 0x488   : > { %v3622_v50 = vadd.f32 %v3559_v56, %v3373_v4  ;;  %v3386_v56 = vld [vmem:[%s4751_s19 + $0xe8] sm:$0xff] }
 0x48a   : > { %v3654_v8 = vmax.f32 %v3622_v50, 0.0 }
 0x48c   : > { %3686 = vst [vmem:[%s6233_s27 + $0x80] sm:$0xff] %v3654_v8 }
 0x48d   : > { %v3561_v20 = vpop.f32.mrf.mxu0 }
 0x48e   : > { %v3562_v2 = vadd.f32 %v6221_v43, %v3561_v20 }
 0x490   : > { %v3623_v48 = vadd.f32 %v3562_v2, %v3374_v0  ;;  %v3387_v2 = vld [vmem:[%s4751_s19 + $0xf0] sm:$0xff] }
 0x492   : > { %v3655_v33 = vmax.f32 %v3623_v48, 0.0 }
 0x494   : > { %3687 = vst [vmem:[%s6233_s27 + $0x88] sm:$0xff] %v3655_v33 }
 0x495   : > { %v3564_v31 = vpop.f32.mrf.mxu0 }
 0x496   : > { %v3565_v62 = vadd.f32 %v6221_v43, %v3564_v31 }
 0x498   : > { %v3624_v14 = vadd.f32 %v3565_v62, %v3375_v60  ;;  %v3388_v62 = vld [vmem:[%s4751_s19 + $0xf8] sm:$0xff] }
 0x49a   : > { %v3656_v53 = vmax.f32 %v3624_v14, 0.0 }
 0x49c   : > { %3688 = vst [vmem:[%s6233_s27 + $0x90] sm:$0xff] %v3656_v53 }
 0x49d   : > { %v3567_v34 = vpop.f32.mrf.mxu0 }
 0x49e   : > { %v3568_v10 = vadd.f32 %v6221_v43, %v3567_v34 }
 0x4a0   : > { %v3625_v23 = vadd.f32 %v3568_v10, %v3376_v57 }
 0x4a2   : > { %v3657_v28 = vmax.f32 %v3625_v23, 0.0 }
 0x4a4   : > { %3689 = vst [vmem:[%s6233_s27 + $0x98] sm:$0xff] %v3657_v28 }
 0x4a5   : > { %v3570_v1 = vpop.f32.mrf.mxu0 }
 0x4a6   : > { %v3571_v44 = vadd.f32 %v6221_v43, %v3570_v1 }
 0x4a8   : > { %v3626_v58 = vadd.f32 %v3571_v44, %v3377_v22 }
 0x4aa   : > { %v3658_v21 = vmax.f32 %v3626_v58, 0.0 }
 0x4ac   : > { %3690 = vst [vmem:[%s6233_s27 + $0xa0] sm:$0xff] %v3658_v21 }
 0x4ad   : > { %v3573_v30 = vpop.f32.mrf.mxu0 }
 0x4ae   : > { %v3574_v19 = vadd.f32 %v6221_v43, %v3573_v30 }
 0x4b0   : > { %v3627_v26 = vadd.f32 %v3574_v19, %v3378_v51 }
 0x4b2   : > { %v3659_v17 = vmax.f32 %v3627_v26, 0.0 }
 0x4b4   : > { %3691 = vst [vmem:[%s6233_s27 + $0xa8] sm:$0xff] %v3659_v17 }
 0x4b5   : > { %v3576_v40 = vpop.f32.mrf.mxu0 }
 0x4b6   : > { %v3577_v45 = vadd.f32 %v6221_v43, %v3576_v40 }
 0x4b8   : > { %v3628_v52 = vadd.f32 %v3577_v45, %v3379_v49 }
 0x4ba   : > { %v3660_v37 = vmax.f32 %v3628_v52, 0.0 }
 0x4bc   : > { %3692 = vst [vmem:[%s6233_s27 + $0xb0] sm:$0xff] %v3660_v37 }
 0x4bd   : > { %v3579_v24 = vpop.f32.mrf.mxu0 }
 0x4be   : > { %v3580_v18 = vadd.f32 %v6221_v43, %v3579_v24 }
 0x4c0   : > { %v3629_v63 = vadd.f32 %v3580_v18, %v3380_v3 }
 0x4c2   : > { %v3661_v5 = vmax.f32 %v3629_v63, 0.0 }
 0x4c4   : > { %3693 = vst [vmem:[%s6233_s27 + $0xb8] sm:$0xff] %v3661_v5 }
 0x4c5   : > { %v3582_v27 = vpop.f32.mrf.mxu0 }
 0x4c6   : > { %v3583_v35 = vadd.f32 %v6221_v43, %v3582_v27 }
 0x4c8   : > { %v3630_v11 = vadd.f32 %v3583_v35, %v3381_v6 }
 0x4ca   : > { %v3662_v55 = vmax.f32 %v3630_v11, 0.0 }
 0x4cc   : > { %3694 = vst [vmem:[%s6233_s27 + $0xc0] sm:$0xff] %v3662_v55 }
 0x4cd   : > { %v3585_v7 = vpop.f32.mrf.mxu0 }
 0x4ce   : > { %v3586_v25 = vadd.f32 %v6221_v43, %v3585_v7 }
 0x4d0   : > { %v3631_v9 = vadd.f32 %v3586_v25, %v3382_v16 }
 0x4d2   : > { %v3663_v38 = vmax.f32 %v3631_v9, 0.0 }
 0x4d4   : > { %3695 = vst [vmem:[%s6233_s27 + $0xc8] sm:$0xff] %v3663_v38 }
 0x4d5   : > { %v3588_v12 = vpop.f32.mrf.mxu0 }
 0x4d6   : > { %v3589_v46 = vadd.f32 %v6221_v43, %v3588_v12 }
 0x4d8   : > { %v3632_v39 = vadd.f32 %v3589_v46, %v3383_v13 }
 0x4da   : > { %v3664_v47 = vmax.f32 %v3632_v39, 0.0 }
 0x4dc   : > { %3696 = vst [vmem:[%s6233_s27 + $0xd0] sm:$0xff] %v3664_v47 }
 0x4dd   : > { %v3591_v32 = vpop.f32.mrf.mxu0 }
 0x4de   : > { %v3592_v29 = vadd.f32 %v6221_v43, %v3591_v32 }
 0x4e0   : > { %v3633_v36 = vadd.f32 %v3592_v29, %v3384_v59 }
 0x4e2   : > { %v3665_v42 = vmax.f32 %v3633_v36, 0.0 }
 0x4e4   : > { %3697 = vst [vmem:[%s6233_s27 + $0xd8] sm:$0xff] %v3665_v42 }
 0x4e5   : > { %v3594_v61 = vpop.f32.mrf.mxu0 }
 0x4e6   : > { %v3595_v15 = vadd.f32 %v6221_v43, %v3594_v61 }
 0x4e8   : > { %v3634_v4 = vadd.f32 %v3595_v15, %v3385_v54 }
 0x4ea   : > { %v3666_v41 = vmax.f32 %v3634_v4, 0.0 }
 0x4ec   : > { %3698 = vst [vmem:[%s6233_s27 + $0xe0] sm:$0xff] %v3666_v41 }
 0x4ed   : > { %v3597_v50 = vpop.f32.mrf.mxu0 }
 0x4ee   : > { %v3598_v8 = vadd.f32 %v6221_v43, %v3597_v50 }
 0x4f0   : > { %v3635_v0 = vadd.f32 %v3598_v8, %v3386_v56 }
 0x4f2   : > { %v3667_v20 = vmax.f32 %v3635_v0, 0.0 }
 0x4f4   : > { %3699 = vst [vmem:[%s6233_s27 + $0xe8] sm:$0xff] %v3667_v20 }
 0x4f5   : > { %v3600_v48 = vpop.f32.mrf.mxu0 }
 0x4f6   : > { %v3601_v33 = vadd.f32 %v6221_v43, %v3600_v48 }
 0x4f8   : > { %v3636_v60 = vadd.f32 %v3601_v33, %v3387_v2 }
 0x4fa   : > { %v3668_v31 = vmax.f32 %v3636_v60, 0.0 }
 0x4fc   : > { %3700 = vst [vmem:[%s6233_s27 + $0xf0] sm:$0xff] %v3668_v31 }
 0x4fd   : > { %v3603_v14 = vpop.f32.mrf.mxu0 }
 0x4fe   : > { %v3604_v53 = vadd.f32 %v6221_v43, %v3603_v14 }
 0x500   : > { %v3637_v57 = vadd.f32 %v3604_v53, %v3388_v62 }
 0x502   : > { %v3669_v34 = vmax.f32 %v3637_v57, 0.0 }
 0x504   : > { %3701 = vst [vmem:[%s6233_s27 + $0xf8] sm:$0xff] %v3669_v34 }
 0x505   : > { %4480 = shalt.err (!%p4477_p13)
}
 0x506   : > { %s4549_s11 = smov 128   ;;  %s4550_s22 = smov 8  }
 0x507   : > { %4252 = dma.vmem_to_hbm [thread:$0]  (%p4690_p0), %s3719_s30, 4096, %s3721_s20, %s3703_s14, %s4549_s11, %s4549_s11, %s4550_s22  }
 0x508 PF: > { %s6626_s29 = sld [smem:[#allocation16_spill]]  ;;  %p4269_p3 = pnand %p3871_p4, %p4694_p2 }
 0x509   : > { %s6628_s23 = sld [smem:[#allocation19_spill]] }
 0x50a   : > { %p4270_p5 = pneg %p4269_p3 }
 0x50e   : > { %s3735_s17 = sand.u32 1, %s6626_s29  }
 0x50f   : > { %s3736_s13 = scalar_lea.sflag [#allocation5], %s3735_s17 }
 0x510   : > { %4518 = dma.done.wait (%p4270_p5), %s3736_s13, 4096  }
 0x511   : > { %4520 = vsyncadd (%p4270_p5), %s3736_s13, 4294963200  ;;  %s29_s14 = sadd.s32 1, %s6628_s23   ;;  %s6629_s27 = sld [smem:[#allocation17_spill]] }
 0x512   : > { %p26_p1 = scmp.ge.s32.totalorder %s29_s14, 4   ;;  %s6630_s11 = sld [smem:[#allocation21_spill]] }
 0x513   : > { %s6631_s12 = sld [smem:[#allocation18_spill]]  ;;  %s6633_s30 = smov %s4527_s10 }
 0x514   : > { %s6632_s13 = sld [smem:[#allocation20_spill]]  ;;  %28 = sbr.rel (!%p26_p1) target bundleno = 13 (0xd), region = 140 }
 0x517   : > { %s6634_s10 = smov %s6629_s27 }
 0x519   :  { %3742 = vsyncpa [#allocation4], 1 }
 0x51a   :  { %3744 = vsyncpa [#allocation4 + $0x1], 1 }
 0x51b   :  { %3745 = vsyncpa [#allocation7], 1 }
 0x51c   :  { %3747 = vsyncpa [#allocation7 + $0x1], 1 }
 0x51d   :  { %3748 = vsyncpa [#allocation10], 1 }
 0x51e   :  { %3749 = vsyncpa [#allocation5], 1 }
 0x51f   :  { %3751 = vsyncpa [#allocation5 + $0x1], 1 }

</bundles_post_ra>
